<compile_context>
chip_gen: v7x
topology: tpu7x:2x2x1
jax: 0.10.0
libtpu: 0.0.40
codegen_flags: <defaults>
</compile_context>

<pallas_src>
import numpy as np

import jax
import jax.numpy as jnp
from jax.experimental import pallas as pl
from jax.experimental.pallas import tpu as pltpu


_PACK_ORDER = ("A1", "b1", "A2", "b2", "W1", "c1", "W2", "c2", "W3", "c3")


def _round_up(n, m):
    return ((n + m - 1) // m) * m


def _resident(a):
    """Whole-array VMEM block, same block for every grid step (tiny weights)."""
    nd = a.ndim
    return pl.BlockSpec(a.shape, lambda i, _nd=nd: (0,) * _nd)


# ----------------------------------------------------------------------------
# Fused forward kernel (one batch tile per grid step)
# ----------------------------------------------------------------------------
def _femnist_kernel(x_ref, a1_ref, b1_ref, a2_ref, b2_ref,
                    w1_ref, c1_ref, w2_ref, c2_ref, w3_ref, c3_ref, o_ref):
    f32, bf16 = jnp.float32, jnp.bfloat16
    rows = x_ref.shape[0]          # = tb * 32  (32 zero-padded image rows / sample)
    tb = o_ref.shape[0]            # batch tile size

    def ahead(v, k, axis=0):
        # shifted[r] = v[r + k] along `axis`; the wrapped tail only ever lands on
        # rows / lanes that are never read back with a non-zero weight.
        return jnp.roll(v, -k, axis=axis)

    # ---- conv1 (1->6 ch, 5x5) + bias + ReLU: 5 banded MXU matmuls over the height --
    xb = x_ref[...].astype(bf16)                           # (rows, 32)
    h1 = jnp.dot(xb, a1_ref[0], preferred_element_type=f32)
    for di in range(1, 5):
        h1 = h1 + jnp.dot(ahead(xb, di), a1_ref[di], preferred_element_type=f32)
    h1 = jnp.maximum(h1 + b1_ref[...], 0.0)                # (rows, 192): lane = oj*8+oc

    # ---- fused 2x2 max-pool #1 (valid values stay at even rows / even 8-lane groups)
    h1 = jnp.maximum(h1, ahead(h1, 1))
    h1 = jnp.maximum(h1, ahead(h1, 8, axis=1))
    h1b = h1.astype(bf16)                                  # single cast before shifts

    # ---- conv2 (6->16 ch, 5x5) + bias + ReLU: 5 banded matmuls on the pooled layout
    h2 = jnp.dot(h1b, a2_ref[0], preferred_element_type=f32)
    for di in range(1, 5):
        h2 = h2 + jnp.dot(ahead(h1b, 2 * di), a2_ref[di], preferred_element_type=f32)
    h2 = jnp.maximum(h2 + b2_ref[...], 0.0)                # (rows, 128): lane = qj*16+oc

    # ---- fused 2x2 max-pool #2 (valid at rows b*32 + 4*ri, lane groups 32*rj) ------
    h2 = jnp.maximum(h2, ahead(h2, 2))
    h2 = jnp.maximum(h2, ahead(h2, 16, axis=1))
    h2 = h2.astype(bf16)

    # ---- flatten: gather the 4 valid rows of each sample via one-hot MXU matmuls ---
    # (torch's NCHW flatten permutation is already folded into the packed fc1 weight)
    r_id = jax.lax.broadcasted_iota(jnp.int32, (tb, rows), 1)
    b_id = jax.lax.broadcasted_iota(jnp.int32, (tb, rows), 0)
    local = r_id - b_id * 32                               # row index within the sample
    feat = jnp.concatenate(
        [jnp.dot(jnp.where(local == 4 * ri, 1.0, 0.0).astype(bf16), h2,
                 preferred_element_type=f32)
         for ri in range(4)], axis=1)                      # (tb, 512) f32

    # ---- fc1 -> fc2 -> fc3 (all padded to 128 lanes; padding rows/cols are zero) ---
    z = jnp.dot(feat.astype(bf16), w1_ref[...], preferred_element_type=f32) + c1_ref[...]
    z = jnp.maximum(z, 0.0)
    z = jnp.dot(z.astype(bf16), w2_ref[...], preferred_element_type=f32) + c2_ref[...]
    z = jnp.maximum(z, 0.0)
    z = jnp.dot(z.astype(bf16), w3_ref[...], preferred_element_type=f32) + c3_ref[...]
    o_ref[...] = z.astype(o_ref.dtype)


# ----------------------------------------------------------------------------
# Forward wrapper: batch-tiled grid, parallel semantics, lane-dense output
# ----------------------------------------------------------------------------
def femnist_forward(x_nchw, packed):
    B = x_nchw.shape[0]
    tb = min(32, _round_up(B, 8))             # batch tile: a few MB of VMEM per step
    bp = _round_up(B, tb)

    x = x_nchw.reshape(B, 28, 28).astype(jnp.float32)
    x = jnp.pad(x, ((0, bp - B), (0, 4), (0, 4)))          # H,W 28->32 ; batch -> bp
    x = x.reshape(bp * 32, 32)                             # rows = (sample, image row)

    out = pl.pallas_call(
        _femnist_kernel,
        out_shape=jax.ShapeDtypeStruct((bp, 128), jnp.float32),
        grid=(pl.cdiv(bp, tb),),
        in_specs=[pl.BlockSpec((tb * 32, 32), lambda i: (i, 0))]
                 + [_resident(packed[k]) for k in _PACK_ORDER],
        out_specs=pl.BlockSpec((tb, 128), lambda i: (i, 0)),
        compiler_params=pltpu.CompilerParams(
            dimension_semantics=("parallel",),
            vmem_limit_bytes=32 * 1024 * 1024),
    )(x, *[packed[k] for k in _PACK_ORDER])
    return out[:B, :62]


# ----------------------------------------------------------------------------
# One-time host-side packing of FemnistNet parameters into TPU-friendly matrices
# ----------------------------------------------------------------------------
def pack_params(params):
    w1 = np.asarray(params["w1"], np.float32)     # (6, 1, 5, 5)
    b1 = np.asarray(params["b1"], np.float32)     # (6,)
    w2 = np.asarray(params["w2"], np.float32)     # (16, 6, 5, 5)
    b2 = np.asarray(params["b2"], np.float32)     # (16,)
    f1w = np.asarray(params["fc1_w"], np.float32) # (256, 120)  stored (in, out)
    f1b = np.asarray(params["fc1_b"], np.float32)
    f2w = np.asarray(params["fc2_w"], np.float32) # (120, 84)
    f2b = np.asarray(params["fc2_b"], np.float32)
    f3w = np.asarray(params["fc3_w"], np.float32) # (84, 62)
    f3b = np.asarray(params["fc3_b"], np.float32)

    # conv1 banded matrices: A1[di, w_in, oj*8 + oc] = w1[oc, 0, di, w_in - oj]
    A1 = np.zeros((5, 32, 24 * 8), np.float32)
    for di in range(5):
        for dj in range(5):
            for oj in range(24):
                A1[di, oj + dj, oj * 8:oj * 8 + 6] = w1[:, 0, di, dj]
    b1t = np.zeros((1, 24 * 8), np.float32)
    for oj in range(24):
        b1t[0, oj * 8:oj * 8 + 6] = b1

    # conv2 banded matrices against the un-compacted pooled layout:
    # A2[di, (2*(qj+dj))*8 + cin, qj*16 + oc] = w2[oc, cin, di, dj]
    A2 = np.zeros((5, 24 * 8, 8 * 16), np.float32)
    for di in range(5):
        for dj in range(5):
            for qj in range(8):
                oj = 2 * (qj + dj)
                A2[di, oj * 8:oj * 8 + 6, qj * 16:qj * 16 + 16] = w2[:, :, di, dj].T
    b2t = np.tile(b2, 8)[None, :]                                   # (1, 128)

    # fc1: fold the pooled-row gather + lane selection + NCHW flatten permutation.
    # kernel feature layout: feat[b, ri*128 + 32*rj + oc] = pooled2[b, oc, ri, rj]
    # torch flatten index:   f = oc*16 + ri*4 + rj
    W1 = np.zeros((512, 128), np.float32)
    for ri in range(4):
        for rj in range(4):
            src = np.arange(16) * 16 + ri * 4 + rj
            base = ri * 128 + 32 * rj
            W1[base:base + 16, :120] = f1w[src, :]
    c1 = np.zeros((1, 128), np.float32); c1[0, :120] = f1b
    W2 = np.zeros((128, 128), np.float32); W2[:120, :84] = f2w
    c2 = np.zeros((1, 128), np.float32); c2[0, :84] = f2b
    W3 = np.zeros((128, 128), np.float32); W3[:84, :62] = f3w
    c3 = np.zeros((1, 128), np.float32); c3[0, :62] = f3b

    bf = jnp.bfloat16
    return {
        "A1": jnp.asarray(A1, bf), "b1": jnp.asarray(b1t),
        "A2": jnp.asarray(A2, bf), "b2": jnp.asarray(b2t),
        "W1": jnp.asarray(W1, bf), "c1": jnp.asarray(c1),
        "W2": jnp.asarray(W2, bf), "c2": jnp.asarray(c2),
        "W3": jnp.asarray(W3, bf), "c3": jnp.asarray(c3),
    }


# ----------------------------------------------------------------------------
# Deterministic synthetic parameters (shapes from FemnistNet.__init__).
# NOTE: fc weights are stored (in, out); real torch nn.Linear weights would be
# transposed before packing.
# ----------------------------------------------------------------------------
def init_params(key):
    ks = jax.random.split(key, 10)

    def u(k, shape, fan_in):
        bound = 1.0 / (fan_in ** 0.5)
        return jax.random.uniform(k, shape, jnp.float32, -bound, bound)

    return {
        "w1": u(ks[0], (6, 1, 5, 5), 1 * 5 * 5),    # conv1: Conv2d(1, 6, 5)
        "b1": u(ks[1], (6,), 1 * 5 * 5),
        "w2": u(ks[2], (16, 6, 5, 5), 6 * 5 * 5),   # conv2: Conv2d(6, 16, 5)
        "b2": u(ks[3], (16,), 6 * 5 * 5),
        "fc1_w": u(ks[4], (256, 120), 256),         # stored (in, out)
        "fc1_b": u(ks[5], (120,), 256),
        "fc2_w": u(ks[6], (120, 84), 120),
        "fc2_b": u(ks[7], (84,), 120),
        "fc3_w": u(ks[8], (84, 62), 84),
        "fc3_b": u(ks[9], (62,), 84),
    }


if __name__ == "__main__":
    key = jax.random.PRNGKey(0)
    k_x, k_p = jax.random.split(key)
    # FEMNIST images: 28x28 so the flatten yields 256 features.
    x = jax.random.normal(k_x, (2, 1, 28, 28), dtype=jnp.float32)
    params = init_params(k_p)
    packed = pack_params(params)

    out = jax.jit(femnist_forward)(x, packed)
    out = jax.block_until_ready(out)
    assert out.shape == (2, 62), out.shape
    assert bool(jnp.all(jnp.isfinite(out)))
    print("KERNEL_OK")
</pallas_src>

<mosaic_0001>
module attributes {stable_mosaic.version = 11 : i64} {
  func.func @_femnist_kernel(%arg0: i32, %arg1: memref<256x32xf32, #tpu.memory_space<vmem>>, %arg2: memref<5x32x192xbf16, #tpu.memory_space<vmem>>, %arg3: memref<1x192xf32, #tpu.memory_space<vmem>>, %arg4: memref<5x192x128xbf16, #tpu.memory_space<vmem>>, %arg5: memref<1x128xf32, #tpu.memory_space<vmem>>, %arg6: memref<512x128xbf16, #tpu.memory_space<vmem>>, %arg7: memref<1x128xf32, #tpu.memory_space<vmem>>, %arg8: memref<128x128xbf16, #tpu.memory_space<vmem>>, %arg9: memref<1x128xf32, #tpu.memory_space<vmem>>, %arg10: memref<128x128xbf16, #tpu.memory_space<vmem>>, %arg11: memref<1x128xf32, #tpu.memory_space<vmem>>, %arg12: memref<8x128xf32, #tpu.memory_space<vmem>>) attributes {dimension_semantics = [#tpu.dimension_semantics<parallel>], iteration_bounds = array<i64: 1>, scalar_prefetch = 0 : i64, scratch_operands = 0 : i64, tpu.core_type = #tpu.core_type<tc>, window_params = [{transform_indices = @transform_0, window_bounds = array<i64: 256, 32>}, {pipeline_mode = #tpu.pipeline_mode<synchronous>, transform_indices = @transform_1, window_bounds = array<i64: 5, 32, 192>}, {pipeline_mode = #tpu.pipeline_mode<synchronous>, transform_indices = @transform_2, window_bounds = array<i64: 1, 192>}, {pipeline_mode = #tpu.pipeline_mode<synchronous>, transform_indices = @transform_3, window_bounds = array<i64: 5, 192, 128>}, {pipeline_mode = #tpu.pipeline_mode<synchronous>, transform_indices = @transform_4, window_bounds = array<i64: 1, 128>}, {pipeline_mode = #tpu.pipeline_mode<synchronous>, transform_indices = @transform_5, window_bounds = array<i64: 512, 128>}, {pipeline_mode = #tpu.pipeline_mode<synchronous>, transform_indices = @transform_6, window_bounds = array<i64: 1, 128>}, {pipeline_mode = #tpu.pipeline_mode<synchronous>, transform_indices = @transform_7, window_bounds = array<i64: 128, 128>}, {pipeline_mode = #tpu.pipeline_mode<synchronous>, transform_indices = @transform_8, window_bounds = array<i64: 1, 128>}, {pipeline_mode = #tpu.pipeline_mode<synchronous>, transform_indices = @transform_9, window_bounds = array<i64: 128, 128>}, {pipeline_mode = #tpu.pipeline_mode<synchronous>, transform_indices = @transform_10, window_bounds = array<i64: 1, 128>}, {transform_indices = @transform_11, window_bounds = array<i64: 8, 128>}]} {
    %c0 = arith.constant 0 : index
    %c0_0 = arith.constant 0 : index
    %0 = vector.load %arg1[%c0, %c0_0] : memref<256x32xf32, #tpu.memory_space<vmem>>, vector<256x32xf32>
    %1 = arith.truncf %0 : vector<256x32xf32> to vector<256x32xbf16>
    %c0_1 = arith.constant 0 : index
    %c0_2 = arith.constant 0 : index
    %c0_3 = arith.constant 0 : index
    %2 = vector.load %arg2[%c0_1, %c0_2, %c0_3] : memref<5x32x192xbf16, #tpu.memory_space<vmem>>, vector<1x32x192xbf16>
    %3 = vector.shape_cast %2 : vector<1x32x192xbf16> to vector<32x192xbf16>
    %cst = arith.constant dense<0.000000e+00> : vector<256x192xf32>
    %4 = tpu.matmul %1, %3, %cst {dimension_numbers = #tpu.dot_dimension_numbers<[1], [0], [0], [1], [0, 0, 1, 1], [], []>} : vector<256x32xbf16>, vector<32x192xbf16>, vector<256x192xf32> -> vector<256x192xf32>
    %5 = vector.extract_strided_slice %1 {offsets = [1, 0], sizes = [255, 32], strides = [1, 1]} : vector<256x32xbf16> to vector<255x32xbf16>
    %6 = vector.extract_strided_slice %1 {offsets = [0, 0], sizes = [1, 32], strides = [1, 1]} : vector<256x32xbf16> to vector<1x32xbf16>
    %7 = tpu.concatenate %5, %6 in 0 : vector<255x32xbf16>, vector<1x32xbf16> -> vector<256x32xbf16>
    %c1 = arith.constant 1 : index
    %c0_4 = arith.constant 0 : index
    %c0_5 = arith.constant 0 : index
    %8 = vector.load %arg2[%c1, %c0_4, %c0_5] : memref<5x32x192xbf16, #tpu.memory_space<vmem>>, vector<1x32x192xbf16>
    %9 = vector.shape_cast %8 : vector<1x32x192xbf16> to vector<32x192xbf16>
    %cst_6 = arith.constant dense<0.000000e+00> : vector<256x192xf32>
    %10 = tpu.matmul %7, %9, %cst_6 {dimension_numbers = #tpu.dot_dimension_numbers<[1], [0], [0], [1], [0, 0, 1, 1], [], []>} : vector<256x32xbf16>, vector<32x192xbf16>, vector<256x192xf32> -> vector<256x192xf32>
    %11 = arith.addf %4, %10 : vector<256x192xf32>
    %12 = vector.extract_strided_slice %1 {offsets = [2, 0], sizes = [254, 32], strides = [1, 1]} : vector<256x32xbf16> to vector<254x32xbf16>
    %13 = vector.extract_strided_slice %1 {offsets = [0, 0], sizes = [2, 32], strides = [1, 1]} : vector<256x32xbf16> to vector<2x32xbf16>
    %14 = tpu.concatenate %12, %13 in 0 : vector<254x32xbf16>, vector<2x32xbf16> -> vector<256x32xbf16>
    %c2 = arith.constant 2 : index
    %c0_7 = arith.constant 0 : index
    %c0_8 = arith.constant 0 : index
    %15 = vector.load %arg2[%c2, %c0_7, %c0_8] : memref<5x32x192xbf16, #tpu.memory_space<vmem>>, vector<1x32x192xbf16>
    %16 = vector.shape_cast %15 : vector<1x32x192xbf16> to vector<32x192xbf16>
    %cst_9 = arith.constant dense<0.000000e+00> : vector<256x192xf32>
    %17 = tpu.matmul %14, %16, %cst_9 {dimension_numbers = #tpu.dot_dimension_numbers<[1], [0], [0], [1], [0, 0, 1, 1], [], []>} : vector<256x32xbf16>, vector<32x192xbf16>, vector<256x192xf32> -> vector<256x192xf32>
    %18 = arith.addf %11, %17 : vector<256x192xf32>
    %19 = vector.extract_strided_slice %1 {offsets = [3, 0], sizes = [253, 32], strides = [1, 1]} : vector<256x32xbf16> to vector<253x32xbf16>
    %20 = vector.extract_strided_slice %1 {offsets = [0, 0], sizes = [3, 32], strides = [1, 1]} : vector<256x32xbf16> to vector<3x32xbf16>
    %21 = tpu.concatenate %19, %20 in 0 : vector<253x32xbf16>, vector<3x32xbf16> -> vector<256x32xbf16>
    %c3 = arith.constant 3 : index
    %c0_10 = arith.constant 0 : index
    %c0_11 = arith.constant 0 : index
    %22 = vector.load %arg2[%c3, %c0_10, %c0_11] : memref<5x32x192xbf16, #tpu.memory_space<vmem>>, vector<1x32x192xbf16>
    %23 = vector.shape_cast %22 : vector<1x32x192xbf16> to vector<32x192xbf16>
    %cst_12 = arith.constant dense<0.000000e+00> : vector<256x192xf32>
    %24 = tpu.matmul %21, %23, %cst_12 {dimension_numbers = #tpu.dot_dimension_numbers<[1], [0], [0], [1], [0, 0, 1, 1], [], []>} : vector<256x32xbf16>, vector<32x192xbf16>, vector<256x192xf32> -> vector<256x192xf32>
    %25 = arith.addf %18, %24 : vector<256x192xf32>
    %26 = vector.extract_strided_slice %1 {offsets = [4, 0], sizes = [252, 32], strides = [1, 1]} : vector<256x32xbf16> to vector<252x32xbf16>
    %27 = vector.extract_strided_slice %1 {offsets = [0, 0], sizes = [4, 32], strides = [1, 1]} : vector<256x32xbf16> to vector<4x32xbf16>
    %28 = tpu.concatenate %26, %27 in 0 : vector<252x32xbf16>, vector<4x32xbf16> -> vector<256x32xbf16>
    %c4 = arith.constant 4 : index
    %c0_13 = arith.constant 0 : index
    %c0_14 = arith.constant 0 : index
    %29 = vector.load %arg2[%c4, %c0_13, %c0_14] : memref<5x32x192xbf16, #tpu.memory_space<vmem>>, vector<1x32x192xbf16>
    %30 = vector.shape_cast %29 : vector<1x32x192xbf16> to vector<32x192xbf16>
    %cst_15 = arith.constant dense<0.000000e+00> : vector<256x192xf32>
    %31 = tpu.matmul %28, %30, %cst_15 {dimension_numbers = #tpu.dot_dimension_numbers<[1], [0], [0], [1], [0, 0, 1, 1], [], []>} : vector<256x32xbf16>, vector<32x192xbf16>, vector<256x192xf32> -> vector<256x192xf32>
    %32 = arith.addf %25, %31 : vector<256x192xf32>
    %c0_16 = arith.constant 0 : index
    %c0_17 = arith.constant 0 : index
    %33 = vector.load %arg3[%c0_16, %c0_17] : memref<1x192xf32, #tpu.memory_space<vmem>>, vector<1x192xf32>
    %34 = vector.broadcast %33 : vector<1x192xf32> to vector<256x192xf32>
    %35 = arith.addf %32, %34 : vector<256x192xf32>
    %cst_18 = arith.constant 0.000000e+00 : f32
    %36 = vector.broadcast %cst_18 : f32 to vector<256x192xf32>
    %37 = arith.maximumf %35, %36 : vector<256x192xf32>
    %38 = vector.extract_strided_slice %37 {offsets = [1, 0], sizes = [255, 192], strides = [1, 1]} : vector<256x192xf32> to vector<255x192xf32>
    %39 = vector.extract_strided_slice %37 {offsets = [0, 0], sizes = [1, 192], strides = [1, 1]} : vector<256x192xf32> to vector<1x192xf32>
    %40 = tpu.concatenate %38, %39 in 0 : vector<255x192xf32>, vector<1x192xf32> -> vector<256x192xf32>
    %41 = arith.maximumf %37, %40 : vector<256x192xf32>
    %42 = vector.extract_strided_slice %41 {offsets = [0, 8], sizes = [256, 184], strides = [1, 1]} : vector<256x192xf32> to vector<256x184xf32>
    %43 = vector.extract_strided_slice %41 {offsets = [0, 0], sizes = [256, 8], strides = [1, 1]} : vector<256x192xf32> to vector<256x8xf32>
    %44 = tpu.concatenate %42, %43 in 1 : vector<256x184xf32>, vector<256x8xf32> -> vector<256x192xf32>
    %45 = arith.maximumf %41, %44 : vector<256x192xf32>
    %46 = arith.truncf %45 : vector<256x192xf32> to vector<256x192xbf16>
    %c0_19 = arith.constant 0 : index
    %c0_20 = arith.constant 0 : index
    %c0_21 = arith.constant 0 : index
    %47 = vector.load %arg4[%c0_19, %c0_20, %c0_21] : memref<5x192x128xbf16, #tpu.memory_space<vmem>>, vector<1x192x128xbf16>
    %48 = vector.shape_cast %47 : vector<1x192x128xbf16> to vector<192x128xbf16>
    %cst_22 = arith.constant dense<0.000000e+00> : vector<256x128xf32>
    %49 = tpu.matmul %46, %48, %cst_22 {dimension_numbers = #tpu.dot_dimension_numbers<[1], [0], [0], [1], [0, 0, 1, 1], [], []>} : vector<256x192xbf16>, vector<192x128xbf16>, vector<256x128xf32> -> vector<256x128xf32>
    %50 = vector.extract_strided_slice %46 {offsets = [2, 0], sizes = [254, 192], strides = [1, 1]} : vector<256x192xbf16> to vector<254x192xbf16>
    %51 = vector.extract_strided_slice %46 {offsets = [0, 0], sizes = [2, 192], strides = [1, 1]} : vector<256x192xbf16> to vector<2x192xbf16>
    %52 = tpu.concatenate %50, %51 in 0 : vector<254x192xbf16>, vector<2x192xbf16> -> vector<256x192xbf16>
    %c1_23 = arith.constant 1 : index
    %c0_24 = arith.constant 0 : index
    %c0_25 = arith.constant 0 : index
    %53 = vector.load %arg4[%c1_23, %c0_24, %c0_25] : memref<5x192x128xbf16, #tpu.memory_space<vmem>>, vector<1x192x128xbf16>
    %54 = vector.shape_cast %53 : vector<1x192x128xbf16> to vector<192x128xbf16>
    %cst_26 = arith.constant dense<0.000000e+00> : vector<256x128xf32>
    %55 = tpu.matmul %52, %54, %cst_26 {dimension_numbers = #tpu.dot_dimension_numbers<[1], [0], [0], [1], [0, 0, 1, 1], [], []>} : vector<256x192xbf16>, vector<192x128xbf16>, vector<256x128xf32> -> vector<256x128xf32>
    %56 = arith.addf %49, %55 : vector<256x128xf32>
    %57 = vector.extract_strided_slice %46 {offsets = [4, 0], sizes = [252, 192], strides = [1, 1]} : vector<256x192xbf16> to vector<252x192xbf16>
    %58 = vector.extract_strided_slice %46 {offsets = [0, 0], sizes = [4, 192], strides = [1, 1]} : vector<256x192xbf16> to vector<4x192xbf16>
    %59 = tpu.concatenate %57, %58 in 0 : vector<252x192xbf16>, vector<4x192xbf16> -> vector<256x192xbf16>
    %c2_27 = arith.constant 2 : index
    %c0_28 = arith.constant 0 : index
    %c0_29 = arith.constant 0 : index
    %60 = vector.load %arg4[%c2_27, %c0_28, %c0_29] : memref<5x192x128xbf16, #tpu.memory_space<vmem>>, vector<1x192x128xbf16>
    %61 = vector.shape_cast %60 : vector<1x192x128xbf16> to vector<192x128xbf16>
    %cst_30 = arith.constant dense<0.000000e+00> : vector<256x128xf32>
    %62 = tpu.matmul %59, %61, %cst_30 {dimension_numbers = #tpu.dot_dimension_numbers<[1], [0], [0], [1], [0, 0, 1, 1], [], []>} : vector<256x192xbf16>, vector<192x128xbf16>, vector<256x128xf32> -> vector<256x128xf32>
    %63 = arith.addf %56, %62 : vector<256x128xf32>
    %64 = vector.extract_strided_slice %46 {offsets = [6, 0], sizes = [250, 192], strides = [1, 1]} : vector<256x192xbf16> to vector<250x192xbf16>
    %65 = vector.extract_strided_slice %46 {offsets = [0, 0], sizes = [6, 192], strides = [1, 1]} : vector<256x192xbf16> to vector<6x192xbf16>
    %66 = tpu.concatenate %64, %65 in 0 : vector<250x192xbf16>, vector<6x192xbf16> -> vector<256x192xbf16>
    %c3_31 = arith.constant 3 : index
    %c0_32 = arith.constant 0 : index
    %c0_33 = arith.constant 0 : index
    %67 = vector.load %arg4[%c3_31, %c0_32, %c0_33] : memref<5x192x128xbf16, #tpu.memory_space<vmem>>, vector<1x192x128xbf16>
    %68 = vector.shape_cast %67 : vector<1x192x128xbf16> to vector<192x128xbf16>
    %cst_34 = arith.constant dense<0.000000e+00> : vector<256x128xf32>
    %69 = tpu.matmul %66, %68, %cst_34 {dimension_numbers = #tpu.dot_dimension_numbers<[1], [0], [0], [1], [0, 0, 1, 1], [], []>} : vector<256x192xbf16>, vector<192x128xbf16>, vector<256x128xf32> -> vector<256x128xf32>
    %70 = arith.addf %63, %69 : vector<256x128xf32>
    %71 = vector.extract_strided_slice %46 {offsets = [8, 0], sizes = [248, 192], strides = [1, 1]} : vector<256x192xbf16> to vector<248x192xbf16>
    %72 = vector.extract_strided_slice %46 {offsets = [0, 0], sizes = [8, 192], strides = [1, 1]} : vector<256x192xbf16> to vector<8x192xbf16>
    %73 = tpu.concatenate %71, %72 in 0 : vector<248x192xbf16>, vector<8x192xbf16> -> vector<256x192xbf16>
    %c4_35 = arith.constant 4 : index
    %c0_36 = arith.constant 0 : index
    %c0_37 = arith.constant 0 : index
    %74 = vector.load %arg4[%c4_35, %c0_36, %c0_37] : memref<5x192x128xbf16, #tpu.memory_space<vmem>>, vector<1x192x128xbf16>
    %75 = vector.shape_cast %74 : vector<1x192x128xbf16> to vector<192x128xbf16>
    %cst_38 = arith.constant dense<0.000000e+00> : vector<256x128xf32>
    %76 = tpu.matmul %73, %75, %cst_38 {dimension_numbers = #tpu.dot_dimension_numbers<[1], [0], [0], [1], [0, 0, 1, 1], [], []>} : vector<256x192xbf16>, vector<192x128xbf16>, vector<256x128xf32> -> vector<256x128xf32>
    %77 = arith.addf %70, %76 : vector<256x128xf32>
    %c0_39 = arith.constant 0 : index
    %c0_40 = arith.constant 0 : index
    %78 = vector.load %arg5[%c0_39, %c0_40] : memref<1x128xf32, #tpu.memory_space<vmem>>, vector<1x128xf32>
    %79 = vector.broadcast %78 : vector<1x128xf32> to vector<256x128xf32>
    %80 = arith.addf %77, %79 : vector<256x128xf32>
    %cst_41 = arith.constant 0.000000e+00 : f32
    %81 = vector.broadcast %cst_41 : f32 to vector<256x128xf32>
    %82 = arith.maximumf %80, %81 : vector<256x128xf32>
    %83 = vector.extract_strided_slice %82 {offsets = [2, 0], sizes = [254, 128], strides = [1, 1]} : vector<256x128xf32> to vector<254x128xf32>
    %84 = vector.extract_strided_slice %82 {offsets = [0, 0], sizes = [2, 128], strides = [1, 1]} : vector<256x128xf32> to vector<2x128xf32>
    %85 = tpu.concatenate %83, %84 in 0 : vector<254x128xf32>, vector<2x128xf32> -> vector<256x128xf32>
    %86 = arith.maximumf %82, %85 : vector<256x128xf32>
    %87 = vector.extract_strided_slice %86 {offsets = [0, 16], sizes = [256, 112], strides = [1, 1]} : vector<256x128xf32> to vector<256x112xf32>
    %88 = vector.extract_strided_slice %86 {offsets = [0, 0], sizes = [256, 16], strides = [1, 1]} : vector<256x128xf32> to vector<256x16xf32>
    %89 = tpu.concatenate %87, %88 in 1 : vector<256x112xf32>, vector<256x16xf32> -> vector<256x128xf32>
    %90 = arith.maximumf %86, %89 : vector<256x128xf32>
    %91 = arith.truncf %90 : vector<256x128xf32> to vector<256x128xbf16>
    %92 = tpu.iota {dimensions = array<i32: 1>} : vector<8x256xi32>
    %93 = tpu.iota {dimensions = array<i32: 0>} : vector<8x256xi32>
    %c32_i32 = arith.constant 32 : i32
    %94 = vector.broadcast %c32_i32 : i32 to vector<8x256xi32>
    %95 = arith.muli %93, %94 : vector<8x256xi32>
    %96 = arith.subi %92, %95 : vector<8x256xi32>
    %c0_i32 = arith.constant 0 : i32
    %97 = vector.broadcast %c0_i32 : i32 to vector<8x256xi32>
    %98 = arith.cmpi eq, %96, %97 : vector<8x256xi32>
    %cst_42 = arith.constant 1.000000e+00 : f32
    %cst_43 = arith.constant 0.000000e+00 : f32
    %99 = vector.broadcast %cst_42 : f32 to vector<8x256xf32>
    %100 = vector.broadcast %cst_43 : f32 to vector<8x256xf32>
    %101 = arith.select %98, %99, %100 : vector<8x256xi1>, vector<8x256xf32>
    %102 = arith.truncf %101 : vector<8x256xf32> to vector<8x256xbf16>
    %cst_44 = arith.constant dense<0.000000e+00> : vector<8x128xf32>
    %103 = tpu.matmul %102, %91, %cst_44 {dimension_numbers = #tpu.dot_dimension_numbers<[1], [0], [0], [1], [0, 0, 1, 1], [], []>} : vector<8x256xbf16>, vector<256x128xbf16>, vector<8x128xf32> -> vector<8x128xf32>
    %c4_i32 = arith.constant 4 : i32
    %104 = vector.broadcast %c4_i32 : i32 to vector<8x256xi32>
    %105 = arith.cmpi eq, %96, %104 : vector<8x256xi32>
    %cst_45 = arith.constant 1.000000e+00 : f32
    %cst_46 = arith.constant 0.000000e+00 : f32
    %106 = vector.broadcast %cst_45 : f32 to vector<8x256xf32>
    %107 = vector.broadcast %cst_46 : f32 to vector<8x256xf32>
    %108 = arith.select %105, %106, %107 : vector<8x256xi1>, vector<8x256xf32>
    %109 = arith.truncf %108 : vector<8x256xf32> to vector<8x256xbf16>
    %cst_47 = arith.constant dense<0.000000e+00> : vector<8x128xf32>
    %110 = tpu.matmul %109, %91, %cst_47 {dimension_numbers = #tpu.dot_dimension_numbers<[1], [0], [0], [1], [0, 0, 1, 1], [], []>} : vector<8x256xbf16>, vector<256x128xbf16>, vector<8x128xf32> -> vector<8x128xf32>
    %c8_i32 = arith.constant 8 : i32
    %111 = vector.broadcast %c8_i32 : i32 to vector<8x256xi32>
    %112 = arith.cmpi eq, %96, %111 : vector<8x256xi32>
    %cst_48 = arith.constant 1.000000e+00 : f32
    %cst_49 = arith.constant 0.000000e+00 : f32
    %113 = vector.broadcast %cst_48 : f32 to vector<8x256xf32>
    %114 = vector.broadcast %cst_49 : f32 to vector<8x256xf32>
    %115 = arith.select %112, %113, %114 : vector<8x256xi1>, vector<8x256xf32>
    %116 = arith.truncf %115 : vector<8x256xf32> to vector<8x256xbf16>
    %cst_50 = arith.constant dense<0.000000e+00> : vector<8x128xf32>
    %117 = tpu.matmul %116, %91, %cst_50 {dimension_numbers = #tpu.dot_dimension_numbers<[1], [0], [0], [1], [0, 0, 1, 1], [], []>} : vector<8x256xbf16>, vector<256x128xbf16>, vector<8x128xf32> -> vector<8x128xf32>
    %c12_i32 = arith.constant 12 : i32
    %118 = vector.broadcast %c12_i32 : i32 to vector<8x256xi32>
    %119 = arith.cmpi eq, %96, %118 : vector<8x256xi32>
    %cst_51 = arith.constant 1.000000e+00 : f32
    %cst_52 = arith.constant 0.000000e+00 : f32
    %120 = vector.broadcast %cst_51 : f32 to vector<8x256xf32>
    %121 = vector.broadcast %cst_52 : f32 to vector<8x256xf32>
    %122 = arith.select %119, %120, %121 : vector<8x256xi1>, vector<8x256xf32>
    %123 = arith.truncf %122 : vector<8x256xf32> to vector<8x256xbf16>
    %cst_53 = arith.constant dense<0.000000e+00> : vector<8x128xf32>
    %124 = tpu.matmul %123, %91, %cst_53 {dimension_numbers = #tpu.dot_dimension_numbers<[1], [0], [0], [1], [0, 0, 1, 1], [], []>} : vector<8x256xbf16>, vector<256x128xbf16>, vector<8x128xf32> -> vector<8x128xf32>
    %125 = tpu.concatenate %103, %110, %117, %124 in 1 : vector<8x128xf32>, vector<8x128xf32>, vector<8x128xf32>, vector<8x128xf32> -> vector<8x512xf32>
    %126 = arith.truncf %125 : vector<8x512xf32> to vector<8x512xbf16>
    %c0_54 = arith.constant 0 : index
    %c0_55 = arith.constant 0 : index
    %127 = vector.load %arg6[%c0_54, %c0_55] : memref<512x128xbf16, #tpu.memory_space<vmem>>, vector<512x128xbf16>
    %cst_56 = arith.constant dense<0.000000e+00> : vector<8x128xf32>
    %128 = tpu.matmul %126, %127, %cst_56 {dimension_numbers = #tpu.dot_dimension_numbers<[1], [0], [0], [1], [0, 0, 1, 1], [], []>} : vector<8x512xbf16>, vector<512x128xbf16>, vector<8x128xf32> -> vector<8x128xf32>
    %c0_57 = arith.constant 0 : index
    %c0_58 = arith.constant 0 : index
    %129 = vector.load %arg7[%c0_57, %c0_58] : memref<1x128xf32, #tpu.memory_space<vmem>>, vector<1x128xf32>
    %130 = vector.broadcast %129 : vector<1x128xf32> to vector<8x128xf32>
    %131 = arith.addf %128, %130 : vector<8x128xf32>
    %cst_59 = arith.constant 0.000000e+00 : f32
    %132 = vector.broadcast %cst_59 : f32 to vector<8x128xf32>
    %133 = arith.maximumf %131, %132 : vector<8x128xf32>
    %134 = arith.truncf %133 : vector<8x128xf32> to vector<8x128xbf16>
    %c0_60 = arith.constant 0 : index
    %c0_61 = arith.constant 0 : index
    %135 = vector.load %arg8[%c0_60, %c0_61] : memref<128x128xbf16, #tpu.memory_space<vmem>>, vector<128x128xbf16>
    %cst_62 = arith.constant dense<0.000000e+00> : vector<8x128xf32>
    %136 = tpu.matmul %134, %135, %cst_62 {dimension_numbers = #tpu.dot_dimension_numbers<[1], [0], [0], [1], [0, 0, 1, 1], [], []>} : vector<8x128xbf16>, vector<128x128xbf16>, vector<8x128xf32> -> vector<8x128xf32>
    %c0_63 = arith.constant 0 : index
    %c0_64 = arith.constant 0 : index
    %137 = vector.load %arg9[%c0_63, %c0_64] : memref<1x128xf32, #tpu.memory_space<vmem>>, vector<1x128xf32>
    %138 = vector.broadcast %137 : vector<1x128xf32> to vector<8x128xf32>
    %139 = arith.addf %136, %138 : vector<8x128xf32>
    %cst_65 = arith.constant 0.000000e+00 : f32
    %140 = vector.broadcast %cst_65 : f32 to vector<8x128xf32>
    %141 = arith.maximumf %139, %140 : vector<8x128xf32>
    %142 = arith.truncf %141 : vector<8x128xf32> to vector<8x128xbf16>
    %c0_66 = arith.constant 0 : index
    %c0_67 = arith.constant 0 : index
    %143 = vector.load %arg10[%c0_66, %c0_67] : memref<128x128xbf16, #tpu.memory_space<vmem>>, vector<128x128xbf16>
    %cst_68 = arith.constant dense<0.000000e+00> : vector<8x128xf32>
    %144 = tpu.matmul %142, %143, %cst_68 {dimension_numbers = #tpu.dot_dimension_numbers<[1], [0], [0], [1], [0, 0, 1, 1], [], []>} : vector<8x128xbf16>, vector<128x128xbf16>, vector<8x128xf32> -> vector<8x128xf32>
    %c0_69 = arith.constant 0 : index
    %c0_70 = arith.constant 0 : index
    %145 = vector.load %arg11[%c0_69, %c0_70] : memref<1x128xf32, #tpu.memory_space<vmem>>, vector<1x128xf32>
    %146 = vector.broadcast %145 : vector<1x128xf32> to vector<8x128xf32>
    %147 = arith.addf %144, %146 : vector<8x128xf32>
    %c0_71 = arith.constant 0 : index
    %c0_72 = arith.constant 0 : index
    %148 = vector.load %arg12[%c0_71, %c0_72] : memref<8x128xf32, #tpu.memory_space<vmem>>, vector<8x128xf32>
    tpu.vector_store %arg12[%c0_71, %c0_72], %147 {strides = array<i32>} : memref<8x128xf32, #tpu.memory_space<vmem>>, vector<8x128xf32>,
    return
  }
  func.func @transform_0(%arg0: i32) -> (i32, i32) {
    %c0_i32 = arith.constant 0 : i32
    %c0_i32_0 = arith.constant 0 : i32
    return %arg0, %c0_i32 : i32, i32
  }
  func.func @transform_1(%arg0: i32) -> (i32, i32, i32) {
    %c0_i32 = arith.constant 0 : i32
    %c0_i32_0 = arith.constant 0 : i32
    %c0_i32_1 = arith.constant 0 : i32
    %c0_i32_2 = arith.constant 0 : i32
    return %c0_i32, %c0_i32_0, %c0_i32_1 : i32, i32, i32
  }
  func.func @transform_2(%arg0: i32) -> (i32, i32) {
    %c0_i32 = arith.constant 0 : i32
    %c0_i32_0 = arith.constant 0 : i32
    %c0_i32_1 = arith.constant 0 : i32
    return %c0_i32, %c0_i32_0 : i32, i32
  }
  func.func @transform_3(%arg0: i32) -> (i32, i32, i32) {
    %c0_i32 = arith.constant 0 : i32
    %c0_i32_0 = arith.constant 0 : i32
    %c0_i32_1 = arith.constant 0 : i32
    %c0_i32_2 = arith.constant 0 : i32
    return %c0_i32, %c0_i32_0, %c0_i32_1 : i32, i32, i32
  }
  func.func @transform_4(%arg0: i32) -> (i32, i32) {
    %c0_i32 = arith.constant 0 : i32
    %c0_i32_0 = arith.constant 0 : i32
    %c0_i32_1 = arith.constant 0 : i32
    return %c0_i32, %c0_i32_0 : i32, i32
  }
  func.func @transform_5(%arg0: i32) -> (i32, i32) {
    %c0_i32 = arith.constant 0 : i32
    %c0_i32_0 = arith.constant 0 : i32
    %c0_i32_1 = arith.constant 0 : i32
    return %c0_i32, %c0_i32_0 : i32, i32
  }
  func.func @transform_6(%arg0: i32) -> (i32, i32) {
    %c0_i32 = arith.constant 0 : i32
    %c0_i32_0 = arith.constant 0 : i32
    %c0_i32_1 = arith.constant 0 : i32
    return %c0_i32, %c0_i32_0 : i32, i32
  }
  func.func @transform_7(%arg0: i32) -> (i32, i32) {
    %c0_i32 = arith.constant 0 : i32
    %c0_i32_0 = arith.constant 0 : i32
    %c0_i32_1 = arith.constant 0 : i32
    return %c0_i32, %c0_i32_0 : i32, i32
  }
  func.func @transform_8(%arg0: i32) -> (i32, i32) {
    %c0_i32 = arith.constant 0 : i32
    %c0_i32_0 = arith.constant 0 : i32
    %c0_i32_1 = arith.constant 0 : i32
    return %c0_i32, %c0_i32_0 : i32, i32
  }
  func.func @transform_9(%arg0: i32) -> (i32, i32) {
    %c0_i32 = arith.constant 0 : i32
    %c0_i32_0 = arith.constant 0 : i32
    %c0_i32_1 = arith.constant 0 : i32
    return %c0_i32, %c0_i32_0 : i32, i32
  }
  func.func @transform_10(%arg0: i32) -> (i32, i32) {
    %c0_i32 = arith.constant 0 : i32
    %c0_i32_0 = arith.constant 0 : i32
    %c0_i32_1 = arith.constant 0 : i32
    return %c0_i32, %c0_i32_0 : i32, i32
  }
  func.func @transform_11(%arg0: i32) -> (i32, i32) {
    %c0_i32 = arith.constant 0 : i32
    %c0_i32_0 = arith.constant 0 : i32
    return %arg0, %c0_i32 : i32, i32
  }
}

</mosaic_0001>

<bundles_post_ra>
// kernel: femnist_forward.1
= control target key start
LH: loop header
LB: loop body
LE: loop exit
PB: predicated region body
PF: predicated region fallthrough
CT: control target
= control target key end

     0   :  { %16 = vsyncpa [#allocation3], 0  ;;  %s10176_s0 = inlined_call_operand.vmem [shape: f32[256,32], index: 0, kind: input, shape index: {}]   ;;  %s10177_s1 = inlined_call_operand.hbm [shape: bf16[5,32,192], index: 1, kind: input, shape index: {}]   ;;  %s10178_s2 = inlined_call_operand.vmem [shape: f32[1,192], index: 2, kind: input, shape index: {}]   ;;  %s10179_s3 = inlined_call_operand.vmem [shape: bf16[5,192,128], index: 3, kind: input, shape index: {}]   ;;  %s10180_s4 = inlined_call_operand.vmem [shape: f32[1,128], index: 4, kind: input, shape index: {}]   ;;  %s10181_s5 = inlined_call_operand.hbm [shape: bf16[512,128], index: 5, kind: input, shape index: {}]   ;;  %s10182_s6 = inlined_call_operand.vmem [shape: f32[1,128], index: 6, kind: input, shape index: {}]   ;;  %s10183_s7 = inlined_call_operand.vmem [shape: bf16[128,128], index: 7, kind: input, shape index: {}]   ;;  %s10184_s8 = inlined_call_operand.vmem [shape: f32[1,128], index: 8, kind: input, shape index: {}]   ;;  %s10185_s9 = inlined_call_operand.hbm [shape: bf16[128,128], index: 9, kind: input, shape index: {}]   ;;  %s10186_s10 = inlined_call_operand.vmem [shape: f32[1,128], index: 10, kind: input, shape index: {}]   ;;  %s10187_s11 = inlined_call_operand.vmem [shape: f32[8,128], index: 11, kind: output, shape index: {}]  }
   0x1   :  { %17 = vsyncpa [#allocation5], 0  ;;  %s7463_s17 = smov [#allocation4]   ;;  %s7393_s21 = scalar_lea.hbm %s10181_s5, 4096 }
   0x2   :  { %s43_s18 = sshll.u32 %s7463_s17, 4  ;;  %p7394_p0 = scmp.ne.s32.totalorder %s10181_s5, %s7393_s21  ;;  %s44_s18 = int_to_ptr.vmem [resolvable:$true] %s43_s18 }
   0x3   :  { %p7397_p1 = scmp.lt.u32.totalorder %s7393_s21, %s10181_s5 }
   0x5   :  { %p7399_p2 = pnand %p7397_p1, %p7394_p0 }
   0x7   :  { %7402 = shalt.err (!%p7399_p2)
}
   0x8   :  { %s7403_s26 = scalar_lea.vmem %s44_s18, 4096  ;;  %p7408_p4 = scmp.lt.s32.totalorder %s44_s18, %s44_s18 }
   0x9   :  { %p7404_p3 = scmp.ne.s32.totalorder %s44_s18, %s7403_s26  ;;  %p7409_p5 = scmp.lt.s32.totalorder %s7403_s26, %s7403_s26 }
   0xb   :  { %p7410_p6 = por %p7409_p5, %p7408_p4 }
   0xd   :  { %p7411_p7 = pnand %p7410_p6, %p7404_p3 }
   0xf   :  { %7414 = shalt.err (!%p7411_p7)
}
  0x10   :  { %s7464_s27 = smov 64   ;;  %s7465_s28 = smov 4  }
  0x11   :  { %49 = dma.hbm_to_vmem [thread:$0]  %s10181_s5, 4096, %s44_s18, [#allocation5], %s7464_s27, %s7464_s27, %s7465_s28  }
  0x12   :  { %s7466_s12 = smov [#allocation2]   ;;  %s7415_s16 = scalar_lea.hbm %s10177_s1, 2560 }
  0x13   :  { %s25_s13 = sshll.u32 %s7466_s12, 4  ;;  %p7416_p8 = scmp.ne.s32.totalorder %s10177_s1, %s7415_s16  ;;  %s26_s13 = int_to_ptr.vmem [resolvable:$true] %s25_s13 }
  0x14   :  { %p7419_p9 = scmp.lt.u32.totalorder %s7415_s16, %s10177_s1 }
  0x16   :  { %p7421_p10 = pnand %p7419_p9, %p7416_p8 }
  0x18   :  { %7424 = shalt.err (!%p7421_p10)
}
  0x19   :  { %s7425_s22 = scalar_lea.vmem %s26_s13, 2560  ;;  %p7430_p12 = scmp.lt.s32.totalorder %s26_s13, %s26_s13 }
  0x1a   :  { %p7426_p11 = scmp.ne.s32.totalorder %s26_s13, %s7425_s22  ;;  %p7431_p13 = scmp.lt.s32.totalorder %s7425_s22, %s7425_s22 }
  0x1c   :  { %p7432_p0 = por %p7431_p13, %p7430_p12 }
  0x1e   :  { %p7433_p1 = pnand %p7432_p0, %p7426_p11 }
  0x20   :  { %7436 = shalt.err (!%p7433_p1)
}
  0x21   :  { %s7467_s5 = smov 128   ;;  %s7468_s18 = smov 8  }
  0x22   :  { %31 = dma.hbm_to_vmem [thread:$0]  %s10177_s1, 2560, %s26_s13, [#allocation3], %s7467_s5, %s7467_s5, %s7468_s18  }
  0x23   :  { %s7469_s25 = smov [#allocation6]   ;;  %s7437_s12 = scalar_lea.hbm %s10185_s9, 1024 }
  0x24   :  { %s61_s26 = sshll.u32 %s7469_s25, 4  ;;  %p7438_p2 = scmp.ne.s32.totalorder %s10185_s9, %s7437_s12  ;;  %s62_s26 = int_to_ptr.vmem [resolvable:$true] %s61_s26 }
  0x25   :  { %p7441_p3 = scmp.lt.u32.totalorder %s7437_s12, %s10185_s9 }
  0x27   :  { %p7443_p4 = pnand %p7441_p3, %p7438_p2 }
  0x29   :  { %7446 = shalt.err (!%p7443_p4)
}
  0x2a   :  { %s7447_s19 = scalar_lea.vmem %s62_s26, 1024  ;;  %p7452_p6 = scmp.lt.s32.totalorder %s62_s26, %s62_s26 }
  0x2b   :  { %p7448_p5 = scmp.ne.s32.totalorder %s62_s26, %s7447_s19  ;;  %p7453_p7 = scmp.lt.s32.totalorder %s7447_s19, %s7447_s19 }
  0x2d   :  { %p7454_p8 = por %p7453_p7, %p7452_p6 }
  0x2f   :  { %p7455_p9 = pnand %p7454_p8, %p7448_p5 }
  0x31   :  { %7458 = shalt.err (!%p7455_p9)
}
  0x32   :  { %67 = dma.hbm_to_vmem [thread:$0]  %s10185_s9, 1024, %s62_s26, [#allocation5], %s7464_s27, %s7464_s27, %s7465_s28  }
  0x33   :  { %7459 = dma.done.wait [#allocation3], 2560  }
  0x34   :  { %7460 = vsyncadd [#allocation3], 4294964736 }
  0x35   :  { %7461 = dma.done.wait [#allocation5], 5120  }
  0x36   :  { %7462 = vsyncadd [#allocation5], 4294962176  ;;  %v10189_v0 = vmov 0   ;;  %v7255_v1 = vld [vmem:[#allocation2 + $0x24] ss:$8 sps:$4 sm:$0xff]   ;;  %v82_v7 = vld [vmem:[%s10176_s0 + $0x10] sm:$0xff] }
  0x37   :  { %371 = vmatprep.mubr.bf16.mxu0 %v10189_v0  ;;  %3182 = vmatprep.subr.bf16.mxu1 %v10189_v0  ;;  %v7257_v2 = vld [vmem:[#allocation2 + $0x20] ss:$8 sps:$4 sm:$0xff]   ;;  %v7258_v3 = vld [vmem:[#allocation2 + $0x34] ss:$8 sps:$4 sm:$0xff]   ;;  %v7260_v4 = vld [vmem:[#allocation2 + $0x30] ss:$8 sps:$4 sm:$0xff]  }
  0x38   :  { %339 = vmatprep.subr.bf16.mxu0 %v7255_v1  ;;  %v80_v5 = vld [vmem:[%s10176_s0] sm:$0xff]  ;;  %v81_v6 = vld [vmem:[%s10176_s0 + $0x8] sm:$0xff]  ;;  %v83_v8 = vld [vmem:[%s10176_s0 + $0x18] sm:$0xff]  ;;  %vm132_vm0 = vsmask.f32 7424  ;;  %vm290_vm1 = vcmask 261120  }
  0x39   :  { %340 = vmatpush1.bf16.msra.mxu0 %v7257_v2  ;;  %v7593_v9 = vpack.c.bf16 %v81_v6, %v80_v5  ;;  %v7595_v10 = vpack.c.bf16 %v83_v8, %v82_v7  ;;  %v84_v11 = vld [vmem:[%s10176_s0 + $0x20] sm:$0xff]  ;;  %v85_v12 = vld [vmem:[%s10176_s0 + $0x28] sm:$0xff]  ;;  %v86_v17 = vld [vmem:[%s10176_s0 + $0x30] sm:$0xff]  ;;  %vm262_vm2 = vcmask 1047552   ;;  %vm793_vm4 = vcmask 1046528   ;;  %s7471_s17 = smov 56  }
  0x3a   :  { %341 = vmatprep.subr.bf16.mxu0 %v7258_v3  ;;  %v7606_v16 = vpack.c.bf16 %v85_v12, %v84_v11  ;;  %v87_v18 = vld [vmem:[%s10176_s0 + $0x38] sm:$0xff]  ;;  %v88_v21 = vld [vmem:[%s10176_s0 + $0x40] sm:$0xff]  ;;  %v89_v22 = vld [vmem:[%s10176_s0 + $0x48] sm:$0xff]  ;;  %vm1158_vm5 = vsmask.f32 6400  ;;  %vm1556_vm7 = vcmask 1045504  }
  0x3b   :  { %v134_v13 = vshrl.u32 %v7593_v9, 16  ;;  %v136_v14 = vshll.u32 %v7593_v9, 16  ;;  %v141_v15 = vshll.u32 %v7595_v10, 16  ;;  %v90_v23 = vld [vmem:[%s10176_s0 + $0x50] sm:$0xff]  ;;  %v91_v24 = vld [vmem:[%s10176_s0 + $0x58] sm:$0xff]  ;;  %v145_v26 = vshrl.u32 %v7595_v10, 16  ;;  %vm7768_vm3 = vmand %vm262_vm2, %vm132_vm0 }
  0x3c   :  { %v149_v27 = vshll.u32 %v7606_v16, 16  ;;  %v7637_v28 = vpack.c.bf16 %v87_v18, %v86_v17  ;;  %v92_v29 = vld [vmem:[%s10176_s0 + $0x60] sm:$0xff]  ;;  %v7642_v30 = vpack.c.bf16 %v89_v22, %v88_v21  ;;  %v93_v31 = vld [vmem:[%s10176_s0 + $0x68] sm:$0xff]  ;;  %v7648_v35 = vpack.c.bf16 %v91_v24, %v90_v23  ;;  %v94_v36 = vld [vmem:[%s10176_s0 + $0x70] sm:$0xff]  ;;  %s7472_s19 = smov 120  }
  0x3d   :  { %342 = vmatpush1.bf16.msra.mxu0 %v7260_v4  ;;  %v7616_v19 = vrot.slane %v136_v14, 1  ;;  %v143_v20 = vrot.slane %v141_v15, 1  ;;  %v7261_v32 = vld [vmem:[#allocation2] ss:$8 sps:$4 sm:$0xff]   ;;  %v7263_v33 = vld [vmem:[#allocation2 + $0x4] ss:$8 sps:$4 sm:$0xff]   ;;  %v7666_v42 = vpack.c.bf16 %v93_v31, %v92_v29  ;;  %vm1224_vm6 = vmand %vm793_vm4, %vm1158_vm5 }
  0x3e   :  { %v95_v37 = vld [vmem:[%s10176_s0 + $0x78] sm:$0xff]  ;;  %v96_v38 = vld [vmem:[%s10176_s0 + $0x80] sm:$0xff]  ;;  %584 = vmatprep.subr.bf16.mxu0 %v7263_v33  ;;  %v151_v40 = vrot.slane %v149_v27, 1  ;;  %v157_v41 = vshll.u32 %v7637_v28, 16  ;;  %v97_v43 = vld [vmem:[%s10176_s0 + $0x88] sm:$0xff]  ;;  %v165_v46 = vshll.u32 %v7642_v30, 16 }
  0x3f   :  { %v139_v25 = vor.u32 %v7616_v19, %v134_v13  ;;  %v147_v39 = vor.u32 %v145_v26, %v143_v20  ;;  %v98_v44 = vld [vmem:[%s10176_s0 + $0x90] sm:$0xff]  ;;  %v99_v45 = vld [vmem:[%s10176_s0 + $0x98] sm:$0xff]  ;;  %v100_v47 = vld [vmem:[%s10176_s0 + $0xa0] sm:$0xff]  ;;  %v173_v49 = vshll.u32 %v7648_v35, 16  ;;  %v7685_v50 = vpack.c.bf16 %v95_v37, %v94_v36 }
  0x40   :  { %v101_v48 = vld [vmem:[%s10176_s0 + $0xa8] sm:$0xff]  ;;  %v153_v51 = vshrl.u32 %v7606_v16, 16  ;;  %v161_v52 = vshrl.u32 %v7637_v28, 16  ;;  %v7689_v53 = vpack.c.bf16 %v97_v43, %v96_v38  ;;  %v7691_v54 = vpack.c.bf16 %v99_v45, %v98_v44  ;;  %v7264_v55 = vld [vmem:[#allocation2 + $0x10] ss:$8 sps:$4 sm:$0xff]   ;;  %v104_v11 = vld [vmem:[%s10176_s0 + $0xc0] sm:$0xff] }
  0x41   :  { %v144_v34 = vsel %vm132_vm0, %v139_v25, %v143_v20  ;;  %v7266_v56 = vld [vmem:[#allocation2 + $0x14] ss:$8 sps:$4 sm:$0xff]   ;;  %v152_v57 = vsel %vm132_vm0, %v147_v39, %v151_v40  ;;  %v159_v58 = vrot.slane %v157_v41, 1  ;;  %v181_v59 = vshll.u32 %v7666_v42, 16  ;;  %v105_v12 = vld [vmem:[%s10176_s0 + $0xc8] sm:$0xff] }
  0x42   :  { %6075 = vmatmul.mubr.msk.bf16.vlgmr.msra.gmra.mrb[0].mxu0 %vm290_vm1, %v144_v34  ;;  %v7697_v60 = vpack.c.bf16 %v101_v48, %v100_v47  ;;  %v167_v61 = vrot.slane %v165_v46, 1  ;;  %v169_v62 = vshrl.u32 %v7642_v30, 16  ;;  %v177_v63 = vshrl.u32 %v7648_v35, 16  ;;  %v102_v1 = vld [vmem:[%s10176_s0 + $0xb0] sm:$0xff]  ;;  %v103_v2 = vld [vmem:[%s10176_s0 + $0xb8] sm:$0xff] }
  0x43   :  { %381 = vmatprep.mubr.bf16.mxu0 %v10189_v0  ;;  %585 = vmatpush1.bf16.msra.mxu0 %v7261_v32  ;;  %v175_v3 = vrot.slane %v173_v49, 1  ;;  %v185_v4 = vshrl.u32 %v7666_v42, 16  ;;  %v189_v5 = vshll.u32 %v7685_v50, 16  ;;  %v155_v6 = vor.u32 %v153_v51, %v151_v40  ;;  %v110_v17 = vld [vmem:[%s10176_s0 + $0xf0] sm:$0xff]  ;;  %v111_v18 = vld [vmem:[%s10176_s0 + $0xf8] sm:$0xff] }
  0x44   :  { %586 = vmatprep.subr.bf16.mxu0 %v7266_v56  ;;  %v197_v7 = vshll.u32 %v7689_v53, 16  ;;  %v205_v8 = vshll.u32 %v7691_v54, 16  ;;  %v183_v20 = vrot.slane %v181_v59, 1  ;;  %v213_v21 = vshll.u32 %v7697_v60, 16 }
  0x45   :  { %v193_v22 = vshrl.u32 %v7685_v50, 16  ;;  %v201_v23 = vshrl.u32 %v7689_v53, 16  ;;  %v191_v24 = vrot.slane %v189_v5, 1  ;;  %v209_v25 = vshrl.u32 %v7691_v54, 16 }
  0x46   :  { %v7739_v29 = vpack.c.bf16 %v103_v2, %v102_v1  ;;  %v160_v31 = vsel %vm132_vm0, %v155_v6, %v159_v58  ;;  %v199_v32 = vrot.slane %v197_v7, 1  ;;  %v207_v33 = vrot.slane %v205_v8, 1 }
  0x47   :  { %587 = vmatpush1.bf16.msra.mxu0 %v7264_v55  ;;  %v215_v34 = vrot.slane %v213_v21, 1  ;;  %v217_v36 = vshrl.u32 %v7697_v60, 16  ;;  %v7749_v37 = vpack.c.bf16 %v105_v12, %v104_v11  ;;  %v7751_v38 = vpack.c.bf16 %v111_v18, %v110_v17 }
  0x48   :  { %v221_v39 = vshll.u32 %v7739_v29, 16  ;;  %v225_v40 = vshrl.u32 %v7739_v29, 16  ;;  %v163_v45 = vor.u32 %v161_v52, %v159_v58  ;;  %v171_v1 = vor.u32 %v169_v62, %v167_v61 }
  0x49   :  { %v253_v43 = vshll.u32 %v7751_v38, 16  ;;  %v257_v44 = vshrl.u32 %v7751_v38, 16  ;;  %v229_v47 = vshll.u32 %v7749_v37, 16  ;;  %v179_v6 = vor.u32 %v177_v63, %v175_v3 }
  0x4a   :  { %6076 = vmatmul.mubr.msk.bf16.gmra.mrb[4].mxu0 %vm290_vm1, %v152_v57  ;;  %v168_v57 = vsel %vm132_vm0, %v163_v45, %v167_v61  ;;  %v176_v2 = vsel %vm132_vm0, %v171_v1, %v175_v3  ;;  %v187_v12 = vor.u32 %v185_v4, %v183_v20  ;;  %v195_v17 = vor.u32 %v193_v22, %v191_v24 }
  0x4b   :  { %391 = vmatprep.mubr.bf16.mxu0 %v10189_v0  ;;  %v7764_v48 = vrot.slane %v253_v43, 1  ;;  %v184_v11 = vsel %vm132_vm0, %v179_v6, %v183_v20  ;;  %v203_v18 = vor.u32 %v201_v23, %v199_v32  ;;  %v231_v45 = vrot.slane %v229_v47, 1 }
  0x4c   :  { %v192_v61 = vsel %vm132_vm0, %v187_v12, %v191_v24  ;;  %v200_v3 = vsel %vm132_vm0, %v195_v17, %v199_v32  ;;  %v223_v24 = vrot.slane %v221_v39, 1  ;;  %v219_v32 = vor.u32 %v217_v36, %v215_v34 }
  0x4d   :  { %v7775_v56 = vor.u32 %v257_v44, %v7764_v48  ;;  %v208_v20 = vsel %vm132_vm0, %v203_v18, %v207_v33  ;;  %v109_v18 = vld [vmem:[%s10176_s0 + $0xe8] sm:$0xff]  ;;  %v1159_v55 = vrot.slane %v134_v13, 1  ;;  %vm2768_vm8 = vcmask 457728  }
  0x4e   :  { %v224_v6 = vsel %vm132_vm0, %v219_v32, %v223_v24  ;;  %vm2575_vm9 = vcmask 982016   ;;  %vm3134_vm10 = vcmask 523264   ;;  %vm4045_vm11 = vcmask 1044480  }
  0x4f   :  { %v264_v58 = vsel %vm7768_vm3, %v7775_v56, %v7616_v19  ;;  %v7275_v19 = vld [vmem:[#allocation2 + $0x64] ss:$8 sps:$4 sm:$0xff]   ;;  %v1160_v56 = vrot.slane %v136_v14, 2  ;;  %vm4468_vm12 = vcmask 1043456  }
  0x52   :  { %6077 = vmatmul.mubr.msk.bf16.gmra.mrb[8].mxu0 %vm290_vm1, %v160_v31  ;;  %v211_v31 = vor.u32 %v209_v25, %v207_v33  ;;  %v106_v33 = vld [vmem:[%s10176_s0 + $0xd0] sm:$0xff] }
  0x53   :  { %401 = vmatprep.mubr.bf16.mxu0 %v10189_v0 }
  0x54   :  { %v216_v1 = vsel %vm132_vm0, %v211_v31, %v215_v34 }
  0x5a   :  { %6078 = vmatmul.mubr.msk.bf16.gmra.mrb[12].mxu0 %vm290_vm1, %v168_v57  ;;  %v7269_v57 = vld [vmem:[#allocation2 + $0x44] ss:$8 sps:$4 sm:$0xff]  }
  0x5b   :  { %411 = vmatprep.mubr.bf16.mxu0 %v10189_v0  ;;  %901 = vmatprep.subr.bf16.mxu0 %v7269_v57 }
  0x62   :  { %6079 = vmatmul.mubr.msk.bf16.gmra.mrb[16].mxu0 %vm290_vm1, %v176_v2  ;;  %v107_v2 = vld [vmem:[%s10176_s0 + $0xd8] sm:$0xff] }
  0x63   :  { %421 = vmatprep.mubr.bf16.mxu0 %v10189_v0  ;;  %v7831_v12 = vpack.c.bf16 %v107_v2, %v106_v33 }
  0x65   :  { %v237_v17 = vshll.u32 %v7831_v12, 16 }
  0x67   :  { %v239_v31 = vrot.slane %v237_v17, 1 }
  0x6a   :  { %6080 = vmatmul.mubr.msk.bf16.gmra.mrb[20].mxu0 %vm290_vm1, %v184_v11  ;;  %v227_v11 = vor.u32 %v225_v40, %v223_v24 }
  0x6b   :  { %431 = vmatprep.mubr.bf16.mxu0 %v10189_v0 }
  0x6c   :  { %v232_v34 = vsel %vm132_vm0, %v227_v11, %v231_v45 }
  0x72   :  { %6081 = vmatmul.mubr.msk.bf16.gmra.mrb[24].mxu0 %vm290_vm1, %v192_v61  ;;  %v233_v61 = vshrl.u32 %v7749_v37, 16 }
  0x73   :  { %441 = vmatprep.mubr.bf16.mxu0 %v10189_v0 }
  0x7a   :  { %6082 = vmatmul.mubr.msk.bf16.gmra.mrb[28].mxu0 %vm290_vm1, %v200_v3  ;;  %v108_v3 = vld [vmem:[%s10176_s0 + $0xe0] sm:$0xff] }
  0x7b   :  { %451 = vmatprep.mubr.bf16.mxu0 %v10189_v0  ;;  %v7848_v24 = vpack.c.bf16 %v109_v18, %v108_v3  ;;  %v7267_v3 = vld [vmem:[#allocation2 + $0x40] ss:$8 sps:$4 sm:$0xff]   ;;  %v7272_v18 = vld [vmem:[#allocation2 + $0x54] ss:$8 sps:$4 sm:$0xff]  }
  0x7d   :  { %v245_v32 = vshll.u32 %v7848_v24, 16 }
  0x82   :  { %6083 = vmatmul.mubr.msk.bf16.gmra.mrb[32].mxu0 %vm290_vm1, %v208_v20  ;;  %v235_v20 = vor.u32 %v233_v61, %v231_v45  ;;  %v247_v45 = vrot.slane %v245_v32, 1 }
  0x83   :  { %461 = vmatprep.mubr.bf16.mxu0 %v10189_v0 }
  0x84   :  { %v240_v57 = vsel %vm132_vm0, %v235_v20, %v239_v31  ;;  %v1162_v20 = vrot.slane %v145_v26, 1  ;;  %v7278_v26 = vld [vmem:[#allocation2 + $0x74] ss:$8 sps:$4 sm:$0xff]  }
  0x8a   :  { %6084 = vmatmul.mubr.msk.bf16.gmra.mrb[36].mxu0 %vm290_vm1, %v216_v1  ;;  %v241_v1 = vshrl.u32 %v7831_v12, 16 }
  0x8b   :  { %471 = vmatprep.mubr.bf16.mxu0 %v10189_v0 }
  0x8c   :  { %v243_v33 = vor.u32 %v241_v1, %v239_v31  ;;  %v794_v31 = vrot.slane %v7593_v9, 1 }
  0x8e   :  { %v248_v2 = vsel %vm132_vm0, %v243_v33, %v247_v45  ;;  %v7934_v33 = vor.u32 %v1160_v56, %v1159_v55  ;;  %v805_v56 = vrot.slane %v7666_v42, 1 }
  0x92   :  { %6085 = vmatmul.mubr.msk.bf16.gmra.mrb[40].mxu0 %vm290_vm1, %v224_v6  ;;  %v249_v6 = vshrl.u32 %v7848_v24, 16 }
  0x93   :  { %481 = vmatprep.mubr.bf16.mxu0 %v10189_v0 }
  0x94   :  { %v251_v11 = vor.u32 %v249_v6, %v247_v45  ;;  %v797_v45 = vrot.slane %v7606_v16, 1 }
  0x9a   :  { %6086 = vmatmul.mubr.msk.bf16.gmra.mrb[44].mxu0 %vm290_vm1, %v232_v34  ;;  %v256_v34 = vsel %vm132_vm0, %v251_v11, %v7764_v48  ;;  %v7270_v48 = vld [vmem:[#allocation2 + $0x50] ss:$8 sps:$4 sm:$0xff]  }
  0x9b   :  { %491 = vmatprep.mubr.bf16.mxu0 %v10189_v0 }
  0xa2   :  { %6087 = vmatmul.mubr.msk.bf16.gmra.mrb[48].mxu0 %vm290_vm1, %v240_v57  ;;  %v795_v57 = vrot.slane %v7595_v10, 1 }
  0xa3   :  { %501 = vmatprep.mubr.bf16.mxu0 %v10189_v0 }
  0xa4   :  { %v796_v14 = vsel %vm793_vm4, %v794_v31, %v795_v57  ;;  %v798_v11 = vsel %vm793_vm4, %v795_v57, %v797_v45 }
  0xaa   :  { %6088 = vmatmul.mubr.msk.bf16.gmra.mrb[52].mxu0 %vm290_vm1, %v248_v2  ;;  %v7276_v2 = vld [vmem:[#allocation2 + $0x70] ss:$8 sps:$4 sm:$0xff]  }
  0xab   :  { %511 = vmatprep.mubr.bf16.mxu0 %v10189_v0 }
  0xb2   :  { %6089 = vmatmul.mubr.msk.bf16.gmra.mrb[56].mxu0 %vm290_vm1, %v256_v34  ;;  %v799_v34 = vrot.slane %v7637_v28, 1 }
  0xb3   :  { %521 = vmatprep.mubr.bf16.mxu0 %v10189_v0 }
  0xba   :  { %6090 = vmatmul.mubr.msk.bf16.gmra.mrb[60].mxu0 %vm290_vm1, %v264_v58  ;;  %v1163_v58 = vrot.slane %v141_v15, 2  ;;  %v7273_v15 = vld [vmem:[#allocation2 + $0x60] ss:$8 sps:$4 sm:$0xff]  }
  0xbb   :  { %616 = vmatprep.mubr.bf16.mxu0 %v10189_v0 }
  0xbc   :  { %v7936_v13 = vor.u32 %v1163_v58, %v1162_v20  ;;  %v807_v20 = vrot.slane %v7685_v50, 1 }
  0xbe   :  { %v808_v57 = vsel %vm793_vm4, %v805_v56, %v807_v20 }
  0xc2   :  { %6095 = vmatmul.mubr.msk.bf16.vlgmr.msra.gmra.mrb[0].mxu0 %vm290_vm1, %v7593_v9 }
  0xc3   :  { %626 = vmatprep.mubr.bf16.mxu0 %v10189_v0  ;;  %902 = vmatpush1.bf16.msra.mxu0 %v7267_v3  ;;  %v800_v3 = vsel %vm793_vm4, %v797_v45, %v799_v34 }
  0xc4   :  { %903 = vmatprep.subr.bf16.mxu0 %v7272_v18  ;;  %v801_v18 = vrot.slane %v7642_v30, 1 }
  0xc7   :  { %904 = vmatpush1.bf16.msra.mxu0 %v7270_v48  ;;  %v802_v48 = vsel %vm793_vm4, %v799_v34, %v801_v18 }
  0xc8   :  { %1299 = vmatprep.subr.bf16.mxu0 %v7275_v19  ;;  %v803_v19 = vrot.slane %v7648_v35, 1 }
  0xca   :  { %6096 = vmatmul.mubr.msk.bf16.gmra.mrb[4].mxu0 %vm290_vm1, %v7595_v10  ;;  %v804_v55 = vsel %vm793_vm4, %v801_v18, %v803_v19  ;;  %v806_v58 = vsel %vm793_vm4, %v803_v19, %v805_v56 }
  0xcb   :  { %636 = vmatprep.mubr.bf16.mxu0 %v10189_v0 }
  0xd2   :  { %6097 = vmatmul.mubr.msk.bf16.gmra.mrb[8].mxu0 %vm290_vm1, %v7606_v16 }
  0xd3   :  { %646 = vmatprep.mubr.bf16.mxu0 %v10189_v0 }
  0xda   :  { %6098 = vmatmul.mubr.msk.bf16.gmra.mrb[12].mxu0 %vm290_vm1, %v7637_v28 }
  0xdb   :  { %656 = vmatprep.mubr.bf16.mxu0 %v10189_v0 }
  0xe2   :  { %6099 = vmatmul.mubr.msk.bf16.gmra.mrb[16].mxu0 %vm290_vm1, %v7642_v30 }
  0xe3   :  { %666 = vmatprep.mubr.bf16.mxu0 %v10189_v0 }
  0xea   :  { %6100 = vmatmul.mubr.msk.bf16.gmra.mrb[20].mxu0 %vm290_vm1, %v7648_v35 }
  0xeb   :  { %676 = vmatprep.mubr.bf16.mxu0 %v10189_v0 }
  0xf2   :  { %6101 = vmatmul.mubr.msk.bf16.gmra.mrb[24].mxu0 %vm290_vm1, %v7666_v42 }
  0xf3   :  { %686 = vmatprep.mubr.bf16.mxu0 %v10189_v0 }
  0xfa   :  { %6102 = vmatmul.mubr.msk.bf16.gmra.mrb[28].mxu0 %vm290_vm1, %v7685_v50 }
  0xfb   :  { %696 = vmatprep.mubr.bf16.mxu0 %v10189_v0 }
 0x102   :  { %6103 = vmatmul.mubr.msk.bf16.gmra.mrb[32].mxu0 %vm290_vm1, %v7689_v53 }
 0x103   :  { %706 = vmatprep.mubr.bf16.mxu0 %v10189_v0 }
 0x10a   :  { %6104 = vmatmul.mubr.msk.bf16.gmra.mrb[36].mxu0 %vm290_vm1, %v7691_v54 }
 0x10b   :  { %716 = vmatprep.mubr.bf16.mxu0 %v10189_v0 }
 0x112   :  { %6105 = vmatmul.mubr.msk.bf16.gmra.mrb[40].mxu0 %vm290_vm1, %v7697_v60 }
 0x113   :  { %726 = vmatprep.mubr.bf16.mxu0 %v10189_v0 }
 0x11a   :  { %6106 = vmatmul.mubr.msk.bf16.gmra.mrb[44].mxu0 %vm290_vm1, %v7739_v29 }
 0x11b   :  { %736 = vmatprep.mubr.bf16.mxu0 %v10189_v0 }
 0x122   :  { %6107 = vmatmul.mubr.msk.bf16.gmra.mrb[48].mxu0 %vm290_vm1, %v7749_v37 }
 0x123   :  { %746 = vmatprep.mubr.bf16.mxu0 %v10189_v0 }
 0x12a   :  { %6108 = vmatmul.mubr.msk.bf16.gmra.mrb[52].mxu0 %vm290_vm1, %v7831_v12 }
 0x12b   :  { %756 = vmatprep.mubr.bf16.mxu0 %v10189_v0 }
 0x132   :  { %6109 = vmatmul.mubr.msk.bf16.gmra.mrb[56].mxu0 %vm290_vm1, %v7848_v24 }
 0x133   :  { %766 = vmatprep.mubr.bf16.mxu0 %v10189_v0 }
 0x13a   :  { %6110 = vmatmul.mubr.msk.bf16.gmra.mrb[60].mxu0 %vm290_vm1, %v7751_v38 }
 0x13b   :  { %933 = vmatprep.mubr.bf16.mxu0 %v10189_v0 }
 0x142   :  { %6115 = vmatmul.mubr.msk.bf16.vlgmr.msra.gmra.mrb[0].mxu0 %vm290_vm1, %v796_v14  ;;  %v809_v14 = vrot.slane %v7689_v53, 1 }
 0x143   :  { %943 = vmatprep.mubr.bf16.mxu0 %v10189_v0  ;;  %1300 = vmatpush1.bf16.msra.mxu0 %v7273_v15 }
 0x144   :  { %1301 = vmatprep.subr.bf16.mxu0 %v7278_v26  ;;  %v810_v15 = vsel %vm793_vm4, %v807_v20, %v809_v14  ;;  %v811_v26 = vrot.slane %v7691_v54, 1 }
 0x146   :  { %v812_v45 = vsel %vm793_vm4, %v809_v14, %v811_v26 }
 0x147   :  { %1302 = vmatpush1.bf16.msra.mxu0 %v7276_v2  ;;  %v813_v2 = vrot.slane %v7697_v60, 1 }
 0x149   :  { %v814_v34 = vsel %vm793_vm4, %v811_v26, %v813_v2  ;;  %v1165_v26 = vsel %vm1158_vm5, %v7934_v33, %v7936_v13 }
 0x14a   :  { %6116 = vmatmul.mubr.msk.bf16.gmra.mrb[4].mxu0 %vm290_vm1, %v798_v11  ;;  %v7281_v11 = vld [vmem:[#allocation2 + $0x84] ss:$8 sps:$4 sm:$0xff]  }
 0x14b   :  { %953 = vmatprep.mubr.bf16.mxu0 %v10189_v0  ;;  %1664 = vmatprep.subr.bf16.mxu0 %v7281_v11  ;;  %v7279_v11 = vld [vmem:[#allocation2 + $0x80] ss:$8 sps:$4 sm:$0xff]  }
 0x152   :  { %6117 = vmatmul.mubr.msk.bf16.gmra.mrb[8].mxu0 %vm290_vm1, %v800_v3  ;;  %v815_v3 = vrot.slane %v7739_v29, 1 }
 0x153   :  { %963 = vmatprep.mubr.bf16.mxu0 %v10189_v0 }
 0x154   :  { %v816_v18 = vsel %vm793_vm4, %v813_v2, %v815_v3  ;;  %v1167_v2 = vrot.slane %v149_v27, 2 }
 0x15a   :  { %6118 = vmatmul.mubr.msk.bf16.gmra.mrb[12].mxu0 %vm290_vm1, %v802_v48  ;;  %v817_v48 = vrot.slane %v7749_v37, 1 }
 0x15b   :  { %973 = vmatprep.mubr.bf16.mxu0 %v10189_v0 }
 0x15c   :  { %v818_v19 = vsel %vm793_vm4, %v815_v3, %v817_v48  ;;  %v7282_v3 = vld [vmem:[#allocation2 + $0x90] ss:$8 sps:$4 sm:$0xff]  }
 0x162   :  { %6119 = vmatmul.mubr.msk.bf16.gmra.mrb[16].mxu0 %vm290_vm1, %v804_v55  ;;  %v819_v55 = vrot.slane %v7831_v12, 1 }
 0x163   :  { %983 = vmatprep.mubr.bf16.mxu0 %v10189_v0 }
 0x164   :  { %v820_v56 = vsel %vm793_vm4, %v817_v48, %v819_v55  ;;  %v1170_v48 = vrot.slane %v161_v52, 1 }
 0x16a   :  { %6120 = vmatmul.mubr.msk.bf16.gmra.mrb[20].mxu0 %vm290_vm1, %v806_v58  ;;  %v821_v58 = vrot.slane %v7848_v24, 1 }
 0x16b   :  { %993 = vmatprep.mubr.bf16.mxu0 %v10189_v0 }
 0x16c   :  { %v822_v20 = vsel %vm793_vm4, %v819_v55, %v821_v58  ;;  %v1174_v55 = vrot.slane %v169_v62, 1 }
 0x172   :  { %6121 = vmatmul.mubr.msk.bf16.gmra.mrb[24].mxu0 %vm290_vm1, %v808_v57  ;;  %v823_v57 = vrot.slane %v7751_v38, 1 }
 0x173   :  { %1003 = vmatprep.mubr.bf16.mxu0 %v10189_v0 }
 0x174   :  { %v824_v14 = vsel %vm793_vm4, %v821_v58, %v823_v57  ;;  %v1179_v58 = vrot.slane %v173_v49, 2 }
 0x17a   :  { %6122 = vmatmul.mubr.msk.bf16.gmra.mrb[28].mxu0 %vm290_vm1, %v810_v15  ;;  %v828_v15 = vsel %vm793_vm4, %v823_v57, %v794_v31  ;;  %v1183_v57 = vrot.slane %v181_v59, 2 }
 0x17b   :  { %1013 = vmatprep.mubr.bf16.mxu0 %v10189_v0 }
 0x182   :  { %6123 = vmatmul.mubr.msk.bf16.gmra.mrb[32].mxu0 %vm290_vm1, %v812_v45  ;;  %v1166_v45 = vrot.slane %v153_v51, 1  ;;  %v1171_v51 = vrot.slane %v157_v41, 2 }
 0x183   :  { %1023 = vmatprep.mubr.bf16.mxu0 %v10189_v0 }
 0x184   :  { %v1168_v31 = vor.u32 %v1167_v2, %v1166_v45  ;;  %v1172_v27 = vor.u32 %v1171_v51, %v1170_v48  ;;  %v1191_v45 = vrot.slane %v197_v7, 2  ;;  %v1194_v2 = vrot.slane %v209_v25, 1 }
 0x185   :  { %v1206_v48 = vrot.slane %v233_v61, 1  ;;  %v1207_v51 = vrot.slane %v229_v47, 2 }
 0x18a   :  { %6124 = vmatmul.mubr.msk.bf16.gmra.mrb[36].mxu0 %vm290_vm1, %v814_v34  ;;  %v7284_v34 = vld [vmem:[#allocation2 + $0x94] ss:$8 sps:$4 sm:$0xff]  }
 0x18b   :  { %1033 = vmatprep.mubr.bf16.mxu0 %v10189_v0 }
 0x192   :  { %6125 = vmatmul.mubr.msk.bf16.gmra.mrb[40].mxu0 %vm290_vm1, %v816_v18  ;;  %v1169_v18 = vsel %vm1158_vm5, %v7936_v13, %v1168_v31  ;;  %v1175_v13 = vrot.slane %v165_v46, 2 }
 0x193   :  { %1043 = vmatprep.mubr.bf16.mxu0 %v10189_v0 }
 0x194   :  { %v1176_v52 = vor.u32 %v1175_v13, %v1174_v55  ;;  %v1214_v55 = vrot.slane %v249_v6, 1  ;;  %v1215_v13 = vrot.slane %v245_v32, 2 }
 0x196   :  { %v1177_v41 = vsel %vm1158_vm5, %v1172_v27, %v1176_v52 }
 0x19a   :  { %6126 = vmatmul.mubr.msk.bf16.gmra.mrb[44].mxu0 %vm290_vm1, %v818_v19  ;;  %v1173_v19 = vsel %vm1158_vm5, %v1168_v31, %v1172_v27  ;;  %v1199_v31 = vrot.slane %v213_v21, 2  ;;  %v1210_v27 = vrot.slane %v241_v1, 1  ;;  %v1216_v1 = vor.u32 %v1215_v13, %v1214_v55 }
 0x19b   :  { %1053 = vmatprep.mubr.bf16.mxu0 %v10189_v0 }
 0x1a2   :  { %6127 = vmatmul.mubr.msk.bf16.gmra.mrb[48].mxu0 %vm290_vm1, %v820_v56  ;;  %v1178_v56 = vrot.slane %v177_v63, 1 }
 0x1a3   :  { %1063 = vmatprep.mubr.bf16.mxu0 %v10189_v0 }
 0x1a4   :  { %v1180_v62 = vor.u32 %v1179_v58, %v1178_v56 }
 0x1a6   :  { %v1181_v46 = vsel %vm1158_vm5, %v1176_v52, %v1180_v62  ;;  %v1218_v52 = vrot.slane %v257_v44, 1  ;;  %v1558_v44 = vrot.slane %v7595_v10, 2 }
 0x1aa   :  { %6128 = vmatmul.mubr.msk.bf16.gmra.mrb[52].mxu0 %vm290_vm1, %v822_v20  ;;  %v1182_v20 = vrot.slane %v185_v4, 1 }
 0x1ab   :  { %1073 = vmatprep.mubr.bf16.mxu0 %v10189_v0 }
 0x1ac   :  { %v1184_v63 = vor.u32 %v1183_v57, %v1182_v20  ;;  %v1564_v20 = vrot.slane %v7642_v30, 2  ;;  %v1570_v30 = vrot.slane %v7685_v50, 2  ;;  %v1576_v50 = vrot.slane %v7697_v60, 2 }
 0x1ad   :  { %v1582_v60 = vrot.slane %v7831_v12, 2 }
 0x1ae   :  { %v1185_v49 = vsel %vm1158_vm5, %v1180_v62, %v1184_v63  ;;  %v1560_v62 = vrot.slane %v7606_v16, 2  ;;  %v1566_v16 = vrot.slane %v7648_v35, 2  ;;  %v1572_v35 = vrot.slane %v7689_v53, 2 }
 0x1af   :  { %v1578_v53 = vrot.slane %v7739_v29, 2  ;;  %v1584_v29 = vrot.slane %v7848_v24, 2  ;;  %v7285_v24 = vld [vmem:[%s10179_s3 + $0x60] sm:$0xff]  }
 0x1b0   :  { %3183 = vmatpush1.bf16.msra.mxu1 %v7285_v24 }
 0x1b1   :  { %3184 = vmatprep.subr.bf16.mxu1 %v10189_v0 }
 0x1b2   :  { %6129 = vmatmul.mubr.msk.bf16.gmra.mrb[56].mxu0 %vm290_vm1, %v824_v14  ;;  %v1186_v14 = vrot.slane %v193_v22, 1 }
 0x1b3   :  { %1083 = vmatprep.mubr.bf16.mxu0 %v10189_v0 }
 0x1ba   :  { %6130 = vmatmul.mubr.msk.bf16.gmra.mrb[60].mxu0 %vm290_vm1, %v828_v15  ;;  %v1187_v15 = vrot.slane %v189_v5, 2 }
 0x1bb   :  { %1331 = vmatprep.mubr.bf16.mxu0 %v10189_v0 }
 0x1bc   :  { %v1188_v4 = vor.u32 %v1187_v15, %v1186_v14  ;;  %v1573_v15 = vsel %vm1556_vm7, %v1570_v30, %v1572_v35 }
 0x1be   :  { %v1189_v59 = vsel %vm1158_vm5, %v1184_v63, %v1188_v4  ;;  %v1567_v63 = vsel %vm1556_vm7, %v1564_v20, %v1566_v16 }
 0x1c2   :  { %6135 = vmatmul.mubr.msk.bf16.vlgmr.msra.gmra.mrb[0].mxu0 %vm290_vm1, %v1165_v26  ;;  %v1190_v26 = vrot.slane %v201_v23, 1 }
 0x1c3   :  { %1341 = vmatprep.mubr.bf16.mxu0 %v10189_v0  ;;  %1665 = vmatpush1.bf16.msra.mxu0 %v7279_v11  ;;  %v1195_v11 = vrot.slane %v205_v8, 2 }
 0x1c4   :  { %1666 = vmatprep.subr.bf16.mxu0 %v7284_v34  ;;  %v1192_v22 = vor.u32 %v1191_v45, %v1190_v26  ;;  %v1198_v34 = vrot.slane %v217_v36, 1  ;;  %v1579_v26 = vsel %vm1556_vm7, %v1576_v50, %v1578_v53 }
 0x1c5   :  { %v1196_v23 = vor.u32 %v1195_v11, %v1194_v2  ;;  %v10188_v11 = vlaneseq }
 0x1c6   :  { %v1193_v5 = vsel %vm1158_vm5, %v1188_v4, %v1192_v22  ;;  %v1200_v25 = vor.u32 %v1199_v31, %v1198_v34  ;;  %v1921_v34 = vld [vmem:[%s10178_s2] sm:$0x3] }
 0x1c7   :  { %1667 = vmatpush1.bf16.msra.mxu0 %v7282_v3  ;;  %v1197_v7 = vsel %vm1158_vm5, %v1192_v22, %v1196_v23  ;;  %v1202_v3 = vrot.slane %v225_v40, 1  ;;  %v1208_v40 = vor.u32 %v1207_v51, %v1206_v48 }
 0x1c8   :  { %v1201_v8 = vsel %vm1158_vm5, %v1196_v23, %v1200_v25  ;;  %v8188_v23 = vshrl.u32 %v10188_v11, 7 }
 0x1ca   :  { %6136 = vmatmul.mubr.msk.bf16.gmra.mrb[4].mxu0 %vm290_vm1, %v1169_v18  ;;  %v1203_v18 = vrot.slane %v221_v39, 2  ;;  %10236 = vst [vmem:[#allocation9_spill] sm:$0xff] %v8188_v23  ;;  %v1929_v31 = vsub.s32 1, %v8188_v23 }
 0x1cb   :  { %1351 = vmatprep.mubr.bf16.mxu0 %v10189_v0 }
 0x1cc   :  { %v1204_v36 = vor.u32 %v1203_v18, %v1202_v3  ;;  %v8205_v3 = vrot.slane %v1921_v34, %v1929_v31  ;;  %v7289_v18 = vld [vmem:[%s10179_s3 + $0x80] sm:$0xff]  }
 0x1ce   :  { %v1205_v21 = vsel %vm1158_vm5, %v1200_v25, %v1204_v36  ;;  %v1209_v39 = vsel %vm1158_vm5, %v1204_v36, %v1208_v40  ;;  %v7288_v25 = vld [vmem:[%s10179_s3 + $0x78] sm:$0xff]  }
 0x1d2   :  { %6137 = vmatmul.mubr.msk.bf16.gmra.mrb[8].mxu0 %vm290_vm1, %v1173_v19  ;;  %v1211_v19 = vrot.slane %v237_v17, 2 }
 0x1d3   :  { %1361 = vmatprep.mubr.bf16.mxu0 %v10189_v0 }
 0x1d4   :  { %v1212_v61 = vor.u32 %v1211_v19, %v1210_v27 }
 0x1d6   :  { %v1213_v47 = vsel %vm1158_vm5, %v1208_v40, %v1212_v61  ;;  %v1217_v17 = vsel %vm1158_vm5, %v1212_v61, %v1216_v1  ;;  %v7290_v61 = vld [vmem:[%s10179_s3 + $0x88] sm:$0xff]  }
 0x1da   :  { %6138 = vmatmul.mubr.msk.bf16.gmra.mrb[12].mxu0 %vm290_vm1, %v1177_v41  ;;  %v1219_v41 = vrot.slane %v253_v43, 2  ;;  %v1557_v43 = vrot.slane %v7593_v9, 2  ;;  %v7287_v9 = vld [vmem:[%s10179_s3 + $0x70] sm:$0xff]  }
 0x1db   :  { %1371 = vmatprep.mubr.bf16.mxu0 %v10189_v0 }
 0x1dc   :  { %v1220_v6 = vor.u32 %v1219_v41, %v1218_v52  ;;  %v1559_v58 = vsel %vm1556_vm7, %v1557_v43, %v1558_v44  ;;  %v7291_v41 = vld [vmem:[%s10179_s3 + $0x90] sm:$0xff]  }
 0x1de   :  { %v1221_v32 = vsel %vm1158_vm5, %v1216_v1, %v1220_v6  ;;  %v1225_v56 = vsel %vm1224_vm6, %v1220_v6, %v7934_v33  ;;  %v1561_v33 = vsel %vm1556_vm7, %v1558_v44, %v1560_v62 }
 0x1e2   :  { %6139 = vmatmul.mubr.msk.bf16.gmra.mrb[16].mxu0 %vm290_vm1, %v1181_v46  ;;  %v1562_v46 = vrot.slane %v7637_v28, 2  ;;  %v1568_v28 = vrot.slane %v7666_v42, 2  ;;  %v1574_v42 = vrot.slane %v7691_v54, 2  ;;  %v1580_v54 = vrot.slane %v7749_v37, 2 }
 0x1e3   :  { %1381 = vmatprep.mubr.bf16.mxu0 %v10189_v0  ;;  %v1586_v37 = vrot.slane %v7751_v38, 2  ;;  %v7286_v38 = vld [vmem:[%s10179_s3 + $0x68] sm:$0xff]  }
 0x1e4   :  { %v1563_v10 = vsel %vm1556_vm7, %v1560_v62, %v1562_v46  ;;  %v1565_v57 = vsel %vm1556_vm7, %v1562_v46, %v1564_v20  ;;  %v1571_v14 = vsel %vm1556_vm7, %v1568_v28, %v1570_v30  ;;  %v1575_v4 = vsel %vm1556_vm7, %v1572_v35, %v1574_v42  ;;  %3185 = vmatpush1.bf16.msra.mxu1 %v7286_v38 }
 0x1e5   :  { %v1581_v45 = vsel %vm1556_vm7, %v1578_v53, %v1580_v54  ;;  %v1583_v22 = vsel %vm1556_vm7, %v1580_v54, %v1582_v60  ;;  %v1587_v2 = vsel %vm1556_vm7, %v1584_v29, %v1586_v37  ;;  %v1591_v12 = vsel %vm1556_vm7, %v1586_v37, %v1557_v43  ;;  %3186 = vmatprep.subr.bf16.mxu1 %v10189_v0 }
 0x1e8   :  { %3187 = vmatpush1.bf16.msra.mxu1 %v7287_v9 }
 0x1e9   :  { %3188 = vmatprep.subr.bf16.mxu1 %v10189_v0 }
 0x1ea   :  { %6140 = vmatmul.mubr.msk.bf16.gmra.mrb[20].mxu0 %vm290_vm1, %v1185_v49  ;;  %v1569_v49 = vsel %vm1556_vm7, %v1566_v16, %v1568_v28  ;;  %v7292_v28 = vld [vmem:[%s10179_s3 + $0x98] sm:$0xff]  }
 0x1eb   :  { %1391 = vmatprep.mubr.bf16.mxu0 %v10189_v0 }
 0x1ec   :  { %3189 = vmatpush1.bf16.msra.mxu1 %v7288_v25 }
 0x1ed   :  { %3190 = vmatprep.subr.bf16.mxu1 %v10189_v0 }
 0x1f0   :  { %3191 = vmatpush1.bf16.msra.mxu1 %v7289_v18  ;;  %v7294_v18 = vld [vmem:[%s10179_s3 + $0xa8] sm:$0xff]  }
 0x1f1   :  { %3192 = vmatprep.subr.bf16.mxu1 %v10189_v0 }
 0x1f2   :  { %6141 = vmatmul.mubr.msk.bf16.gmra.mrb[24].mxu0 %vm290_vm1, %v1189_v59  ;;  %v1577_v59 = vsel %vm1556_vm7, %v1574_v42, %v1576_v50 }
 0x1f3   :  { %1401 = vmatprep.mubr.bf16.mxu0 %v10189_v0 }
 0x1f4   :  { %3193 = vmatpush1.bf16.msra.mxu1 %v7290_v61  ;;  %v7295_v61 = vld [vmem:[%s10179_s3 + $0xb0] sm:$0xff]  }
 0x1f5   :  { %3194 = vmatprep.subr.bf16.mxu1 %v10189_v0 }
 0x1f8   :  { %3195 = vmatpush1.bf16.msra.mxu1 %v7291_v41 }
 0x1f9   :  { %3196 = vmatprep.subr.bf16.mxu1 %v10189_v0 }
 0x1fa   :  { %6142 = vmatmul.mubr.msk.bf16.gmra.mrb[28].mxu0 %vm290_vm1, %v1193_v5  ;;  %v1585_v5 = vsel %vm1556_vm7, %v1582_v60, %v1584_v29 }
 0x1fb   :  { %1411 = vmatprep.mubr.bf16.mxu0 %v10189_v0 }
 0x1fc   :  { %3197 = vmatpush1.bf16.msra.mxu1 %v7292_v28  ;;  %v7296_v28 = vld [vmem:[%s10179_s3 + $0xb8] sm:$0xff]  }
 0x1fd   :  { %3198 = vmatprep.subr.bf16.mxu1 %v10189_v0 }
 0x202   :  { %6143 = vmatmul.mubr.msk.bf16.gmra.mrb[32].mxu0 %vm290_vm1, %v1197_v7  ;;  %v1925_v7 = vsub.s32 0, %v8188_v23 }
 0x203   :  { %1421 = vmatprep.mubr.bf16.mxu0 %v10189_v0 }
 0x20a   :  { %6144 = vmatmul.mubr.msk.bf16.gmra.mrb[36].mxu0 %vm290_vm1, %v1201_v8  ;;  %v8203_v8 = vrot.slane %v1921_v34, %v1925_v7 }
 0x20b   :  { %1431 = vmatprep.mubr.bf16.mxu0 %v10189_v0 }
 0x212   :  { %6145 = vmatmul.mubr.msk.bf16.gmra.mrb[40].mxu0 %vm290_vm1, %v1205_v21 }
 0x213   :  { %1441 = vmatprep.mubr.bf16.mxu0 %v10189_v0 }
 0x21a   :  { %6146 = vmatmul.mubr.msk.bf16.gmra.mrb[44].mxu0 %vm290_vm1, %v1209_v39 }
 0x21b   :  { %1451 = vmatprep.mubr.bf16.mxu0 %v10189_v0 }
 0x222   :  { %6147 = vmatmul.mubr.msk.bf16.gmra.mrb[48].mxu0 %vm290_vm1, %v1213_v47 }
 0x223   :  { %1461 = vmatprep.mubr.bf16.mxu0 %v10189_v0 }
 0x22a   :  { %6148 = vmatmul.mubr.msk.bf16.gmra.mrb[52].mxu0 %vm290_vm1, %v1217_v17 }
 0x22b   :  { %1471 = vmatprep.mubr.bf16.mxu0 %v10189_v0 }
 0x232   :  { %6149 = vmatmul.mubr.msk.bf16.gmra.mrb[56].mxu0 %vm290_vm1, %v1221_v32 }
 0x233   :  { %1481 = vmatprep.mubr.bf16.mxu0 %v10189_v0 }
 0x23a   :  { %6150 = vmatmul.mubr.msk.bf16.gmra.mrb[60].mxu0 %vm290_vm1, %v1225_v56 }
 0x23b   :  { %1696 = vmatprep.mubr.bf16.mxu0 %v10189_v0 }
 0x242   :  { %6155 = vmatmul.mubr.msk.bf16.vlgmr.msra.gmra.mrb[0].mxu0 %vm290_vm1, %v1559_v58 }
 0x243   :  { %1706 = vmatprep.mubr.bf16.mxu0 %v10189_v0 }
 0x24a   :  { %6156 = vmatmul.mubr.msk.bf16.gmra.mrb[4].mxu0 %vm290_vm1, %v1561_v33 }
 0x24b   :  { %1716 = vmatprep.mubr.bf16.mxu0 %v10189_v0 }
 0x252   :  { %6157 = vmatmul.mubr.msk.bf16.gmra.mrb[8].mxu0 %vm290_vm1, %v1563_v10 }
 0x253   :  { %1726 = vmatprep.mubr.bf16.mxu0 %v10189_v0 }
 0x25a   :  { %6158 = vmatmul.mubr.msk.bf16.gmra.mrb[12].mxu0 %vm290_vm1, %v1565_v57 }
 0x25b   :  { %1736 = vmatprep.mubr.bf16.mxu0 %v10189_v0 }
 0x262   :  { %6159 = vmatmul.mubr.msk.bf16.gmra.mrb[16].mxu0 %vm290_vm1, %v1567_v63 }
 0x263   :  { %1746 = vmatprep.mubr.bf16.mxu0 %v10189_v0 }
 0x26a   :  { %6160 = vmatmul.mubr.msk.bf16.gmra.mrb[20].mxu0 %vm290_vm1, %v1569_v49 }
 0x26b   :  { %1756 = vmatprep.mubr.bf16.mxu0 %v10189_v0 }
 0x272   :  { %6161 = vmatmul.mubr.msk.bf16.gmra.mrb[24].mxu0 %vm290_vm1, %v1571_v14 }
 0x273   :  { %1766 = vmatprep.mubr.bf16.mxu0 %v10189_v0 }
 0x27a   :  { %6162 = vmatmul.mubr.msk.bf16.gmra.mrb[28].mxu0 %vm290_vm1, %v1573_v15 }
 0x27b   :  { %1776 = vmatprep.mubr.bf16.mxu0 %v10189_v0 }
 0x282   :  { %6163 = vmatmul.mubr.msk.bf16.gmra.mrb[32].mxu0 %vm290_vm1, %v1575_v4 }
 0x283   :  { %1786 = vmatprep.mubr.bf16.mxu0 %v10189_v0 }
 0x28a   :  { %6164 = vmatmul.mubr.msk.bf16.gmra.mrb[36].mxu0 %vm290_vm1, %v1577_v59  ;;  %v7293_v59 = vld [vmem:[%s10179_s3 + $0xa0] sm:$0xff]  }
 0x28b   :  { %1796 = vmatprep.mubr.bf16.mxu0 %v10189_v0  ;;  %3199 = vmatpush1.bf16.msra.mxu1 %v7293_v59 }
 0x28c   :  { %3200 = vmatprep.subr.bf16.mxu1 %v10189_v0 }
 0x28f   :  { %3201 = vmatpush1.bf16.msra.mxu1 %v7294_v18 }
 0x290   :  { %3202 = vmatprep.subr.bf16.mxu1 %v10189_v0 }
 0x292   :  { %6165 = vmatmul.mubr.msk.bf16.gmra.mrb[40].mxu0 %vm290_vm1, %v1579_v26 }
 0x293   :  { %1806 = vmatprep.mubr.bf16.mxu0 %v10189_v0  ;;  %3203 = vmatpush1.bf16.msra.mxu1 %v7295_v61 }
 0x294   :  { %3204 = vmatprep.subr.bf16.mxu1 %v10189_v0 }
 0x297   :  { %3205 = vmatpush1.bf16.msra.mxu1 %v7296_v28 }
 0x298   :  { %3463 = vmatprep.subr.bf16.mxu1 %v10189_v0 }
 0x29a   :  { %6166 = vmatmul.mubr.msk.bf16.gmra.mrb[44].mxu0 %vm290_vm1, %v1581_v45 }
 0x29b   :  { %1816 = vmatprep.mubr.bf16.mxu0 %v10189_v0 }
 0x2a2   :  { %6167 = vmatmul.mubr.msk.bf16.gmra.mrb[48].mxu0 %vm290_vm1, %v1583_v22 }
 0x2a3   :  { %1826 = vmatprep.mubr.bf16.mxu0 %v10189_v0 }
 0x2aa   :  { %6168 = vmatmul.mubr.msk.bf16.gmra.mrb[52].mxu0 %vm290_vm1, %v1585_v5 }
 0x2ab   :  { %1836 = vmatprep.mubr.bf16.mxu0 %v10189_v0 }
 0x2b2   :  { %6169 = vmatmul.mubr.msk.bf16.gmra.mrb[56].mxu0 %vm290_vm1, %v1587_v2 }
 0x2b3   :  { %1846 = vmatprep.mubr.bf16.mxu0 %v10189_v0 }
 0x2ba   :  { %6170 = vmatmul.mubr.msk.bf16.gmra.mrb[60].mxu0 %vm290_vm1, %v1591_v12 }
 0x315   :  { %v1698_v36 = vpop.f32.mrb[0].mxu0 }
 0x316   :  { %v1933_v21 = vadd.f32 %v8203_v8, %v1698_v36  ;;  %v1700_v48 = vpop.f32.mrb[1].mxu0 }
 0x317   :  { %v1934_v51 = vadd.f32 %v8205_v3, %v1700_v48  ;;  %v1702_v40 = vpop.f32.mrb[2].mxu0 }
 0x318   :  { %v1997_v39 = vmax.f32 %v1933_v21, 0.0  ;;  %v1935_v27 = vadd.f32 %v8203_v8, %v1702_v40  ;;  %v1704_v19 = vpop.f32.mrb[3].mxu0 }
 0x319   :  { %v1998_v47 = vmax.f32 %v1934_v51, 0.0  ;;  %v1936_v55 = vadd.f32 %v8205_v3, %v1704_v19 }
 0x31a   :  { %v1999_v13 = vmax.f32 %v1935_v27, 0.0  ;;  %v8220_v17 = vrot.slane %v1997_v39, 1 }
 0x31b   :  { %v2000_v1 = vmax.f32 %v1936_v55, 0.0  ;;  %v8225_v6 = vrot.slane %v1998_v47, 1 }
 0x31c   :  { %v2126_v52 = vrot.slane %v1999_v13, 1 }
 0x31d   :  { %v2129_v32 = vrot.slane %v2000_v1, 1  ;;  %v1708_v56 = vpop.f32.mrb[4].mxu0 }
 0x31e   :  { %v1937_v43 = vadd.f32 %v8203_v8, %v1708_v56  ;;  %v1710_v44 = vpop.f32.mrb[5].mxu0  ;;  %v2127_v58 = vsel %vm793_vm4, %v8220_v17, %v2126_v52 }
 0x31f   :  { %v1938_v62 = vadd.f32 %v8205_v3, %v1710_v44  ;;  %v1712_v33 = vpop.f32.mrb[6].mxu0  ;;  %v8231_v46 = vmax.f32 %v1997_v39, %v2127_v58  ;;  %v2130_v10 = vsel %vm793_vm4, %v8225_v6, %v2129_v32 }
 0x320   :  { %v2001_v20 = vmax.f32 %v1937_v43, 0.0  ;;  %v1939_v57 = vadd.f32 %v8203_v8, %v1712_v33  ;;  %v1714_v16 = vpop.f32.mrb[7].mxu0  ;;  %v8237_v63 = vmax.f32 %v1998_v47, %v2130_v10 }
 0x321   :  { %v2002_v49 = vmax.f32 %v1938_v62, 0.0  ;;  %v1940_v30 = vadd.f32 %v8205_v3, %v1714_v16 }
 0x322   :  { %v2131_v14 = vrot.slane %v2001_v20, 1  ;;  %v2003_v35 = vmax.f32 %v1939_v57, 0.0 }
 0x323   :  { %v2133_v15 = vrot.slane %v2002_v49, 1  ;;  %v2004_v42 = vmax.f32 %v1940_v30, 0.0 }
 0x324   :  { %v2135_v4 = vrot.slane %v2003_v35, 1  ;;  %v2132_v50 = vsel %vm793_vm4, %v2126_v52, %v2131_v14 }
 0x325   :  { %v2137_v53 = vrot.slane %v2004_v42, 1  ;;  %v1718_v26 = vpop.f32.mrb[8].mxu0  ;;  %v8248_v54 = vmax.f32 %v1999_v13, %v2132_v50  ;;  %v2134_v45 = vsel %vm793_vm4, %v2129_v32, %v2133_v15 }
 0x326   :  { %v2136_v60 = vsel %vm793_vm4, %v2131_v14, %v2135_v4  ;;  %v1941_v22 = vadd.f32 %v8203_v8, %v1718_v26  ;;  %v1720_v29 = vpop.f32.mrb[9].mxu0  ;;  %v8253_v5 = vmax.f32 %v2000_v1, %v2134_v45 }
 0x327   :  { %v1942_v37 = vadd.f32 %v8205_v3, %v1720_v29  ;;  %v1722_v2 = vpop.f32.mrb[10].mxu0  ;;  %v8258_v12 = vpack.i.bf16 %v8248_v54, %v8231_v46  ;;  %v8260_v24 = vmax.f32 %v2001_v20, %v2136_v60  ;;  %v2138_v38 = vsel %vm793_vm4, %v2133_v15, %v2137_v53 }
 0x328   :  { %v2005_v9 = vmax.f32 %v1941_v22, 0.0  ;;  %v1943_v7 = vadd.f32 %v8203_v8, %v1722_v2  ;;  %v1724_v34 = vpop.f32.mrb[11].mxu0  ;;  %v6940_v31 = vpack.i.bf16 %v8253_v5, %v8237_v63  ;;  %v8267_v25 = vmax.f32 %v2002_v49, %v2138_v38 }
 0x329   :  { %v2006_v36 = vmax.f32 %v1942_v37, 0.0  ;;  %v1944_v21 = vadd.f32 %v8205_v3, %v1724_v34  ;;  %6936 = vrot.lane.b32.xlu1 %v8258_v12, %s7471_s17 }
 0x32a   :  { %v2139_v48 = vrot.slane %v2005_v9, 1  ;;  %v2007_v51 = vmax.f32 %v1943_v7, 0.0  ;;  %6941 = vrot.lane.b32.xlu0 %v6940_v31, %s7472_s19 }
 0x32b   :  { %v2141_v40 = vrot.slane %v2006_v36, 1  ;;  %v2008_v39 = vmax.f32 %v1944_v21, 0.0 }
 0x32c   :  { %v2140_v27 = vsel %vm793_vm4, %v2135_v4, %v2139_v48  ;;  %v2143_v19 = vrot.slane %v2007_v51, 1 }
 0x32d   :  { %v2145_v47 = vrot.slane %v2008_v39, 1  ;;  %v1728_v55 = vpop.f32.mrb[12].mxu0  ;;  %v8281_v13 = vmax.f32 %v2003_v35, %v2140_v27  ;;  %v2142_v1 = vsel %vm793_vm4, %v2137_v53, %v2141_v40 }
 0x32e   :  { %v2144_v52 = vsel %vm793_vm4, %v2139_v48, %v2143_v19  ;;  %v1945_v41 = vadd.f32 %v8203_v8, %v1728_v55  ;;  %v1730_v32 = vpop.f32.mrb[13].mxu0  ;;  %v8286_v56 = vmax.f32 %v2004_v42, %v2142_v1 }
 0x32f   :  { %v1946_v43 = vadd.f32 %v8205_v3, %v1730_v32  ;;  %v1732_v44 = vpop.f32.mrb[14].mxu0  ;;  %v6945_v58 = vpack.i.bf16 %v8281_v13, %v8260_v24  ;;  %v8291_v62 = vmax.f32 %v2005_v9, %v2144_v52  ;;  %v2146_v16 = vsel %vm793_vm4, %v2141_v40, %v2145_v47 }
 0x330   :  { %v2009_v33 = vmax.f32 %v1945_v41, 0.0  ;;  %v1947_v10 = vadd.f32 %v8203_v8, %v1732_v44  ;;  %v1734_v20 = vpop.f32.mrb[15].mxu0  ;;  %v6950_v57 = vpack.i.bf16 %v8286_v56, %v8267_v25  ;;  %v8303_v14 = vmax.f32 %v2006_v36, %v2146_v16 }
 0x331   :  { %v2010_v49 = vmax.f32 %v1946_v43, 0.0  ;;  %v1948_v30 = vadd.f32 %v8205_v3, %v1734_v20  ;;  %6946 = vrot.lane.b32.xlu1 %v6945_v58, %s7471_s17 }
 0x332   :  { %v2147_v35 = vrot.slane %v2009_v33, 1  ;;  %v2011_v15 = vmax.f32 %v1947_v10, 0.0  ;;  %6951 = vrot.lane.b32.xlu0 %v6950_v57, %s7472_s19 }
 0x333   :  { %v2149_v42 = vrot.slane %v2010_v49, 1  ;;  %v2012_v4 = vmax.f32 %v1948_v30, 0.0 }
 0x334   :  { %v2148_v50 = vsel %vm793_vm4, %v2143_v19, %v2147_v35  ;;  %v2151_v59 = vrot.slane %v2011_v15, 1 }
 0x335   :  { %v2153_v53 = vrot.slane %v2012_v4, 1  ;;  %6961 = vrot.lane.b32.xlu1 %v6945_v58, %s7472_s19  ;;  %v1738_v26 = vpop.f32.mrb[16].mxu0  ;;  %v8309_v45 = vmax.f32 %v2007_v51, %v2148_v50  ;;  %v2150_v60 = vsel %vm793_vm4, %v2145_v47, %v2149_v42 }
 0x336   :  { %v2152_v22 = vsel %vm793_vm4, %v2147_v35, %v2151_v59  ;;  %v1949_v29 = vadd.f32 %v8203_v8, %v1738_v26  ;;  %6956 = vrot.lane.b32.xlu0 %v8258_v12, %s7472_s19  ;;  %v1740_v37 = vpop.f32.mrb[17].mxu0  ;;  %v8316_v2 = vmax.f32 %v2008_v39, %v2150_v60 }
 0x337   :  { %v1950_v38 = vadd.f32 %v8205_v3, %v1740_v37  ;;  %v1742_v9 = vpop.f32.mrb[18].mxu0  ;;  %v6965_v7 = vpack.i.bf16 %v8309_v45, %v8291_v62  ;;  %v8321_v34 = vmax.f32 %v2009_v33, %v2152_v22  ;;  %v2154_v12 = vsel %vm793_vm4, %v2149_v42, %v2153_v53 }
 0x338   :  { %v2013_v31 = vmax.f32 %v1949_v29, 0.0  ;;  %v1951_v18 = vadd.f32 %v8203_v8, %v1742_v9  ;;  %v1744_v36 = vpop.f32.mrb[19].mxu0  ;;  %v6970_v21 = vpack.i.bf16 %v8316_v2, %v8303_v14  ;;  %v8329_v40 = vmax.f32 %v2010_v49, %v2154_v12 }
 0x339   :  { %v2014_v48 = vmax.f32 %v1950_v38, 0.0  ;;  %v1952_v51 = vadd.f32 %v8205_v3, %v1744_v36  ;;  %6966 = vrot.lane.b32.xlu1 %v6965_v7, %s7471_s17 }
 0x33a   :  { %v2155_v39 = vrot.slane %v2013_v31, 1  ;;  %v2015_v27 = vmax.f32 %v1951_v18, 0.0  ;;  %6971 = vrot.lane.b32.xlu0 %v6970_v21, %s7472_s19 }
 0x33b   :  { %v2157_v19 = vrot.slane %v2014_v48, 1  ;;  %v2016_v61 = vmax.f32 %v1952_v51, 0.0 }
 0x33c   :  { %v2156_v47 = vsel %vm793_vm4, %v2151_v59, %v2155_v39  ;;  %v2159_v55 = vrot.slane %v2015_v27, 1 }
 0x33d   :  { %v2161_v1 = vrot.slane %v2016_v61, 1  ;;  %v1748_v52 = vpop.f32.mrb[20].mxu0  ;;  %v8333_v41 = vmax.f32 %v2011_v15, %v2156_v47  ;;  %v2158_v32 = vsel %vm793_vm4, %v2153_v53, %v2157_v19 }
 0x33e   :  { %v2160_v43 = vsel %vm793_vm4, %v2155_v39, %v2159_v55  ;;  %v1953_v44 = vadd.f32 %v8203_v8, %v1748_v52  ;;  %6976 = vrot.lane.b32.xlu0 %v6965_v7, %s7472_s19  ;;  %v1750_v58 = vpop.f32.mrb[21].mxu0  ;;  %v8339_v33 = vmax.f32 %v2012_v4, %v2158_v32 }
 0x33f   :  { %v1954_v10 = vadd.f32 %v8205_v3, %v1750_v58  ;;  %v1752_v20 = vpop.f32.mrb[22].mxu0  ;;  %v6980_v57 = vpack.i.bf16 %v8333_v41, %v8321_v34  ;;  %v8344_v16 = vmax.f32 %v2013_v31, %v2160_v43  ;;  %v2162_v15 = vsel %vm793_vm4, %v2157_v19, %v2161_v1 }
 0x340   :  { %v2017_v28 = vmax.f32 %v1953_v44, 0.0  ;;  %v1955_v49 = vadd.f32 %v8203_v8, %v1752_v20  ;;  %v1754_v30 = vpop.f32.mrb[23].mxu0  ;;  %v6985_v35 = vpack.i.bf16 %v8339_v33, %v8329_v40  ;;  %v8351_v50 = vmax.f32 %v2014_v48, %v2162_v15 }
 0x341   :  { %v2018_v42 = vmax.f32 %v1954_v10, 0.0  ;;  %v1956_v4 = vadd.f32 %v8205_v3, %v1754_v30 }
 0x342   :  { %v2163_v59 = vrot.slane %v2017_v28, 1  ;;  %v2019_v53 = vmax.f32 %v1955_v49, 0.0  ;;  %6981 = vrot.lane.b32.xlu0 %v6980_v57, %s7471_s17  ;;  %6986 = vrot.lane.b32.xlu1 %v6985_v35, %s7472_s19 }
 0x343   :  { %v2165_v26 = vrot.slane %v2018_v42, 1  ;;  %v2020_v60 = vmax.f32 %v1956_v4, 0.0 }
 0x344   :  { %v2164_v22 = vsel %vm793_vm4, %v2159_v55, %v2163_v59  ;;  %v2167_v29 = vrot.slane %v2019_v53, 1 }
 0x345   :  { %v2169_v37 = vrot.slane %v2020_v60, 1  ;;  %v1758_v38 = vpop.f32.mrb[24].mxu0  ;;  %v8356_v9 = vmax.f32 %v2015_v27, %v2164_v22  ;;  %v2166_v7 = vsel %vm793_vm4, %v2161_v1, %v2165_v26 }
 0x346   :  { %v2168_v31 = vsel %vm793_vm4, %v2163_v59, %v2167_v29  ;;  %v1957_v18 = vadd.f32 %v8203_v8, %v1758_v38  ;;  %6991 = vrot.lane.b32.xlu1 %v6980_v57, %s7472_s19  ;;  %v1760_v36 = vpop.f32.mrb[25].mxu0  ;;  %v8362_v21 = vmax.f32 %v2016_v61, %v2166_v7 }
 0x347   :  { %v1958_v12 = vadd.f32 %v8205_v3, %v1760_v36  ;;  %v1762_v48 = vpop.f32.mrb[26].mxu0  ;;  %v6995_v51 = vpack.i.bf16 %v8356_v9, %v8344_v16  ;;  %v8367_v39 = vmax.f32 %v2017_v28, %v2168_v31  ;;  %v2170_v1 = vsel %vm793_vm4, %v2165_v26, %v2169_v37 }
 0x348   :  { %v2021_v27 = vmax.f32 %v1957_v18, 0.0  ;;  %v1959_v19 = vadd.f32 %v8203_v8, %v1762_v48  ;;  %v1764_v47 = vpop.f32.mrb[27].mxu0  ;;  %v7000_v55 = vpack.i.bf16 %v8362_v21, %v8351_v50  ;;  %v8374_v32 = vmax.f32 %v2018_v42, %v2170_v1 }
 0x349   :  { %v2022_v52 = vmax.f32 %v1958_v12, 0.0  ;;  %v1960_v61 = vadd.f32 %v8205_v3, %v1764_v47 }
 0x34a   :  { %v2171_v43 = vrot.slane %v2021_v27, 1  ;;  %v2023_v44 = vmax.f32 %v1959_v19, 0.0  ;;  %6996 = vrot.lane.b32.xlu1 %v6995_v51, %s7471_s17  ;;  %7001 = vrot.lane.b32.xlu0 %v7000_v55, %s7472_s19 }
 0x34b   :  { %v2173_v58 = vrot.slane %v2022_v52, 1  ;;  %v2024_v10 = vmax.f32 %v1960_v61, 0.0 }
 0x34c   :  { %v2172_v20 = vsel %vm793_vm4, %v2167_v29, %v2171_v43  ;;  %v2175_v57 = vrot.slane %v2023_v44, 1 }
 0x34d   :  { %v2177_v28 = vrot.slane %v2024_v10, 1  ;;  %v1768_v49 = vpop.f32.mrb[28].mxu0  ;;  %v8379_v30 = vmax.f32 %v2019_v53, %v2172_v20  ;;  %v2174_v35 = vsel %vm793_vm4, %v2169_v37, %v2173_v58 }
 0x34e   :  { %v2176_v15 = vsel %vm793_vm4, %v2171_v43, %v2175_v57  ;;  %v1961_v42 = vadd.f32 %v8203_v8, %v1768_v49  ;;  %7006 = vrot.lane.b32.xlu0 %v6995_v51, %s7472_s19  ;;  %v1770_v4 = vpop.f32.mrb[29].mxu0  ;;  %v8385_v59 = vmax.f32 %v2020_v60, %v2174_v35 }
 0x34f   :  { %v1962_v26 = vadd.f32 %v8205_v3, %v1770_v4  ;;  %v1772_v22 = vpop.f32.mrb[30].mxu0  ;;  %v7010_v29 = vpack.i.bf16 %v8379_v30, %v8367_v39  ;;  %v8390_v38 = vmax.f32 %v2021_v27, %v2176_v15  ;;  %v2178_v18 = vsel %vm793_vm4, %v2173_v58, %v2177_v28 }
 0x350   :  { %v2025_v53 = vmax.f32 %v1961_v42, 0.0  ;;  %v1963_v37 = vadd.f32 %v8203_v8, %v1772_v22  ;;  %v1774_v7 = vpop.f32.mrb[31].mxu0  ;;  %v7015_v31 = vpack.i.bf16 %v8385_v59, %v8374_v32  ;;  %v8397_v12 = vmax.f32 %v2022_v52, %v2178_v18 }
 0x351   :  { %v2026_v36 = vmax.f32 %v1962_v26, 0.0  ;;  %v1964_v60 = vadd.f32 %v8205_v3, %v1774_v7 }
 0x352   :  { %v2179_v48 = vrot.slane %v2025_v53, 1  ;;  %v2027_v51 = vmax.f32 %v1963_v37, 0.0  ;;  %7011 = vrot.lane.b32.xlu0 %v7010_v29, %s7471_s17  ;;  %7016 = vrot.lane.b32.xlu1 %v7015_v31, %s7472_s19 }
 0x353   :  { %v2181_v27 = vrot.slane %v2026_v36, 1  ;;  %v2028_v19 = vmax.f32 %v1964_v60, 0.0 }
 0x354   :  { %v2180_v47 = vsel %vm793_vm4, %v2175_v57, %v2179_v48  ;;  %v2183_v55 = vrot.slane %v2027_v51, 1 }
 0x355   :  { %v2185_v1 = vrot.slane %v2028_v19, 1  ;;  %v1778_v61 = vpop.f32.mrb[32].mxu0  ;;  %v8402_v43 = vmax.f32 %v2023_v44, %v2180_v47  ;;  %v2182_v58 = vsel %vm793_vm4, %v2177_v28, %v2181_v27 }
 0x356   :  { %v2184_v52 = vsel %vm793_vm4, %v2179_v48, %v2183_v55  ;;  %v1965_v20 = vadd.f32 %v8203_v8, %v1778_v61  ;;  %7021 = vrot.lane.b32.xlu1 %v7010_v29, %s7472_s19  ;;  %v1780_v49 = vpop.f32.mrb[33].mxu0  ;;  %v8408_v35 = vmax.f32 %v2024_v10, %v2182_v58 }
 0x357   :  { %v1966_v15 = vadd.f32 %v8205_v3, %v1780_v49  ;;  %v1782_v42 = vpop.f32.mrb[34].mxu0  ;;  %v7025_v57 = vpack.i.bf16 %v8402_v43, %v8390_v38  ;;  %v8413_v4 = vmax.f32 %v2025_v53, %v2184_v52  ;;  %v2186_v29 = vsel %vm793_vm4, %v2181_v27, %v2185_v1 }
 0x358   :  { %v2029_v44 = vmax.f32 %v1965_v20, 0.0  ;;  %v1967_v28 = vadd.f32 %v8203_v8, %v1782_v42  ;;  %v1784_v26 = vpop.f32.mrb[35].mxu0  ;;  %v7030_v22 = vpack.i.bf16 %v8408_v35, %v8397_v12  ;;  %v8420_v7 = vmax.f32 %v2026_v36, %v2186_v29 }
 0x359   :  { %v2030_v37 = vmax.f32 %v1966_v15, 0.0  ;;  %v1968_v10 = vadd.f32 %v8205_v3, %v1784_v26 }
 0x35a   :  { %v2187_v31 = vrot.slane %v2029_v44, 1  ;;  %v2031_v18 = vmax.f32 %v1967_v28, 0.0  ;;  %7026 = vrot.lane.b32.xlu1 %v7025_v57, %s7471_s17  ;;  %7031 = vrot.lane.b32.xlu0 %v7030_v22, %s7472_s19 }
 0x35b   :  { %v2189_v53 = vrot.slane %v2030_v37, 1  ;;  %v2032_v60 = vmax.f32 %v1968_v10, 0.0 }
 0x35c   :  { %v2188_v48 = vsel %vm793_vm4, %v2183_v55, %v2187_v31  ;;  %v2191_v47 = vrot.slane %v2031_v18, 1 }
 0x35d   :  { %v2193_v61 = vrot.slane %v2032_v60, 1  ;;  %v1788_v58 = vpop.f32.mrb[36].mxu0  ;;  %v8425_v52 = vmax.f32 %v2027_v51, %v2188_v48  ;;  %v2190_v27 = vsel %vm793_vm4, %v2185_v1, %v2189_v53 }
 0x35e   :  { %v2192_v36 = vsel %vm793_vm4, %v2187_v31, %v2191_v47  ;;  %v1969_v20 = vadd.f32 %v8203_v8, %v1788_v58  ;;  %7036 = vrot.lane.b32.xlu0 %v7025_v57, %s7472_s19  ;;  %v1790_v49 = vpop.f32.mrb[37].mxu0  ;;  %v8431_v15 = vmax.f32 %v2028_v19, %v2190_v27 }
 0x35f   :  { %v1970_v42 = vadd.f32 %v8205_v3, %v1790_v49  ;;  %v1792_v28 = vpop.f32.mrb[38].mxu0  ;;  %v7040_v55 = vpack.i.bf16 %v8425_v52, %v8413_v4  ;;  %v8436_v26 = vmax.f32 %v2029_v44, %v2192_v36  ;;  %v2194_v57 = vsel %vm793_vm4, %v2189_v53, %v2193_v61 }
 0x360   :  { %v2033_v51 = vmax.f32 %v1969_v20, 0.0  ;;  %v1971_v1 = vadd.f32 %v8203_v8, %v1792_v28  ;;  %v1794_v22 = vpop.f32.mrb[39].mxu0  ;;  %v7045_v29 = vpack.i.bf16 %v8431_v15, %v8420_v7  ;;  %v8443_v31 = vmax.f32 %v2030_v37, %v2194_v57 }
 0x361   :  { %10237 = vst [vmem:[#allocation10_spill] sm:$0xff] %v8436_v26  ;;  %v2034_v10 = vmax.f32 %v1970_v42, 0.0  ;;  %v1972_v19 = vadd.f32 %v8205_v3, %v1794_v22 }
 0x362   :  { %10238 = vst [vmem:[#allocation11_spill] sm:$0xff] %v8443_v31  ;;  %v2195_v48 = vrot.slane %v2033_v51, 1  ;;  %v2035_v58 = vmax.f32 %v1971_v1, 0.0  ;;  %7041 = vrot.lane.b32.xlu0 %v7040_v55, %s7471_s17  ;;  %7046 = vrot.lane.b32.xlu1 %v7045_v29, %s7472_s19 }
 0x363   :  { %v2197_v44 = vrot.slane %v2034_v10, 1  ;;  %v2036_v27 = vmax.f32 %v1972_v19, 0.0 }
 0x364   :  { %v2196_v36 = vsel %vm793_vm4, %v2191_v47, %v2195_v48  ;;  %v2199_v20 = vrot.slane %v2035_v58, 1 }
 0x365   :  { %v2201_v49 = vrot.slane %v2036_v27, 1  ;;  %v1798_v28 = vpop.f32.mrb[40].mxu0  ;;  %v8448_v11 = vmax.f32 %v2031_v18, %v2196_v36  ;;  %v2198_v53 = vsel %vm793_vm4, %v2193_v61, %v2197_v44 }
 0x366   :  { %v2200_v37 = vsel %vm793_vm4, %v2195_v48, %v2199_v20  ;;  %v1973_v42 = vadd.f32 %v8203_v8, %v1798_v28  ;;  %7051 = vrot.lane.b32.xlu1 %v7040_v55, %s7472_s19  ;;  %v1800_v1 = vpop.f32.mrb[41].mxu0  ;;  %v8454_v22 = vmax.f32 %v2032_v60, %v2198_v53 }
 0x367   :  { %10239 = vst [vmem:[#allocation12_spill] sm:$0xff] %v8448_v11  ;;  %v1974_v29 = vadd.f32 %v8205_v3, %v1800_v1  ;;  %v1802_v57 = vpop.f32.mrb[42].mxu0  ;;  %v7055_v47 = vpack.i.bf16 %v8448_v11, %v8436_v26  ;;  %v8459_v19 = vmax.f32 %v2033_v51, %v2200_v37  ;;  %v2202_v55 = vsel %vm793_vm4, %v2197_v44, %v2201_v49 }
 0x368   :  { %v2037_v18 = vmax.f32 %v1973_v42, 0.0  ;;  %v1975_v61 = vadd.f32 %v8203_v8, %v1802_v57  ;;  %v1804_v36 = vpop.f32.mrb[43].mxu0  ;;  %v7060_v48 = vpack.i.bf16 %v8454_v22, %v8443_v31  ;;  %v8466_v53 = vmax.f32 %v2034_v10, %v2202_v55 }
 0x369   :  { %10240 = vst [vmem:[#allocation13_spill] sm:$0xff] %v8459_v19  ;;  %v2038_v28 = vmax.f32 %v1974_v29, 0.0  ;;  %v1976_v60 = vadd.f32 %v8205_v3, %v1804_v36 }
 0x36a   :  { %10241 = vst [vmem:[#allocation14_spill] sm:$0xff] %v8466_v53  ;;  %v2203_v1 = vrot.slane %v2037_v18, 1  ;;  %v2039_v0 = vmax.f32 %v1975_v61, 0.0  ;;  %7056 = vrot.lane.b32.xlu1 %v7055_v47, %s7471_s17  ;;  %7061 = vrot.lane.b32.xlu0 %v7060_v48, %s7472_s19 }
 0x36b   :  { %v2205_v51 = vrot.slane %v2038_v28, 1  ;;  %v2040_v37 = vmax.f32 %v1976_v60, 0.0 }
 0x36c   :  { %v2204_v42 = vsel %vm793_vm4, %v2199_v20, %v2203_v1  ;;  %v2207_v57 = vrot.slane %v2039_v0, 1 }
 0x36d   :  { %v2209_v23 = vrot.slane %v2040_v37, 1  ;;  %v1808_v11 = vpop.f32.mrb[44].mxu0  ;;  %v8471_v26 = vmax.f32 %v2035_v58, %v2204_v42  ;;  %v2206_v44 = vsel %vm793_vm4, %v2201_v49, %v2205_v51 }
 0x36e   :  { %v2208_v10 = vsel %vm793_vm4, %v2203_v1, %v2207_v57  ;;  %v1977_v29 = vadd.f32 %v8203_v8, %v1808_v11  ;;  %7066 = vrot.lane.b32.xlu0 %v7055_v47, %s7472_s19  ;;  %v1810_v61 = vpop.f32.mrb[45].mxu0  ;;  %v8477_v36 = vmax.f32 %v2036_v27, %v2206_v44 }
 0x36f   :  { %10242 = vst [vmem:[#allocation15_spill] sm:$0xff] %v8471_v26  ;;  %v1978_v48 = vadd.f32 %v8205_v3, %v1810_v61  ;;  %v1812_v55 = vpop.f32.mrb[46].mxu0  ;;  %v7070_v20 = vpack.i.bf16 %v8471_v26, %v8459_v19  ;;  %v8482_v60 = vmax.f32 %v2037_v18, %v2208_v10  ;;  %v2210_v47 = vsel %vm793_vm4, %v2205_v51, %v2209_v23 }
 0x370   :  { %10243 = vst [vmem:[#allocation16_spill] sm:$0xff] %v8477_v36  ;;  %v2041_v58 = vmax.f32 %v1977_v29, 0.0  ;;  %v1979_v49 = vadd.f32 %v8203_v8, %v1812_v55  ;;  %v1814_v42 = vpop.f32.mrb[47].mxu0  ;;  %v7075_v11 = vpack.i.bf16 %v8477_v36, %v8466_v53  ;;  %v8489_v44 = vmax.f32 %v2038_v28, %v2210_v47 }
 0x371   :  { %10244 = vst [vmem:[#allocation17_spill] sm:$0xff] %v8482_v60  ;;  %v2042_v1 = vmax.f32 %v1978_v48, 0.0  ;;  %v1980_v27 = vadd.f32 %v8205_v3, %v1814_v42 }
 0x372   :  { %10245 = vst [vmem:[#allocation18_spill] sm:$0xff] %v8489_v44  ;;  %v2211_v61 = vrot.slane %v2041_v58, 1  ;;  %v2043_v31 = vmax.f32 %v1979_v49, 0.0  ;;  %7071 = vrot.lane.b32.xlu0 %v7070_v20, %s7471_s17  ;;  %7076 = vrot.lane.b32.xlu1 %v7075_v11, %s7472_s19 }
 0x373   :  { %v2213_v18 = vrot.slane %v2042_v1, 1  ;;  %v2044_v10 = vmax.f32 %v1980_v27, 0.0 }
 0x374   :  { %v2212_v29 = vsel %vm793_vm4, %v2207_v57, %v2211_v61  ;;  %v2215_v55 = vrot.slane %v2043_v31, 1 }
 0x375   :  { %v2217_v26 = vrot.slane %v2044_v10, 1  ;;  %v1818_v19 = vpop.f32.mrb[48].mxu0  ;;  %v8494_v53 = vmax.f32 %v2039_v0, %v2212_v29  ;;  %v2214_v51 = vsel %vm793_vm4, %v2209_v23, %v2213_v18 }
 0x376   :  { %v2216_v28 = vsel %vm793_vm4, %v2211_v61, %v2215_v55  ;;  %v1981_v48 = vadd.f32 %v8203_v8, %v1818_v19  ;;  %7081 = vrot.lane.b32.xlu1 %v7070_v20, %s7472_s19  ;;  %v1820_v49 = vpop.f32.mrb[49].mxu0  ;;  %v8500_v42 = vmax.f32 %v2040_v37, %v2214_v51 }
 0x377   :  { %10246 = vst [vmem:[#allocation19_spill] sm:$0xff] %v8494_v53  ;;  %v1982_v11 = vadd.f32 %v8205_v3, %v1820_v49  ;;  %v1822_v47 = vpop.f32.mrb[50].mxu0  ;;  %v7085_v57 = vpack.i.bf16 %v8494_v53, %v8482_v60  ;;  %v8505_v27 = vmax.f32 %v2041_v58, %v2216_v28  ;;  %v2218_v20 = vsel %vm793_vm4, %v2213_v18, %v2217_v26 }
 0x378   :  { %10247 = vst [vmem:[#allocation20_spill] sm:$0xff] %v8500_v42  ;;  %v2045_v0 = vmax.f32 %v1981_v48, 0.0  ;;  %v1983_v23 = vadd.f32 %v8203_v8, %v1822_v47  ;;  %v1824_v29 = vpop.f32.mrb[51].mxu0  ;;  %v7090_v19 = vpack.i.bf16 %v8500_v42, %v8489_v44  ;;  %v8512_v51 = vmax.f32 %v2042_v1, %v2218_v20 }
 0x379   :  { %10248 = vst [vmem:[#allocation21_spill] sm:$0xff] %v8505_v27  ;;  %v2046_v61 = vmax.f32 %v1982_v11, 0.0  ;;  %v1984_v37 = vadd.f32 %v8205_v3, %v1824_v29 }
 0x37a   :  { %10249 = vst [vmem:[#allocation22_spill] sm:$0xff] %v8512_v51  ;;  %v2219_v49 = vrot.slane %v2045_v0, 1  ;;  %v2047_v36 = vmax.f32 %v1983_v23, 0.0  ;;  %7086 = vrot.lane.b32.xlu1 %v7085_v57, %s7471_s17  ;;  %7091 = vrot.lane.b32.xlu0 %v7090_v19, %s7472_s19 }
 0x37b   :  { %v2221_v58 = vrot.slane %v2046_v61, 1  ;;  %v2048_v28 = vmax.f32 %v1984_v37, 0.0 }
 0x37c   :  { %v2220_v48 = vsel %vm793_vm4, %v2215_v55, %v2219_v49  ;;  %v2223_v47 = vrot.slane %v2047_v36, 1 }
 0x37d   :  { %v2225_v53 = vrot.slane %v2048_v28, 1  ;;  %v1828_v60 = vpop.f32.mrb[52].mxu0  ;;  %v8517_v44 = vmax.f32 %v2043_v31, %v2220_v48  ;;  %v2222_v18 = vsel %vm793_vm4, %v2217_v26, %v2221_v58 }
 0x37e   :  { %v2224_v1 = vsel %vm793_vm4, %v2219_v49, %v2223_v47  ;;  %v1985_v11 = vadd.f32 %v8203_v8, %v1828_v60  ;;  %7096 = vrot.lane.b32.xlu0 %v7085_v57, %s7472_s19  ;;  %v1830_v23 = vpop.f32.mrb[53].mxu0  ;;  %v8523_v29 = vmax.f32 %v2044_v10, %v2222_v18 }
 0x37f   :  { %10250 = vst [vmem:[#allocation23_spill] sm:$0xff] %v8517_v44  ;;  %v1986_v19 = vadd.f32 %v8205_v3, %v1830_v23  ;;  %v1832_v20 = vpop.f32.mrb[54].mxu0  ;;  %v7100_v55 = vpack.i.bf16 %v8517_v44, %v8505_v27  ;;  %v8528_v37 = vmax.f32 %v2045_v0, %v2224_v1  ;;  %v2226_v57 = vsel %vm793_vm4, %v2221_v58, %v2225_v53 }
 0x380   :  { %10251 = vst [vmem:[#allocation24_spill] sm:$0xff] %v8523_v29  ;;  %v2049_v31 = vmax.f32 %v1985_v11, 0.0  ;;  %v1987_v26 = vadd.f32 %v8203_v8, %v1832_v20  ;;  %v1834_v48 = vpop.f32.mrb[55].mxu0  ;;  %v7105_v60 = vpack.i.bf16 %v8523_v29, %v8512_v51  ;;  %v8535_v18 = vmax.f32 %v2046_v61, %v2226_v57 }
 0x381   :  { %10252 = vst [vmem:[#allocation25_spill] sm:$0xff] %v8528_v37  ;;  %v2050_v49 = vmax.f32 %v1986_v19, 0.0  ;;  %v1988_v10 = vadd.f32 %v8205_v3, %v1834_v48 }
 0x382   :  { %10253 = vst [vmem:[#allocation26_spill] sm:$0xff] %v8535_v18  ;;  %v2227_v23 = vrot.slane %v2049_v31, 1  ;;  %v2051_v42 = vmax.f32 %v1987_v26, 0.0  ;;  %7101 = vrot.lane.b32.xlu0 %v7100_v55, %s7471_s17  ;;  %7106 = vrot.lane.b32.xlu1 %v7105_v60, %s7472_s19 }
 0x383   :  { %v2229_v0 = vrot.slane %v2050_v49, 1  ;;  %v2052_v1 = vmax.f32 %v1988_v10, 0.0 }
 0x384   :  { %v2228_v11 = vsel %vm793_vm4, %v2223_v47, %v2227_v23  ;;  %v2231_v20 = vrot.slane %v2051_v42, 1 }
 0x385   :  { %v2233_v44 = vrot.slane %v2052_v1, 1  ;;  %v1838_v27 = vpop.f32.mrb[56].mxu0  ;;  %v8540_v51 = vmax.f32 %v2047_v36, %v2228_v11  ;;  %v2230_v58 = vsel %vm793_vm4, %v2225_v53, %v2229_v0 }
 0x386   :  { %v2232_v61 = vsel %vm793_vm4, %v2227_v23, %v2231_v20  ;;  %v1989_v19 = vadd.f32 %v8203_v8, %v1838_v27  ;;  %7111 = vrot.lane.b32.xlu1 %v7100_v55, %s7472_s19  ;;  %v1840_v26 = vpop.f32.mrb[57].mxu0  ;;  %v8546_v48 = vmax.f32 %v2048_v28, %v2230_v58 }
 0x387   :  { %10254 = vst [vmem:[#allocation27_spill] sm:$0xff] %v8540_v51  ;;  %v1990_v60 = vadd.f32 %v8205_v3, %v1840_v26  ;;  %v1842_v57 = vpop.f32.mrb[58].mxu0  ;;  %v7115_v47 = vpack.i.bf16 %v8540_v51, %v8528_v37  ;;  %v8551_v10 = vmax.f32 %v2049_v31, %v2232_v61  ;;  %v2234_v55 = vsel %vm793_vm4, %v2229_v0, %v2233_v44 }
 0x388   :  { %10255 = vst [vmem:[#allocation28_spill] sm:$0xff] %v8546_v48  ;;  %v2053_v36 = vmax.f32 %v1989_v19, 0.0  ;;  %v1991_v53 = vadd.f32 %v8203_v8, %v1842_v57  ;;  %v1844_v11 = vpop.f32.mrb[59].mxu0  ;;  %v7120_v27 = vpack.i.bf16 %v8546_v48, %v8535_v18  ;;  %v8558_v58 = vmax.f32 %v2050_v49, %v2234_v55 }
 0x389   :  { %v2054_v23 = vmax.f32 %v1990_v60, 0.0  ;;  %v1992_v28 = vadd.f32 %v8205_v3, %v1844_v11 }
 0x38a   :  { %v2235_v26 = vrot.slane %v2053_v36, 1  ;;  %v2055_v29 = vmax.f32 %v1991_v53, 0.0  ;;  %7116 = vrot.lane.b32.xlu1 %v7115_v47, %s7471_s17  ;;  %7121 = vrot.lane.b32.xlu0 %v7120_v27, %s7472_s19 }
 0x38b   :  { %v2237_v31 = vrot.slane %v2054_v23, 1  ;;  %v2056_v61 = vmax.f32 %v1992_v28, 0.0 }
 0x38c   :  { %v2236_v19 = vsel %vm793_vm4, %v2231_v20, %v2235_v26  ;;  %v2239_v57 = vrot.slane %v2055_v29, 1 }
 0x38d   :  { %v2241_v51 = vrot.slane %v2056_v61, 1  ;;  %v1848_v37 = vpop.f32.mrb[60].mxu0  ;;  %v8563_v18 = vmax.f32 %v2051_v42, %v2236_v19  ;;  %v2238_v0 = vsel %vm793_vm4, %v2233_v44, %v2237_v31 }
 0x38e   :  { %v2240_v49 = vsel %vm793_vm4, %v2235_v26, %v2239_v57  ;;  %v1993_v60 = vadd.f32 %v8203_v8, %v1848_v37  ;;  %7126 = vrot.lane.b32.xlu0 %v7115_v47, %s7472_s19  ;;  %v1850_v53 = vpop.f32.mrb[61].mxu0  ;;  %v8569_v11 = vmax.f32 %v2052_v1, %v2238_v0 }
 0x38f   :  { %10256 = vst [vmem:[#allocation29_spill] sm:$0xff] %v8563_v18  ;;  %v1994_v27 = vadd.f32 %v8205_v3, %v1850_v53  ;;  %v1852_v55 = vpop.f32.mrb[62].mxu0  ;;  %v7130_v20 = vpack.i.bf16 %v8563_v18, %v8551_v10  ;;  %v8574_v28 = vmax.f32 %v2053_v36, %v2240_v49  ;;  %v2242_v47 = vsel %vm793_vm4, %v2237_v31, %v2241_v51 }
 0x390   :  { %v2057_v42 = vmax.f32 %v1993_v60, 0.0  ;;  %v1995_v44 = vadd.f32 %v8203_v8, %v1852_v55  ;;  %v1854_v19 = vpop.f32.mrb[63].mxu0  ;;  %v7135_v37 = vpack.i.bf16 %v8569_v11, %v8558_v58  ;;  %v8581_v0 = vmax.f32 %v2054_v23, %v2242_v47 }
 0x391   :  { %v2058_v26 = vmax.f32 %v1994_v27, 0.0  ;;  %v1996_v1 = vadd.f32 %v8205_v3, %v1854_v19 }
 0x392   :  { %v2243_v53 = vrot.slane %v2057_v42, 1  ;;  %v2059_v48 = vmax.f32 %v1995_v44, 0.0  ;;  %7131 = vrot.lane.b32.xlu0 %v7130_v20, %s7471_s17  ;;  %7136 = vrot.lane.b32.xlu1 %v7135_v37, %s7472_s19 }
 0x393   :  { %v2245_v36 = vrot.slane %v2058_v26, 1  ;;  %v2060_v49 = vmax.f32 %v1996_v1, 0.0 }
 0x394   :  { %v2244_v8 = vsel %vm793_vm4, %v2239_v57, %v2243_v53  ;;  %v2247_v60 = vrot.slane %v2059_v48, 1 }
 0x395   :  { %v2249_v55 = vrot.slane %v2060_v49, 1  ;;  %v8586_v18 = vmax.f32 %v2055_v29, %v2244_v8  ;;  %v2246_v31 = vsel %vm793_vm4, %v2241_v51, %v2245_v36 }
 0x396   :  { %v2248_v3 = vsel %vm793_vm4, %v2243_v53, %v2247_v60  ;;  %7141 = vrot.lane.b32.xlu1 %v7130_v20, %s7472_s19  ;;  %v8591_v23 = vmax.f32 %v2056_v61, %v2246_v31  ;;  %v2317_v27 = vsel %vm793_vm4, %v2247_v60, %v8220_v17 }
 0x397   :  { %v2318_v44 = vsel %vm793_vm4, %v2249_v55, %v8225_v6  ;;  %v7145_v57 = vpack.i.bf16 %v8586_v18, %v8574_v28  ;;  %v2250_v29 = vsel %vm793_vm4, %v2245_v36, %v2249_v55  ;;  %v8604_v37 = vmax.f32 %v2057_v42, %v2248_v3 }
 0x398   :  { %v8599_v19 = vmax.f32 %v2060_v49, %v2318_v44  ;;  %v7150_v51 = vpack.i.bf16 %v8591_v23, %v8581_v0  ;;  %v8606_v61 = vmax.f32 %v2058_v26, %v2250_v29  ;;  %v8610_v17 = vmax.f32 %v2059_v48, %v2317_v27 }
 0x39a   :  { %7146 = vrot.lane.b32.xlu1 %v7145_v57, %s7471_s17  ;;  %7151 = vrot.lane.b32.xlu0 %v7150_v51, %s7472_s19  ;;  %v7165_v53 = vpack.i.bf16 %v8599_v19, %v8606_v61  ;;  %v7160_v48 = vpack.i.bf16 %v8610_v17, %v8604_v37 }
 0x39b   :  { %v6937_v6 = vpop.permute.xlu1 %6936 }
 0x39c   :  { %v6939_v20 = vunpack.i.h.bf16 %v6937_v6  ;;  %v6938_v47 = vunpack.i.l.bf16 %v6937_v6  ;;  %v6942_v1 = vpop.permute.xlu0 %6941 }
 0x39d   :  { %v6944_v49 = vunpack.i.h.bf16 %v6942_v1  ;;  %v6943_v36 = vunpack.i.l.bf16 %v6942_v1 }
 0x39e   :  { %7156 = vrot.lane.b32.xlu0 %v7145_v57, %s7472_s19  ;;  %7166 = vrot.lane.b32.xlu1 %v7165_v53, %s7472_s19 }
 0x39f   :  { %v2770_v42 = vsel %vm2768_vm8, %v6944_v49, %v6939_v20  ;;  %v2769_v26 = vsel %vm2768_vm8, %v6943_v36, %v6938_v47 }
 0x3a0   :  { %v2804_v8 = vmax.f32 %v8253_v5, %v2770_v42  ;;  %v2802_v60 = vmax.f32 %v8237_v63, %v2769_v26 }
 0x3a2   :  { %7161 = vrot.lane.b32.xlu0 %v7160_v48, %s7471_s17  ;;  %7171 = vrot.lane.b32.xlu1 %v7160_v48, %s7472_s19  ;;  %v8624_v51 = vpack.c.bf16 %v2804_v8, %v2802_v60 }
 0x3a3   :  { %v6947_v55 = vpop.permute.xlu1 %6946 }
 0x3a4   :  { %v6949_v31 = vunpack.i.h.bf16 %v6947_v55  ;;  %v6948_v3 = vunpack.i.l.bf16 %v6947_v55  ;;  %v6952_v27 = vpop.permute.xlu0 %6951  ;;  %v2956_v55 = vrot.slane %v8624_v51, 1 }
 0x3a5   :  { %v6954_v44 = vunpack.i.h.bf16 %v6952_v27  ;;  %v6953_v57 = vunpack.i.l.bf16 %v6952_v27 }
 0x3a7   :  { %v2772_v29 = vsel %vm2768_vm8, %v6954_v44, %v6949_v31  ;;  %v2771_v6 = vsel %vm2768_vm8, %v6953_v57, %v6948_v3  ;;  %v6962_v5 = vpop.permute.xlu1 %6961 }
 0x3a8   :  { %v2808_v63 = vmax.f32 %v8286_v56, %v2772_v29  ;;  %v2806_v20 = vmax.f32 %v8267_v25, %v2771_v6  ;;  %v6964_v47 = vunpack.i.h.bf16 %v6962_v5  ;;  %v6963_v1 = vunpack.i.l.bf16 %v6962_v5  ;;  %v6957_v53 = vpop.permute.xlu0 %6956 }
 0x3a9   :  { %v6959_v42 = vunpack.i.h.bf16 %v6957_v53  ;;  %v6958_v26 = vunpack.i.l.bf16 %v6957_v53 }
 0x3aa   :  { %v8630_v48 = vpack.c.bf16 %v2808_v63, %v2806_v20  ;;  %v2578_v8 = vsel %vm2575_vm9, %v6963_v1, %v6953_v57  ;;  %v2579_v60 = vsel %vm2575_vm9, %v6964_v47, %v6954_v44 }
 0x3ab   :  { %v2805_v31 = vmax.f32 %v8260_v24, %v2578_v8  ;;  %v2807_v56 = vmax.f32 %v8281_v13, %v2579_v60  ;;  %v2577_v25 = vsel %vm2575_vm9, %v6959_v42, %v6944_v49  ;;  %v2576_v3 = vsel %vm2575_vm9, %v6958_v26, %v6943_v36  ;;  %v6967_v27 = vpop.permute.xlu1 %6966 }
 0x3ac   :  { %v2803_v29 = vmax.f32 %v8248_v54, %v2577_v25  ;;  %v2801_v6 = vmax.f32 %v8231_v46, %v2576_v3  ;;  %v6969_v5 = vunpack.i.h.bf16 %v6967_v27  ;;  %v6968_v63 = vunpack.i.l.bf16 %v6967_v27  ;;  %v6972_v57 = vpop.permute.xlu0 %6971 }
 0x3ad   :  { %v8641_v20 = vpack.c.bf16 %v2807_v56, %v2805_v31  ;;  %v6974_v44 = vunpack.i.h.bf16 %v6972_v57  ;;  %v6973_v47 = vunpack.i.l.bf16 %v6972_v57  ;;  %v2957_v24 = vrot.slane %v8630_v48, 1  ;;  %v7297_v31 = vld [vmem:[%s10179_s3] sm:$0xff]  }
 0x3ae   :  { %v8644_v1 = vpack.c.bf16 %v2803_v29, %v2801_v6 }
 0x3af   :  { %v2774_v13 = vsel %vm2768_vm8, %v6974_v44, %v6969_v5  ;;  %v2773_v49 = vsel %vm2768_vm8, %v6973_v47, %v6968_v63  ;;  %v2958_v54 = vsel %vm793_vm4, %v2956_v55, %v2957_v24  ;;  %v2954_v60 = vrot.slane %v8641_v20, 1 }
 0x3b0   :  { %v2812_v46 = vmax.f32 %v8316_v2, %v2774_v13  ;;  %v2810_v36 = vmax.f32 %v8303_v14, %v2773_v49  ;;  %6207 = vmatprep.mubr.msk.bf16.mxu1 %vm3134_vm10, %v2958_v54  ;;  %v6977_v53 = vpop.permute.xlu0 %6976  ;;  %v2953_v42 = vrot.slane %v8644_v1, 1  ;;  %v10257_v54 = vmov 0  }
 0x3b1   :  { %v6979_v26 = vunpack.i.h.bf16 %v6977_v53  ;;  %v6978_v8 = vunpack.i.l.bf16 %v6977_v53 }
 0x3b2   :  { %v8659_v56 = vpack.c.bf16 %v2812_v46, %v2810_v36  ;;  %v2955_v14 = vsel %vm793_vm4, %v2953_v42, %v2954_v60 }
 0x3b3   :  { %v2580_v25 = vsel %vm2575_vm9, %v6978_v8, %v6973_v47  ;;  %v2581_v2 = vsel %vm2575_vm9, %v6979_v26, %v6974_v44  ;;  %3215 = vmatmul.mubr.bf16.vlgmr.msra.gmra.mrb[0].mxu1 %v2955_v14  ;;  %v7298_v44 = vld [vmem:[%s10179_s3 + $0x8] sm:$0xff]  }
 0x3b4   :  { %v2809_v3 = vmax.f32 %v8291_v62, %v2580_v25  ;;  %v2811_v27 = vmax.f32 %v8309_v45, %v2581_v2  ;;  %v6982_v29 = vpop.permute.xlu0 %6981  ;;  %v6987_v6 = vpop.permute.xlu1 %6986  ;;  %v2961_v5 = vrot.slane %v8659_v56, 1  ;;  %3464 = vmatpush1.bf16.msra.mxu1 %v7297_v31 }
 0x3b5   :  { %v6984_v63 = vunpack.i.h.bf16 %v6982_v29  ;;  %v6983_v57 = vunpack.i.l.bf16 %v6982_v29  ;;  %v6989_v13 = vunpack.i.h.bf16 %v6987_v6  ;;  %v6988_v49 = vunpack.i.l.bf16 %v6987_v6  ;;  %3465 = vmatprep.subr.bf16.mxu1 %v10257_v54 }
 0x3b6   :  { %v8672_v47 = vpack.c.bf16 %v2811_v27, %v2809_v3  ;;  %v2962_v62 = vsel %vm793_vm4, %v2957_v24, %v2961_v5  ;;  %v7299_v24 = vld [vmem:[%s10179_s3 + $0x10] sm:$0xff]  }
 0x3b7   :  { %v2776_v45 = vsel %vm2768_vm8, %v6989_v13, %v6984_v63  ;;  %v2775_v46 = vsel %vm2768_vm8, %v6988_v49, %v6983_v57  ;;  %6208 = vmatprep.mubr.msk.bf16.mxu1 %vm3134_vm10, %v2962_v62 }
 0x3b8   :  { %v2816_v36 = vmax.f32 %v8339_v33, %v2776_v45  ;;  %v2814_v53 = vmax.f32 %v8329_v40, %v2775_v46  ;;  %v6992_v26 = vpop.permute.xlu1 %6991  ;;  %v2959_v8 = vrot.slane %v8672_v47, 1  ;;  %3466 = vmatpush1.bf16.msra.mxu1 %v7298_v44 }
 0x3b9   :  { %v6994_v31 = vunpack.i.h.bf16 %v6992_v26  ;;  %v6993_v25 = vunpack.i.l.bf16 %v6992_v26  ;;  %3467 = vmatprep.subr.bf16.mxu1 %v10257_v54 }
 0x3ba   :  { %v8685_v2 = vpack.c.bf16 %v2816_v36, %v2814_v53  ;;  %v2960_v14 = vsel %vm793_vm4, %v2954_v60, %v2959_v8  ;;  %v7300_v60 = vld [vmem:[%s10179_s3 + $0x18] sm:$0xff]  }
 0x3bb   :  { %v2582_v33 = vsel %vm2575_vm9, %v6993_v25, %v6988_v49  ;;  %v2583_v40 = vsel %vm2575_vm9, %v6994_v31, %v6989_v13  ;;  %3223 = vmatmul.mubr.bf16.gmra.mrb[4].mxu1 %v2960_v14 }
 0x3bc   :  { %v2813_v3 = vmax.f32 %v8321_v34, %v2582_v33  ;;  %v2815_v27 = vmax.f32 %v8333_v41, %v2583_v40  ;;  %v6997_v29 = vpop.permute.xlu1 %6996  ;;  %v7002_v6 = vpop.permute.xlu0 %7001  ;;  %v2965_v63 = vrot.slane %v8685_v2, 1  ;;  %3468 = vmatpush1.bf16.msra.mxu1 %v7299_v24 }
 0x3bd   :  { %v6999_v57 = vunpack.i.h.bf16 %v6997_v29  ;;  %v6998_v44 = vunpack.i.l.bf16 %v6997_v29  ;;  %v7004_v62 = vunpack.i.h.bf16 %v7002_v6  ;;  %v7003_v45 = vunpack.i.l.bf16 %v7002_v6  ;;  %3469 = vmatprep.subr.bf16.mxu1 %v10257_v54 }
 0x3be   :  { %v8697_v49 = vpack.c.bf16 %v2815_v27, %v2813_v3  ;;  %v2966_v34 = vsel %vm793_vm4, %v2961_v5, %v2965_v63  ;;  %v7301_v5 = vld [vmem:[%s10179_s3 + $0x20] sm:$0xff]  }
 0x3bf   :  { %v2778_v41 = vsel %vm2768_vm8, %v7004_v62, %v6999_v57  ;;  %v2777_v13 = vsel %vm2768_vm8, %v7003_v45, %v6998_v44  ;;  %6209 = vmatprep.mubr.msk.bf16.mxu1 %vm3134_vm10, %v2966_v34 }
 0x3c0   :  { %v2820_v46 = vmax.f32 %v8362_v21, %v2778_v41  ;;  %v2818_v36 = vmax.f32 %v8351_v50, %v2777_v13  ;;  %v7007_v53 = vpop.permute.xlu0 %7006  ;;  %v2963_v26 = vrot.slane %v8697_v49, 1  ;;  %3470 = vmatpush1.bf16.msra.mxu1 %v7300_v60 }
 0x3c1   :  { %v7009_v31 = vunpack.i.h.bf16 %v7007_v53  ;;  %v7008_v25 = vunpack.i.l.bf16 %v7007_v53  ;;  %3471 = vmatprep.subr.bf16.mxu1 %v10257_v54 }
 0x3c2   :  { %v8710_v24 = vpack.c.bf16 %v2820_v46, %v2818_v36  ;;  %v2964_v14 = vsel %vm793_vm4, %v2959_v8, %v2963_v26  ;;  %v7302_v8 = vld [vmem:[%s10179_s3 + $0x28] sm:$0xff]  }
 0x3c3   :  { %v2584_v21 = vsel %vm2575_vm9, %v7008_v25, %v7003_v45  ;;  %v2585_v50 = vsel %vm2575_vm9, %v7009_v31, %v7004_v62  ;;  %3231 = vmatmul.mubr.bf16.gmra.mrb[8].mxu1 %v2964_v14 }
 0x3c4   :  { %v2817_v33 = vmax.f32 %v8344_v16, %v2584_v21  ;;  %v2819_v40 = vmax.f32 %v8356_v9, %v2585_v50  ;;  %v7012_v3 = vpop.permute.xlu0 %7011  ;;  %v7017_v27 = vpop.permute.xlu1 %7016  ;;  %v2969_v29 = vrot.slane %v8710_v24, 1  ;;  %3472 = vmatpush1.bf16.msra.mxu1 %v7301_v5 }
 0x3c5   :  { %v7014_v6 = vunpack.i.h.bf16 %v7012_v3  ;;  %v7013_v57 = vunpack.i.l.bf16 %v7012_v3  ;;  %v7019_v44 = vunpack.i.h.bf16 %v7017_v27  ;;  %v7018_v60 = vunpack.i.l.bf16 %v7017_v27  ;;  %3473 = vmatprep.subr.bf16.mxu1 %v10257_v54 }
 0x3c6   :  { %v8722_v45 = vpack.c.bf16 %v2819_v40, %v2817_v33  ;;  %v2970_v16 = vsel %vm793_vm4, %v2965_v63, %v2969_v29  ;;  %v7303_v63 = vld [vmem:[%s10179_s3 + $0x30] sm:$0xff]  }
 0x3c7   :  { %v2780_v9 = vsel %vm2768_vm8, %v7019_v44, %v7014_v6  ;;  %v2779_v62 = vsel %vm2768_vm8, %v7018_v60, %v7013_v57  ;;  %6210 = vmatprep.mubr.msk.bf16.mxu1 %vm3134_vm10, %v2970_v16 }
 0x3c8   :  { %v2824_v34 = vmax.f32 %v8385_v59, %v2780_v9  ;;  %v2822_v41 = vmax.f32 %v8374_v32, %v2779_v62  ;;  %v7022_v13 = vpop.permute.xlu1 %7021  ;;  %v2967_v46 = vrot.slane %v8722_v45, 1  ;;  %3474 = vmatpush1.bf16.msra.mxu1 %v7302_v8 }
 0x3c9   :  { %v7024_v36 = vunpack.i.h.bf16 %v7022_v13  ;;  %v7023_v53 = vunpack.i.l.bf16 %v7022_v13  ;;  %3475 = vmatprep.subr.bf16.mxu1 %v10257_v54 }
 0x3ca   :  { %v8735_v31 = vpack.c.bf16 %v2824_v34, %v2822_v41  ;;  %v2968_v25 = vsel %vm793_vm4, %v2963_v26, %v2967_v46  ;;  %v7304_v26 = vld [vmem:[%s10179_s3 + $0x38] sm:$0xff]  }
 0x3cb   :  { %v2586_v59 = vsel %vm2575_vm9, %v7023_v53, %v7018_v60  ;;  %v2587_v32 = vsel %vm2575_vm9, %v7024_v36, %v7019_v44  ;;  %3239 = vmatmul.mubr.bf16.gmra.mrb[12].mxu1 %v2968_v25 }
 0x3cc   :  { %v2821_v5 = vmax.f32 %v8367_v39, %v2586_v59  ;;  %v2823_v14 = vmax.f32 %v8379_v30, %v2587_v32  ;;  %v7027_v21 = vpop.permute.xlu1 %7026  ;;  %v7032_v50 = vpop.permute.xlu0 %7031  ;;  %v2973_v33 = vrot.slane %v8735_v31, 1  ;;  %3476 = vmatpush1.bf16.msra.mxu1 %v7303_v63 }
 0x3cd   :  { %v7029_v40 = vunpack.i.h.bf16 %v7027_v21  ;;  %v7028_v3 = vunpack.i.l.bf16 %v7027_v21  ;;  %v7034_v27 = vunpack.i.h.bf16 %v7032_v50  ;;  %v7033_v6 = vunpack.i.l.bf16 %v7032_v50  ;;  %3477 = vmatprep.subr.bf16.mxu1 %v10257_v54 }
 0x3ce   :  { %v8747_v57 = vpack.c.bf16 %v2823_v14, %v2821_v5  ;;  %v2974_v39 = vsel %vm793_vm4, %v2969_v29, %v2973_v33  ;;  %v7305_v29 = vld [vmem:[%s10179_s3 + $0x40] sm:$0xff]  }
 0x3cf   :  { %v2782_v30 = vsel %vm2768_vm8, %v7034_v27, %v7029_v40  ;;  %v2781_v44 = vsel %vm2768_vm8, %v7033_v6, %v7028_v3  ;;  %6211 = vmatprep.mubr.msk.bf16.mxu1 %vm3134_vm10, %v2974_v39 }
 0x3d0   :  { %v2828_v60 = vmax.f32 %v8408_v35, %v2782_v30  ;;  %v2826_v8 = vmax.f32 %v8397_v12, %v2781_v44  ;;  %v7037_v16 = vpop.permute.xlu0 %7036  ;;  %v2971_v9 = vrot.slane %v8747_v57, 1  ;;  %3478 = vmatpush1.bf16.msra.mxu1 %v7304_v26 }
 0x3d1   :  { %v7039_v62 = vunpack.i.h.bf16 %v7037_v16  ;;  %v7038_v34 = vunpack.i.l.bf16 %v7037_v16  ;;  %3479 = vmatprep.subr.bf16.mxu1 %v10257_v54 }
 0x3d2   :  { %v8760_v41 = vpack.c.bf16 %v2828_v60, %v2826_v8  ;;  %v2972_v13 = vsel %vm793_vm4, %v2967_v46, %v2971_v9  ;;  %v7306_v46 = vld [vmem:[%s10179_s3 + $0x48] sm:$0xff]  }
 0x3d3   :  { %v2588_v35 = vsel %vm2575_vm9, %v7038_v34, %v7033_v6  ;;  %v2589_v12 = vsel %vm2575_vm9, %v7039_v62, %v7034_v27  ;;  %3247 = vmatmul.mubr.bf16.gmra.mrb[16].mxu1 %v2972_v13 }
 0x3d4   :  { %v2825_v36 = vmax.f32 %v8390_v38, %v2588_v35  ;;  %v2827_v53 = vmax.f32 %v8402_v43, %v2589_v12  ;;  %v7042_v63 = vpop.permute.xlu0 %7041  ;;  %v7047_v25 = vpop.permute.xlu1 %7046  ;;  %v2977_v59 = vrot.slane %v8760_v41, 1  ;;  %3480 = vmatpush1.bf16.msra.mxu1 %v7305_v29 }
 0x3d5   :  { %v7044_v32 = vunpack.i.h.bf16 %v7042_v63  ;;  %v7043_v5 = vunpack.i.l.bf16 %v7042_v63  ;;  %v7049_v14 = vunpack.i.h.bf16 %v7047_v25  ;;  %v7048_v21 = vunpack.i.l.bf16 %v7047_v25  ;;  %3481 = vmatprep.subr.bf16.mxu1 %v10257_v54 }
 0x3d6   :  { %v8772_v50 = vpack.c.bf16 %v2827_v53, %v2825_v36  ;;  %v2978_v38 = vsel %vm793_vm4, %v2973_v33, %v2977_v59  ;;  %v7307_v33 = vld [vmem:[%s10179_s3 + $0x50] sm:$0xff]  }
 0x3d7   :  { %v2784_v43 = vsel %vm2768_vm8, %v7049_v14, %v7044_v32  ;;  %v2783_v40 = vsel %vm2768_vm8, %v7048_v21, %v7043_v5  ;;  %6212 = vmatprep.mubr.msk.bf16.mxu1 %vm3134_vm10, %v2978_v38  ;;  %v10261_v32 = vld [vmem:[#allocation11_spill] sm:$0xff] }
 0x3d8   :  { %10258 = vst [vmem:[#allocation30_spill] sm:$0xff] %v8772_v50  ;;  %v2832_v3 = vmax.f32 %v8431_v15, %v2784_v43  ;;  %v2830_v27 = vmax.f32 %v8420_v7, %v2783_v40  ;;  %v7052_v6 = vpop.permute.xlu1 %7051  ;;  %v2975_v26 = vrot.slane %v8772_v50, 1  ;;  %3482 = vmatpush1.bf16.msra.mxu1 %v7306_v46 }
 0x3d9   :  { %v7054_v39 = vunpack.i.h.bf16 %v7052_v6  ;;  %v7053_v30 = vunpack.i.l.bf16 %v7052_v6  ;;  %3483 = vmatprep.subr.bf16.mxu1 %v10257_v54  ;;  %v10264_v6 = vld [vmem:[#allocation12_spill] sm:$0xff] }
 0x3da   :  { %v8785_v44 = vpack.c.bf16 %v2832_v3, %v2830_v27  ;;  %v2976_v60 = vsel %vm793_vm4, %v2971_v9, %v2975_v26  ;;  %v7308_v9 = vld [vmem:[%s10179_s3 + $0x58] sm:$0xff]   ;;  %v10263_v27 = vld [vmem:[#allocation10_spill] sm:$0xff] }
 0x3db   :  { %v2590_v15 = vsel %vm2575_vm9, %v7053_v30, %v7048_v21  ;;  %v2591_v7 = vsel %vm2575_vm9, %v7054_v39, %v7049_v14  ;;  %3255 = vmatmul.mubr.bf16.gmra.mrb[20].mxu1 %v2976_v60 }
 0x3dc   :  { %10259 = vst [vmem:[#allocation31_spill] sm:$0xff] %v8785_v44  ;;  %v2829_v8 = vmax.f32 %v8413_v4, %v2590_v15  ;;  %v2831_v16 = vmax.f32 %v8425_v52, %v2591_v7  ;;  %v7057_v62 = vpop.permute.xlu1 %7056  ;;  %v7062_v34 = vpop.permute.xlu0 %7061  ;;  %v2981_v29 = vrot.slane %v8785_v44, 1  ;;  %3484 = vmatpush1.bf16.msra.mxu1 %v7307_v33 }
 0x3dd   :  { %v7059_v13 = vunpack.i.h.bf16 %v7057_v62  ;;  %v7058_v35 = vunpack.i.l.bf16 %v7057_v62  ;;  %v7064_v12 = vunpack.i.h.bf16 %v7062_v34  ;;  %v7063_v36 = vunpack.i.l.bf16 %v7062_v34  ;;  %3485 = vmatprep.subr.bf16.mxu1 %v10257_v54 }
 0x3de   :  { %v8797_v53 = vpack.c.bf16 %v2831_v16, %v2829_v8  ;;  %v2982_v4 = vsel %vm793_vm4, %v2977_v59, %v2981_v29 }
 0x3df   :  { %v2786_v52 = vsel %vm2768_vm8, %v7064_v12, %v7059_v13  ;;  %v2785_v63 = vsel %vm2768_vm8, %v7063_v36, %v7058_v35  ;;  %6213 = vmatprep.mubr.msk.bf16.mxu1 %vm3134_vm10, %v2982_v4  ;;  %v10265_v35 = vld [vmem:[#allocation16_spill] sm:$0xff] }
 0x3e0   :  { %10260 = vst [vmem:[#allocation32_spill] sm:$0xff] %v8797_v53  ;;  %v2836_v25 = vmax.f32 %v8454_v22, %v2786_v52  ;;  %v2834_v5 = vmax.f32 %v10261_v32, %v2785_v63  ;;  %v7067_v14 = vpop.permute.xlu0 %7066  ;;  %v2979_v21 = vrot.slane %v8797_v53, 1  ;;  %3486 = vmatpush1.bf16.msra.mxu1 %v7308_v9 }
 0x3e1   :  { %v7069_v46 = vunpack.i.h.bf16 %v7067_v14  ;;  %v7068_v38 = vunpack.i.l.bf16 %v7067_v14  ;;  %3852 = vmatprep.subr.bf16.mxu1 %v10257_v54 }
 0x3e2   :  { %v8807_v43 = vpack.c.bf16 %v2836_v25, %v2834_v5  ;;  %v2980_v59 = vsel %vm793_vm4, %v2975_v26, %v2979_v21 }
 0x3e3   :  { %v2592_v40 = vsel %vm2575_vm9, %v7068_v38, %v7063_v36  ;;  %v2593_v3 = vsel %vm2575_vm9, %v7069_v46, %v7064_v12  ;;  %3263 = vmatmul.mubr.bf16.gmra.mrb[24].mxu1 %v2980_v59  ;;  %v10266_v36 = vld [vmem:[#allocation14_spill] sm:$0xff]  ;;  %v10268_v46 = vld [vmem:[#allocation13_spill] sm:$0xff]  ;;  %v10269_v59 = vld [vmem:[#allocation15_spill] sm:$0xff] }
 0x3e4   :  { %10262 = vst [vmem:[#allocation11_spill] sm:$0xff] %v8807_v43  ;;  %v2833_v22 = vmax.f32 %v10263_v27, %v2592_v40  ;;  %v2835_v39 = vmax.f32 %v10264_v6, %v2593_v3  ;;  %v7072_v30 = vpop.permute.xlu0 %7071  ;;  %v7077_v33 = vpop.permute.xlu1 %7076  ;;  %v2985_v60 = vrot.slane %v8807_v43, 1 }
 0x3e5   :  { %v7074_v15 = vunpack.i.h.bf16 %v7072_v30  ;;  %v7073_v7 = vunpack.i.l.bf16 %v7072_v30  ;;  %v7079_v8 = vunpack.i.h.bf16 %v7077_v33  ;;  %v7078_v16 = vunpack.i.l.bf16 %v7077_v33 }
 0x3e6   :  { %v8816_v26 = vpack.c.bf16 %v2835_v39, %v2833_v22  ;;  %v2986_v62 = vsel %vm793_vm4, %v2981_v29, %v2985_v60 }
 0x3e7   :  { %v2788_v34 = vsel %vm2768_vm8, %v7079_v8, %v7074_v15  ;;  %v2787_v13 = vsel %vm2768_vm8, %v7078_v16, %v7073_v7  ;;  %6214 = vmatprep.mubr.msk.bf16.mxu1 %vm3134_vm10, %v2986_v62 }
 0x3e8   :  { %v2840_v12 = vmax.f32 %v10265_v35, %v2788_v34  ;;  %v2838_v9 = vmax.f32 %v10266_v36, %v2787_v13  ;;  %v7082_v4 = vpop.permute.xlu1 %7081  ;;  %v2983_v52 = vrot.slane %v8816_v26, 1  ;;  %v10271_v34 = vld [vmem:[#allocation18_spill] sm:$0xff] }
 0x3e9   :  { %v7084_v63 = vunpack.i.h.bf16 %v7082_v4  ;;  %v7083_v25 = vunpack.i.l.bf16 %v7082_v4 }
 0x3ea   :  { %v8825_v32 = vpack.c.bf16 %v2840_v12, %v2838_v9  ;;  %v2984_v5 = vsel %vm793_vm4, %v2979_v21, %v2983_v52 }
 0x3eb   :  { %v2594_v29 = vsel %vm2575_vm9, %v7083_v25, %v7078_v16  ;;  %v2595_v14 = vsel %vm2575_vm9, %v7084_v63, %v7079_v8  ;;  %3271 = vmatmul.mubr.bf16.gmra.mrb[28].mxu1 %v2984_v5  ;;  %v10270_v16 = vld [vmem:[#allocation20_spill] sm:$0xff]  ;;  %v10273_v5 = vld [vmem:[#allocation17_spill] sm:$0xff] }
 0x3ec   :  { %10267 = vst [vmem:[#allocation10_spill] sm:$0xff] %v8825_v32  ;;  %v2837_v38 = vmax.f32 %v10268_v46, %v2594_v29  ;;  %v2839_v40 = vmax.f32 %v10269_v59, %v2595_v14  ;;  %v7087_v3 = vpop.permute.xlu1 %7086  ;;  %v7092_v27 = vpop.permute.xlu0 %7091  ;;  %v2989_v22 = vrot.slane %v8825_v32, 1  ;;  %v10274_v14 = vld [vmem:[#allocation19_spill] sm:$0xff] }
 0x3ed   :  { %v7089_v6 = vunpack.i.h.bf16 %v7087_v3  ;;  %v7088_v39 = vunpack.i.l.bf16 %v7087_v3  ;;  %v7094_v30 = vunpack.i.h.bf16 %v7092_v27  ;;  %v7093_v33 = vunpack.i.l.bf16 %v7092_v27 }
 0x3ee   :  { %v8833_v15 = vpack.c.bf16 %v2839_v40, %v2837_v38  ;;  %v2990_v21 = vsel %vm793_vm4, %v2985_v60, %v2989_v22 }
 0x3ef   :  { %v2790_v7 = vsel %vm2768_vm8, %v7094_v30, %v7089_v6  ;;  %v2789_v8 = vsel %vm2768_vm8, %v7093_v33, %v7088_v39  ;;  %6215 = vmatprep.mubr.msk.bf16.mxu1 %vm3134_vm10, %v2990_v21 }
 0x3f0   :  { %v2844_v62 = vmax.f32 %v10270_v16, %v2790_v7  ;;  %v2842_v13 = vmax.f32 %v10271_v34, %v2789_v8  ;;  %v7097_v35 = vpop.permute.xlu0 %7096  ;;  %v2987_v12 = vrot.slane %v8833_v15, 1  ;;  %v10276_v7 = vld [vmem:[#allocation24_spill] sm:$0xff]  ;;  %v10277_v16 = vld [vmem:[#allocation22_spill] sm:$0xff] }
 0x3f1   :  { %v7099_v36 = vunpack.i.h.bf16 %v7097_v35  ;;  %v7098_v9 = vunpack.i.l.bf16 %v7097_v35 }
 0x3f2   :  { %v8842_v4 = vpack.c.bf16 %v2844_v62, %v2842_v13  ;;  %v2988_v63 = vsel %vm793_vm4, %v2983_v52, %v2987_v12 }
 0x3f3   :  { %v2596_v60 = vsel %vm2575_vm9, %v7098_v9, %v7093_v33  ;;  %v2597_v25 = vsel %vm2575_vm9, %v7099_v36, %v7094_v30  ;;  %3279 = vmatmul.mubr.bf16.gmra.mrb[32].mxu1 %v2988_v63 }
 0x3f4   :  { %10272 = vst [vmem:[#allocation12_spill] sm:$0xff] %v8842_v4  ;;  %v2841_v29 = vmax.f32 %v10273_v5, %v2596_v60  ;;  %v2843_v46 = vmax.f32 %v10274_v14, %v2597_v25  ;;  %v7102_v38 = vpop.permute.xlu0 %7101  ;;  %v7107_v59 = vpop.permute.xlu1 %7106  ;;  %v2993_v40 = vrot.slane %v8842_v4, 1  ;;  %v10279_v25 = vld [vmem:[#allocation21_spill] sm:$0xff] }
 0x3f5   :  { %v7104_v3 = vunpack.i.h.bf16 %v7102_v38  ;;  %v7103_v27 = vunpack.i.l.bf16 %v7102_v38  ;;  %v7109_v6 = vunpack.i.h.bf16 %v7107_v59  ;;  %v7108_v39 = vunpack.i.l.bf16 %v7107_v59 }
 0x3f6   :  { %v8850_v21 = vpack.c.bf16 %v2843_v46, %v2841_v29  ;;  %v2994_v52 = vsel %vm793_vm4, %v2989_v22, %v2993_v40  ;;  %v10280_v29 = vld [vmem:[#allocation23_spill] sm:$0xff] }
 0x3f7   :  { %v2792_v33 = vsel %vm2768_vm8, %v7109_v6, %v7104_v3  ;;  %v2791_v30 = vsel %vm2768_vm8, %v7108_v39, %v7103_v27  ;;  %6216 = vmatprep.mubr.msk.bf16.mxu1 %vm3134_vm10, %v2994_v52 }
 0x3f8   :  { %10275 = vst [vmem:[#allocation16_spill] sm:$0xff] %v8850_v21  ;;  %v2848_v8 = vmax.f32 %v10276_v7, %v2792_v33  ;;  %v2846_v62 = vmax.f32 %v10277_v16, %v2791_v30  ;;  %v7112_v34 = vpop.permute.xlu1 %7111  ;;  %v2991_v13 = vrot.slane %v8850_v21, 1  ;;  %v10281_v7 = vld [vmem:[#allocation28_spill] sm:$0xff]  ;;  %v10282_v16 = vld [vmem:[#allocation26_spill] sm:$0xff] }
 0x3f9   :  { %v7114_v35 = vunpack.i.h.bf16 %v7112_v34  ;;  %v7113_v36 = vunpack.i.l.bf16 %v7112_v34 }
 0x3fa   :  { %v8859_v9 = vpack.c.bf16 %v2848_v8, %v2846_v62  ;;  %v2992_v63 = vsel %vm793_vm4, %v2987_v12, %v2991_v13 }
 0x3fb   :  { %v2598_v22 = vsel %vm2575_vm9, %v7113_v36, %v7108_v39  ;;  %v2599_v60 = vsel %vm2575_vm9, %v7114_v35, %v7109_v6  ;;  %3287 = vmatmul.mubr.bf16.gmra.mrb[36].mxu1 %v2992_v63 }
 0x3fc   :  { %10278 = vst [vmem:[#allocation14_spill] sm:$0xff] %v8859_v9  ;;  %v2845_v5 = vmax.f32 %v10279_v25, %v2598_v22  ;;  %v2847_v14 = vmax.f32 %v10280_v29, %v2599_v60  ;;  %v7117_v46 = vpop.permute.xlu1 %7116  ;;  %v7122_v38 = vpop.permute.xlu0 %7121  ;;  %v2997_v59 = vrot.slane %v8859_v9, 1 }
 0x3fd   :  { %v7119_v3 = vunpack.i.h.bf16 %v7117_v46  ;;  %v7118_v27 = vunpack.i.l.bf16 %v7117_v46  ;;  %v7124_v52 = vunpack.i.h.bf16 %v7122_v38  ;;  %v7123_v33 = vunpack.i.l.bf16 %v7122_v38 }
 0x3fe   :  { %v8867_v30 = vpack.c.bf16 %v2847_v14, %v2845_v5  ;;  %v2998_v12 = vsel %vm793_vm4, %v2993_v40, %v2997_v59  ;;  %v10284_v5 = vld [vmem:[#allocation25_spill] sm:$0xff]  ;;  %v10285_v14 = vld [vmem:[#allocation27_spill] sm:$0xff] }
 0x3ff   :  { %v2794_v39 = vsel %vm2768_vm8, %v7124_v52, %v7119_v3  ;;  %v2793_v6 = vsel %vm2768_vm8, %v7123_v33, %v7118_v27  ;;  %6217 = vmatprep.mubr.msk.bf16.mxu1 %vm3134_vm10, %v2998_v12 }
 0x400   :  { %v2852_v8 = vmax.f32 %v10281_v7, %v2794_v39  ;;  %v2850_v62 = vmax.f32 %v10282_v16, %v2793_v6  ;;  %v7127_v34 = vpop.permute.xlu0 %7126  ;;  %v2995_v35 = vrot.slane %v8867_v30, 1 }
 0x401   :  { %v7129_v36 = vunpack.i.h.bf16 %v7127_v34  ;;  %v7128_v63 = vunpack.i.l.bf16 %v7127_v34 }
 0x402   :  { %v8876_v22 = vpack.c.bf16 %v2852_v8, %v2850_v62  ;;  %v2996_v60 = vsel %vm793_vm4, %v2991_v13, %v2995_v35 }
 0x403   :  { %v2600_v40 = vsel %vm2575_vm9, %v7128_v63, %v7123_v33  ;;  %v2601_v25 = vsel %vm2575_vm9, %v7129_v36, %v7124_v52  ;;  %3295 = vmatmul.mubr.bf16.gmra.mrb[40].mxu1 %v2996_v60 }
 0x404   :  { %10283 = vst [vmem:[#allocation13_spill] sm:$0xff] %v8876_v22  ;;  %v2849_v29 = vmax.f32 %v10284_v5, %v2600_v40  ;;  %v2851_v46 = vmax.f32 %v10285_v14, %v2601_v25  ;;  %v7132_v38 = vpop.permute.xlu0 %7131  ;;  %v7137_v3 = vpop.permute.xlu1 %7136  ;;  %v3001_v27 = vrot.slane %v8876_v22, 1  ;;  %v10287_v14 = vld [vmem:[#allocation29_spill] sm:$0xff] }
 0x405   :  { %v7134_v12 = vunpack.i.h.bf16 %v7132_v38  ;;  %v7133_v39 = vunpack.i.l.bf16 %v7132_v38  ;;  %v7139_v6 = vunpack.i.h.bf16 %v7137_v3  ;;  %v7138_v7 = vunpack.i.l.bf16 %v7137_v3 }
 0x406   :  { %v8884_v8 = vpack.c.bf16 %v2851_v46, %v2849_v29  ;;  %v3002_v13 = vsel %vm793_vm4, %v2997_v59, %v3001_v27 }
 0x407   :  { %v2796_v33 = vsel %vm2768_vm8, %v7139_v6, %v7134_v12  ;;  %v2795_v52 = vsel %vm2768_vm8, %v7138_v7, %v7133_v39  ;;  %6218 = vmatprep.mubr.msk.bf16.mxu1 %vm3134_vm10, %v3002_v13 }
 0x408   :  { %v2856_v16 = vmax.f32 %v8569_v11, %v2796_v33  ;;  %v2854_v62 = vmax.f32 %v8558_v58, %v2795_v52  ;;  %v7142_v34 = vpop.permute.xlu1 %7141  ;;  %v2999_v36 = vrot.slane %v8884_v8, 1 }
 0x409   :  { %v7144_v63 = vunpack.i.h.bf16 %v7142_v34  ;;  %v7143_v60 = vunpack.i.l.bf16 %v7142_v34 }
 0x40a   :  { %v8893_v40 = vpack.c.bf16 %v2856_v16, %v2854_v62  ;;  %v3000_v25 = vsel %vm793_vm4, %v2995_v35, %v2999_v36 }
 0x40b   :  { %v2602_v59 = vsel %vm2575_vm9, %v7143_v60, %v7138_v7  ;;  %v2603_v5 = vsel %vm2575_vm9, %v7144_v63, %v7139_v6  ;;  %3303 = vmatmul.mubr.bf16.gmra.mrb[44].mxu1 %v3000_v25 }
 0x40c   :  { %10286 = vst [vmem:[#allocation15_spill] sm:$0xff] %v8893_v40  ;;  %v2853_v29 = vmax.f32 %v8551_v10, %v2602_v59  ;;  %v2855_v46 = vmax.f32 %v10287_v14, %v2603_v5  ;;  %v7147_v11 = vpop.permute.xlu1 %7146  ;;  %v7152_v58 = vpop.permute.xlu0 %7151  ;;  %v3005_v38 = vrot.slane %v8893_v40, 1 }
 0x40d   :  { %v7149_v3 = vunpack.i.h.bf16 %v7147_v11  ;;  %v7148_v12 = vunpack.i.l.bf16 %v7147_v11  ;;  %v7154_v39 = vunpack.i.h.bf16 %v7152_v58  ;;  %v7153_v13 = vunpack.i.l.bf16 %v7152_v58 }
 0x40e   :  { %v8901_v33 = vpack.c.bf16 %v2855_v46, %v2853_v29  ;;  %v3006_v35 = vsel %vm793_vm4, %v3001_v27, %v3005_v38 }
 0x40f   :  { %v2798_v7 = vsel %vm2768_vm8, %v7154_v39, %v7149_v3  ;;  %v2797_v6 = vsel %vm2768_vm8, %v7153_v13, %v7148_v12  ;;  %6219 = vmatprep.mubr.msk.bf16.mxu1 %vm3134_vm10, %v3006_v35 }
 0x410   :  { %v2860_v10 = vmax.f32 %v8591_v23, %v2798_v7  ;;  %v2858_v52 = vmax.f32 %v8581_v0, %v2797_v6  ;;  %v7157_v16 = vpop.permute.xlu0 %7156  ;;  %v7167_v62 = vpop.permute.xlu1 %7166  ;;  %v3003_v34 = vrot.slane %v8901_v33, 1 }
 0x411   :  { %v7159_v63 = vunpack.i.h.bf16 %v7157_v16  ;;  %v7158_v60 = vunpack.i.l.bf16 %v7157_v16  ;;  %v7169_v29 = vunpack.i.h.bf16 %v7167_v62  ;;  %v7168_v0 = vunpack.i.l.bf16 %v7167_v62 }
 0x412   :  { %v8910_v25 = vpack.c.bf16 %v2860_v10, %v2858_v52  ;;  %v3004_v27 = vsel %vm793_vm4, %v2999_v36, %v3003_v34 }
 0x413   :  { %v2604_v59 = vsel %vm2575_vm9, %v7158_v60, %v7153_v13  ;;  %v2605_v5 = vsel %vm2575_vm9, %v7159_v63, %v7154_v39  ;;  %3311 = vmatmul.mubr.bf16.gmra.mrb[48].mxu1 %v3004_v27 }
 0x414   :  { %v2857_v14 = vmax.f32 %v8574_v28, %v2604_v59  ;;  %v2859_v23 = vmax.f32 %v8586_v18, %v2605_v5  ;;  %v7162_v46 = vpop.permute.xlu0 %7161  ;;  %v7172_v11 = vpop.permute.xlu1 %7171  ;;  %v3009_v58 = vrot.slane %v8910_v25, 1 }
 0x415   :  { %v7164_v3 = vunpack.i.h.bf16 %v7162_v46  ;;  %v7163_v12 = vunpack.i.l.bf16 %v7162_v46  ;;  %v7174_v35 = vunpack.i.h.bf16 %v7172_v11  ;;  %v7173_v7 = vunpack.i.l.bf16 %v7172_v11  ;;  %v7316_v46 = vld [vmem:[%s10179_s3 + $0xf8] sm:$0xff]   ;;  %v7317_v11 = vld [vmem:[%s10179_s3 + $0x100] sm:$0xff]  }
 0x416   :  { %v8918_v36 = vpack.c.bf16 %v2859_v23, %v2857_v14  ;;  %v3010_v13 = vsel %vm793_vm4, %v3005_v38, %v3009_v58  ;;  %v7313_v14 = vld [vmem:[%s10179_s3 + $0xe0] sm:$0xff]   ;;  %v7314_v23 = vld [vmem:[%s10179_s3 + $0xe8] sm:$0xff]  }
 0x417   :  { %v2799_v39 = vsel %vm2768_vm8, %v7168_v0, %v7163_v12  ;;  %v2800_v28 = vsel %vm2768_vm8, %v7169_v29, %v7164_v3  ;;  %v2606_v18 = vsel %vm2575_vm9, %v7173_v7, %v7168_v0  ;;  %v2607_v6 = vsel %vm2575_vm9, %v7174_v35, %v7169_v29  ;;  %6220 = vmatprep.mubr.msk.bf16.mxu1 %vm3134_vm10, %v3010_v13  ;;  %v7312_v29 = vld [vmem:[%s10179_s3 + $0xd8] sm:$0xff]   ;;  %v7315_v0 = vld [vmem:[%s10179_s3 + $0xf0] sm:$0xff]  }
 0x418   :  { %v2862_v10 = vmax.f32 %v8606_v61, %v2799_v39  ;;  %v2864_v52 = vmax.f32 %v8599_v19, %v2800_v28  ;;  %v2861_v16 = vmax.f32 %v8604_v37, %v2606_v18  ;;  %v2863_v62 = vmax.f32 %v8610_v17, %v2607_v6  ;;  %v7319_v3 = vld [vmem:[%s10179_s3 + $0x110] sm:$0xff]   ;;  %v7320_v12 = vld [vmem:[%s10179_s3 + $0x118] sm:$0xff]  }
 0x419   :  { %v3007_v38 = vrot.slane %v8918_v36, 1 }
 0x41a   :  { %v8931_v63 = vpack.c.bf16 %v2864_v52, %v2862_v10  ;;  %v8933_v60 = vpack.c.bf16 %v2863_v62, %v2861_v16 }
 0x41b   :  { %v3008_v27 = vsel %vm793_vm4, %v3003_v34, %v3007_v38  ;;  %v7309_v34 = vld [vmem:[%s10179_s3 + $0xc0] sm:$0xff]  }
 0x41c   :  { %3319 = vmatmul.mubr.bf16.gmra.mrb[52].mxu1 %v3008_v27  ;;  %v3013_v59 = vrot.slane %v8931_v63, 1  ;;  %v3011_v19 = vrot.slane %v8933_v60, 1 }
 0x41e   :  { %v3014_v5 = vsel %vm793_vm4, %v3009_v58, %v3013_v59  ;;  %v3012_v37 = vsel %vm793_vm4, %v3007_v38, %v3011_v19  ;;  %v3036_v61 = vsel %vm793_vm4, %v3013_v59, %v2956_v55  ;;  %v3032_v17 = vsel %vm793_vm4, %v3011_v19, %v2953_v42  ;;  %v7310_v55 = vld [vmem:[%s10179_s3 + $0xc8] sm:$0xff]   ;;  %v7311_v42 = vld [vmem:[%s10179_s3 + $0xd0] sm:$0xff]  }
 0x41f   :  { %6221 = vmatprep.mubr.msk.bf16.mxu1 %vm3134_vm10, %v3014_v5  ;;  %v7318_v58 = vld [vmem:[%s10179_s3 + $0x108] sm:$0xff]  }
 0x424   :  { %3327 = vmatmul.mubr.bf16.gmra.mrb[56].mxu1 %v3012_v37 }
 0x425   :  { %6222 = vmatprep.mubr.msk.bf16.mxu1 %vm3134_vm10, %v3036_v61 }
 0x42c   :  { %3335 = vmatmul.mubr.bf16.gmra.mrb[60].mxu1 %v3032_v17  ;;  %v3628_v17 = vrot.slane %v8630_v48, 2 }
 0x42d   :  { %6235 = vmatprep.mubr.msk.bf16.mxu1 %vm3134_vm10, %v8624_v51 }
 0x434   :  { %3496 = vmatmul.mubr.bf16.vlgmr.msra.gmra.mrb[64].mxu1 %v8644_v1 }
 0x435   :  { %6236 = vmatprep.mubr.msk.bf16.mxu1 %vm3134_vm10, %v8630_v48  ;;  %3853 = vmatpush1.bf16.msra.mxu1 %v7309_v34 }
 0x436   :  { %3854 = vmatprep.subr.bf16.mxu1 %v10257_v54 }
 0x439   :  { %3855 = vmatpush1.bf16.msra.mxu1 %v7310_v55 }
 0x43a   :  { %3856 = vmatprep.subr.bf16.mxu1 %v10257_v54 }
 0x43c   :  { %3504 = vmatmul.mubr.bf16.gmra.mrb[68].mxu1 %v8641_v20 }
 0x43d   :  { %6237 = vmatprep.mubr.msk.bf16.mxu1 %vm3134_vm10, %v8659_v56  ;;  %3857 = vmatpush1.bf16.msra.mxu1 %v7311_v42  ;;  %v10213_v42 = vrot.slane %v8624_v51, 2 }
 0x43e   :  { %3858 = vmatprep.subr.bf16.mxu1 %v10257_v54 }
 0x441   :  { %3859 = vmatpush1.bf16.msra.mxu1 %v7312_v29  ;;  %v3629_v29 = vsel %vm1556_vm7, %v10213_v42, %v3628_v17 }
 0x442   :  { %3860 = vmatprep.subr.bf16.mxu1 %v10257_v54 }
 0x444   :  { %3512 = vmatmul.mubr.bf16.gmra.mrb[72].mxu1 %v8672_v47 }
 0x445   :  { %6238 = vmatprep.mubr.msk.bf16.mxu1 %vm3134_vm10, %v8685_v2  ;;  %3861 = vmatpush1.bf16.msra.mxu1 %v7313_v14 }
 0x446   :  { %3862 = vmatprep.subr.bf16.mxu1 %v10257_v54 }
 0x449   :  { %3863 = vmatpush1.bf16.msra.mxu1 %v7314_v23  ;;  %v10212_v23 = vrot.slane %v8644_v1, 2 }
 0x44a   :  { %3864 = vmatprep.subr.bf16.mxu1 %v10257_v54 }
 0x44c   :  { %3520 = vmatmul.mubr.bf16.gmra.mrb[76].mxu1 %v8697_v49 }
 0x44d   :  { %6239 = vmatprep.mubr.msk.bf16.mxu1 %vm3134_vm10, %v8710_v24  ;;  %3865 = vmatpush1.bf16.msra.mxu1 %v7315_v0  ;;  %v3625_v0 = vrot.slane %v8641_v20, 2 }
 0x44e   :  { %3866 = vmatprep.subr.bf16.mxu1 %v10257_v54 }
 0x451   :  { %3867 = vmatpush1.bf16.msra.mxu1 %v7316_v46 }
 0x452   :  { %3868 = vmatprep.subr.bf16.mxu1 %v10257_v54 }
 0x454   :  { %3528 = vmatmul.mubr.bf16.gmra.mrb[80].mxu1 %v8722_v45 }
 0x455   :  { %6240 = vmatprep.mubr.msk.bf16.mxu1 %vm3134_vm10, %v8735_v31  ;;  %3869 = vmatpush1.bf16.msra.mxu1 %v7317_v11  ;;  %v3632_v11 = vrot.slane %v8659_v56, 2 }
 0x456   :  { %3870 = vmatprep.subr.bf16.mxu1 %v10257_v54 }
 0x459   :  { %3871 = vmatpush1.bf16.msra.mxu1 %v7318_v58 }
 0x45a   :  { %3872 = vmatprep.subr.bf16.mxu1 %v10257_v54 }
 0x45c   :  { %3536 = vmatmul.mubr.bf16.gmra.mrb[84].mxu1 %v8747_v57 }
 0x45d   :  { %6241 = vmatprep.mubr.msk.bf16.mxu1 %vm3134_vm10, %v8760_v41  ;;  %3873 = vmatpush1.bf16.msra.mxu1 %v7319_v3  ;;  %v7321_v3 = vld [vmem:[%s10179_s3 + $0x120] sm:$0xff]  }
 0x45e   :  { %3874 = vmatprep.subr.bf16.mxu1 %v10257_v54 }
 0x461   :  { %3875 = vmatpush1.bf16.msra.mxu1 %v7320_v12 }
 0x462   :  { %4275 = vmatprep.subr.bf16.mxu1 %v10257_v54 }
 0x464   :  { %3544 = vmatmul.mubr.bf16.gmra.mrb[88].mxu1 %v8772_v50 }
 0x465   :  { %6242 = vmatprep.mubr.msk.bf16.mxu1 %vm3134_vm10, %v8785_v44 }
 0x46c   :  { %3552 = vmatmul.mubr.bf16.gmra.mrb[92].mxu1 %v8797_v53 }
 0x46d   :  { %6243 = vmatprep.mubr.msk.bf16.mxu1 %vm3134_vm10, %v8807_v43 }
 0x474   :  { %3560 = vmatmul.mubr.bf16.gmra.mrb[96].mxu1 %v8816_v26 }
 0x475   :  { %6244 = vmatprep.mubr.msk.bf16.mxu1 %vm3134_vm10, %v8825_v32 }
 0x47c   :  { %3568 = vmatmul.mubr.bf16.gmra.mrb[100].mxu1 %v8833_v15 }
 0x47d   :  { %6245 = vmatprep.mubr.msk.bf16.mxu1 %vm3134_vm10, %v8842_v4 }
 0x484   :  { %3576 = vmatmul.mubr.bf16.gmra.mrb[104].mxu1 %v8850_v21 }
 0x485   :  { %6246 = vmatprep.mubr.msk.bf16.mxu1 %vm3134_vm10, %v8859_v9 }
 0x486   :  { %v9031_v35 = vpop.f32.mrb[0].mxu1 }
 0x487   :  { %v3218_v7 = vpop.f32.mrb[1].mxu1 }
 0x488   :  { %v9033_v13 = vpop.f32.mrb[2].mxu1  ;;  %v3626_v7 = vsel %vm1556_vm7, %v10212_v23, %v3625_v0  ;;  %v3648_v23 = vrot.slane %v8760_v41, 2 }
 0x489   :  { %v3221_v39 = vpop.f32.mrb[3].mxu1 }
 0x48a   :  { %v3633_v39 = vsel %vm1556_vm7, %v3628_v17, %v3632_v11 }
 0x48c   :  { %3584 = vmatmul.mubr.bf16.gmra.mrb[108].mxu1 %v8867_v30 }
 0x48d   :  { %6247 = vmatprep.mubr.msk.bf16.mxu1 %vm3134_vm10, %v8876_v22 }
 0x48e   :  { %v9038_v28 = vpop.f32.mrb[4].mxu1 }
 0x48f   :  { %v3226_v18 = vpop.f32.mrb[5].mxu1 }
 0x490   :  { %v9040_v6 = vpop.f32.mrb[6].mxu1  ;;  %v7322_v18 = vld [vmem:[%s10179_s3 + $0x128] sm:$0xff]  }
 0x491   :  { %v3229_v10 = vpop.f32.mrb[7].mxu1 }
 0x494   :  { %3592 = vmatmul.mubr.bf16.gmra.mrb[112].mxu1 %v8884_v8 }
 0x495   :  { %6248 = vmatprep.mubr.msk.bf16.mxu1 %vm3134_vm10, %v8893_v40 }
 0x496   :  { %v9045_v52 = vpop.f32.mrb[8].mxu1 }
 0x497   :  { %v3234_v16 = vpop.f32.mrb[9].mxu1 }
 0x498   :  { %v9047_v62 = vpop.f32.mrb[10].mxu1  ;;  %v3630_v16 = vrot.slane %v8672_v47, 2 }
 0x499   :  { %v3237_v38 = vpop.f32.mrb[11].mxu1 }
 0x49c   :  { %3600 = vmatmul.mubr.bf16.gmra.mrb[116].mxu1 %v8901_v33 }
 0x49d   :  { %6249 = vmatprep.mubr.msk.bf16.mxu1 %vm3134_vm10, %v8910_v25 }
 0x49e   :  { %v9052_v27 = vpop.f32.mrb[12].mxu1 }
 0x49f   :  { %v3242_v59 = vpop.f32.mrb[13].mxu1 }
 0x4a0   :  { %v9054_v5 = vpop.f32.mrb[14].mxu1  ;;  %v3636_v59 = vrot.slane %v8685_v2, 2 }
 0x4a1   :  { %v3245_v19 = vpop.f32.mrb[15].mxu1 }
 0x4a4   :  { %3608 = vmatmul.mubr.bf16.gmra.mrb[120].mxu1 %v8918_v36 }
 0x4a5   :  { %6250 = vmatprep.mubr.msk.bf16.mxu1 %vm3134_vm10, %v8931_v63 }
 0x4a6   :  { %v9059_v37 = vpop.f32.mrb[16].mxu1 }
 0x4a7   :  { %v3250_v61 = vpop.f32.mrb[17].mxu1 }
 0x4a8   :  { %v9062_v34 = vpop.f32.mrb[18].mxu1  ;;  %v7323_v61 = vld [vmem:[%s10179_s3 + $0x130] sm:$0xff]  }
 0x4a9   :  { %v3253_v55 = vpop.f32.mrb[19].mxu1 }
 0x4aa   :  { %v3631_v55 = vsel %vm1556_vm7, %v3625_v0, %v3630_v16 }
 0x4ac   :  { %3616 = vmatmul.mubr.bf16.gmra.mrb[124].mxu1 %v8933_v60 }
 0x4ad   :  { %6287 = vmatprep.mubr.msk.bf16.mxu1 %vm3134_vm10, %v3629_v29  ;;  %v3637_v29 = vsel %vm1556_vm7, %v3632_v11, %v3636_v59  ;;  %v7325_v11 = vld [vmem:[%s10179_s3 + $0x140] sm:$0xff]  }
 0x4ae   :  { %v9070_v14 = vpop.f32.mrb[20].mxu1 }
 0x4af   :  { %v3258_v46 = vpop.f32.mrb[21].mxu1 }
 0x4b0   :  { %v9075_v58 = vpop.f32.mrb[22].mxu1  ;;  %v7324_v46 = vld [vmem:[%s10179_s3 + $0x138] sm:$0xff]  }
 0x4b1   :  { %v3261_v12 = vpop.f32.mrb[23].mxu1 }
 0x4b2   :  { %v3634_v12 = vrot.slane %v8697_v49, 2 }
 0x4b4   :  { %3885 = vmatmul.mubr.bf16.vlgmr.msra.gmra.mrb[128].mxu1 %v3626_v7 }
 0x4b5   :  { %6288 = vmatprep.mubr.msk.bf16.mxu1 %vm3134_vm10, %v3633_v39  ;;  %4276 = vmatpush1.bf16.msra.mxu1 %v7321_v3  ;;  %v3640_v39 = vrot.slane %v8710_v24, 2 }
 0x4b6   :  { %4277 = vmatprep.subr.bf16.mxu1 %v10257_v54  ;;  %v9089_v10 = vpop.f32.mrb[24].mxu1 }
 0x4b7   :  { %v3266_v38 = vpop.f32.mrb[25].mxu1 }
 0x4b8   :  { %v9093_v19 = vpop.f32.mrb[26].mxu1  ;;  %v3635_v38 = vsel %vm1556_vm7, %v3630_v16, %v3634_v12 }
 0x4b9   :  { %4278 = vmatpush1.bf16.msra.mxu1 %v7322_v18  ;;  %v3269_v17 = vpop.f32.mrb[27].mxu1 }
 0x4ba   :  { %4279 = vmatprep.subr.bf16.mxu1 %v10257_v54  ;;  %v7326_v17 = vld [vmem:[%s10179_s3 + $0x148] sm:$0xff]  }
 0x4bc   :  { %3893 = vmatmul.mubr.bf16.gmra.mrb[132].mxu1 %v3631_v55 }
 0x4bd   :  { %6289 = vmatprep.mubr.msk.bf16.mxu1 %vm3134_vm10, %v3637_v29  ;;  %4280 = vmatpush1.bf16.msra.mxu1 %v7323_v61  ;;  %v3641_v61 = vsel %vm1556_vm7, %v3636_v59, %v3640_v39  ;;  %v3638_v29 = vrot.slane %v8722_v45, 2  ;;  %v7327_v59 = vld [vmem:[%s10179_s3 + $0x150] sm:$0xff]  }
 0x4be   :  { %4281 = vmatprep.subr.bf16.mxu1 %v10257_v54  ;;  %v9106_v3 = vpop.f32.mrb[28].mxu1 }
 0x4bf   :  { %v3274_v7 = vpop.f32.mrb[29].mxu1 }
 0x4c0   :  { %v9110_v0 = vpop.f32.mrb[30].mxu1  ;;  %v3644_v7 = vrot.slane %v8735_v31, 2 }
 0x4c1   :  { %4282 = vmatpush1.bf16.msra.mxu1 %v7324_v46  ;;  %v3277_v18 = vpop.f32.mrb[31].mxu1 }
 0x4c2   :  { %4283 = vmatprep.subr.bf16.mxu1 %v10257_v54  ;;  %v3639_v18 = vsel %vm1556_vm7, %v3634_v12, %v3638_v29 }
 0x4c4   :  { %3901 = vmatmul.mubr.bf16.gmra.mrb[136].mxu1 %v3635_v38  ;;  %v3645_v38 = vsel %vm1556_vm7, %v3640_v39, %v3644_v7  ;;  %v7329_v39 = vld [vmem:[%s10179_s3 + $0x160] sm:$0xff]  }
 0x4c5   :  { %6290 = vmatprep.mubr.msk.bf16.mxu1 %vm3134_vm10, %v3641_v61  ;;  %4284 = vmatpush1.bf16.msra.mxu1 %v7325_v11  ;;  %v7328_v61 = vld [vmem:[%s10179_s3 + $0x158] sm:$0xff]  }
 0x4c6   :  { %4285 = vmatprep.subr.bf16.mxu1 %v10257_v54  ;;  %v9123_v55 = vpop.f32.mrb[32].mxu1 }
 0x4c7   :  { %v3282_v46 = vpop.f32.mrb[33].mxu1 }
 0x4c8   :  { %v9127_v16 = vpop.f32.mrb[34].mxu1  ;;  %v3642_v46 = vrot.slane %v8747_v57, 2 }
 0x4c9   :  { %4286 = vmatpush1.bf16.msra.mxu1 %v7326_v17  ;;  %v3285_v11 = vpop.f32.mrb[35].mxu1 }
 0x4ca   :  { %4287 = vmatprep.subr.bf16.mxu1 %v10257_v54 }
 0x4cc   :  { %3909 = vmatmul.mubr.bf16.gmra.mrb[140].mxu1 %v3639_v18  ;;  %v3643_v18 = vsel %vm1556_vm7, %v3638_v29, %v3642_v46 }
 0x4cd   :  { %6291 = vmatprep.mubr.msk.bf16.mxu1 %vm3134_vm10, %v3645_v38  ;;  %4288 = vmatpush1.bf16.msra.mxu1 %v7327_v59  ;;  %v3649_v38 = vsel %vm1556_vm7, %v3644_v7, %v3648_v23  ;;  %v7331_v7 = vld [vmem:[%s10179_s3 + $0x170] sm:$0xff]  }
 0x4ce   :  { %4289 = vmatprep.subr.bf16.mxu1 %v10257_v54  ;;  %v9140_v17 = vpop.f32.mrb[36].mxu1 }
 0x4cf   :  { %v3290_v11 = vpop.f32.mrb[37].mxu1 }
 0x4d0   :  { %v9144_v12 = vpop.f32.mrb[38].mxu1  ;;  %v7330_v11 = vld [vmem:[%s10179_s3 + $0x168] sm:$0xff]  }
 0x4d1   :  { %10288 = vst [vmem:[#allocation20_spill] sm:$0xff] %v9144_v12  ;;  %4290 = vmatpush1.bf16.msra.mxu1 %v7328_v61  ;;  %v3293_v59 = vpop.f32.mrb[39].mxu1  ;;  %v3652_v12 = vrot.slane %v8785_v44, 2  ;;  %v3656_v44 = vrot.slane %v8807_v43, 2  ;;  %v3660_v43 = vrot.slane %v8825_v32, 2 }
 0x4d2   :  { %4291 = vmatprep.subr.bf16.mxu1 %v10257_v54  ;;  %v3646_v59 = vrot.slane %v8772_v50, 2 }
 0x4d4   :  { %3917 = vmatmul.mubr.bf16.gmra.mrb[144].mxu1 %v3643_v18  ;;  %v3647_v18 = vsel %vm1556_vm7, %v3642_v46, %v3646_v59 }
 0x4d5   :  { %6292 = vmatprep.mubr.msk.bf16.mxu1 %vm3134_vm10, %v3649_v38  ;;  %4292 = vmatpush1.bf16.msra.mxu1 %v7329_v39  ;;  %v3653_v38 = vsel %vm1556_vm7, %v3648_v23, %v3652_v12 }
 0x4d6   :  { %4293 = vmatprep.subr.bf16.mxu1 %v10257_v54  ;;  %v9157_v61 = vpop.f32.mrb[40].mxu1 }
 0x4d7   :  { %v3298_v42 = vpop.f32.mrb[41].mxu1 }
 0x4d8   :  { %v9161_v29 = vpop.f32.mrb[42].mxu1  ;;  %v7332_v42 = vld [vmem:[%s10179_s3 + $0x178] sm:$0xff]  }
 0x4d9   :  { %10289 = vst [vmem:[#allocation18_spill] sm:$0xff] %v9161_v29  ;;  %4294 = vmatpush1.bf16.msra.mxu1 %v7330_v11  ;;  %v3301_v39 = vpop.f32.mrb[43].mxu1 }
 0x4da   :  { %4295 = vmatprep.subr.bf16.mxu1 %v10257_v54  ;;  %v3650_v39 = vrot.slane %v8797_v53, 2 }
 0x4dc   :  { %3925 = vmatmul.mubr.bf16.gmra.mrb[148].mxu1 %v3647_v18  ;;  %v3657_v18 = vsel %vm1556_vm7, %v3652_v12, %v3656_v44 }
 0x4dd   :  { %6293 = vmatprep.mubr.msk.bf16.mxu1 %vm3134_vm10, %v3653_v38  ;;  %4296 = vmatpush1.bf16.msra.mxu1 %v7331_v7  ;;  %v3651_v7 = vsel %vm1556_vm7, %v3646_v59, %v3650_v39  ;;  %v3661_v59 = vsel %vm1556_vm7, %v3656_v44, %v3660_v43 }
 0x4de   :  { %4297 = vmatprep.subr.bf16.mxu1 %v10257_v54  ;;  %v9174_v11 = vpop.f32.mrb[44].mxu1 }
 0x4df   :  { %10290 = vst [vmem:[#allocation17_spill] sm:$0xff] %v9174_v11  ;;  %v3306_v29 = vpop.f32.mrb[45].mxu1  ;;  %v3654_v11 = vrot.slane %v8816_v26, 2 }
 0x4e0   :  { %v9178_v46 = vpop.f32.mrb[46].mxu1 }
 0x4e1   :  { %4298 = vmatpush1.bf16.msra.mxu1 %v7332_v42  ;;  %v3309_v23 = vpop.f32.mrb[47].mxu1 }
 0x4e2   :  { %4698 = vmatprep.subr.bf16.mxu1 %v10257_v54  ;;  %v3655_v23 = vsel %vm1556_vm7, %v3650_v39, %v3654_v11 }
 0x4e4   :  { %3933 = vmatmul.mubr.bf16.gmra.mrb[152].mxu1 %v3651_v7  ;;  %v3658_v7 = vrot.slane %v8833_v15, 2 }
 0x4e5   :  { %6294 = vmatprep.mubr.msk.bf16.mxu1 %vm3134_vm10, %v3657_v18 }
 0x4e6   :  { %v9184_v38 = vpop.f32.mrb[48].mxu1 }
 0x4e7   :  { %10291 = vst [vmem:[#allocation19_spill] sm:$0xff] %v9184_v38  ;;  %v3314_v29 = vpop.f32.mrb[49].mxu1  ;;  %v3664_v38 = vrot.slane %v8842_v4, 2 }
 0x4e8   :  { %v9188_v53 = vpop.f32.mrb[50].mxu1 }
 0x4e9   :  { %10292 = vst [vmem:[#allocation24_spill] sm:$0xff] %v9188_v53  ;;  %v3317_v42 = vpop.f32.mrb[51].mxu1  ;;  %v3659_v53 = vsel %vm1556_vm7, %v3654_v11, %v3658_v7  ;;  %v3665_v39 = vsel %vm1556_vm7, %v3660_v43, %v3664_v38  ;;  %v3666_v43 = vrot.slane %v8867_v30, 2 }
 0x4ea   :  { %v3662_v42 = vrot.slane %v8850_v21, 2 }
 0x4ec   :  { %3941 = vmatmul.mubr.bf16.gmra.mrb[156].mxu1 %v3655_v23 }
 0x4ed   :  { %6295 = vmatprep.mubr.msk.bf16.mxu1 %vm3134_vm10, %v3661_v59  ;;  %v3668_v59 = vrot.slane %v8859_v9, 2 }
 0x4ef   :  { %v9193_v12 = vpop.f32.mrb[52].mxu1 }
 0x4f0   :  { %v3322_v18 = vpop.f32.mrb[53].mxu1 }
 0x4f1   :  { %v9197_v29 = vpop.f32.mrb[54].mxu1 }
 0x4f2   :  { %10293 = vst [vmem:[#allocation22_spill] sm:$0xff] %v9197_v29  ;;  %v3325_v32 = vpop.f32.mrb[55].mxu1  ;;  %v3663_v29 = vsel %vm1556_vm7, %v3658_v7, %v3662_v42  ;;  %v3670_v7 = vrot.slane %v8884_v8, 2 }
 0x4f3   :  { %v3669_v32 = vsel %vm1556_vm7, %v3664_v38, %v3668_v59 }
 0x4f4   :  { %3949 = vmatmul.mubr.bf16.gmra.mrb[160].mxu1 %v3659_v53 }
 0x4f5   :  { %6296 = vmatprep.mubr.msk.bf16.mxu1 %vm3134_vm10, %v3665_v39  ;;  %v3672_v39 = vrot.slane %v8876_v22, 2 }
 0x4f7   :  { %v9202_v44 = vpop.f32.mrb[56].mxu1 }
 0x4f8   :  { %v3330_v23 = vpop.f32.mrb[57].mxu1 }
 0x4f9   :  { %v9206_v18 = vpop.f32.mrb[58].mxu1 }
 0x4fa   :  { %10294 = vst [vmem:[#allocation21_spill] sm:$0xff] %v9206_v18  ;;  %v3333_v4 = vpop.f32.mrb[59].mxu1  ;;  %v3667_v18 = vsel %vm1556_vm7, %v3662_v42, %v3666_v43  ;;  %v3671_v42 = vsel %vm1556_vm7, %v3666_v43, %v3670_v7 }
 0x4fb   :  { %v3673_v4 = vsel %vm1556_vm7, %v3668_v59, %v3672_v39 }
 0x4fc   :  { %3957 = vmatmul.mubr.bf16.gmra.mrb[164].mxu1 %v3663_v29 }
 0x4fd   :  { %6297 = vmatprep.mubr.msk.bf16.mxu1 %vm3134_vm10, %v3669_v32  ;;  %v3676_v32 = vrot.slane %v8893_v40, 2  ;;  %v3680_v40 = vrot.slane %v8910_v25, 2 }
 0x4ff   :  { %v9211_v53 = vpop.f32.mrb[60].mxu1  ;;  %v3677_v59 = vsel %vm1556_vm7, %v3672_v39, %v3676_v32  ;;  %v3681_v43 = vsel %vm1556_vm7, %v3676_v32, %v3680_v40 }
 0x500   :  { %10295 = vst [vmem:[#allocation23_spill] sm:$0xff] %v9211_v53  ;;  %v3338_v11 = vpop.f32.mrb[61].mxu1 }
 0x501   :  { %v9215_v23 = vpop.f32.mrb[62].mxu1 }
 0x502   :  { %v3341_v9 = vpop.f32.mrb[63].mxu1 }
 0x504   :  { %3965 = vmatmul.mubr.bf16.gmra.mrb[168].mxu1 %v3667_v18 }
 0x505   :  { %6298 = vmatprep.mubr.msk.bf16.mxu1 %vm3134_vm10, %v3673_v4  ;;  %v3674_v4 = vrot.slane %v8901_v33, 2 }
 0x507   :  { %v3497_v38 = vpop.f32.mrb[64].mxu1 }
 0x508   :  { %v3499_v29 = vpop.f32.mrb[65].mxu1  ;;  %v9223_v11 = vadd.f32 %v3497_v38, %v9031_v35 }
 0x509   :  { %v3500_v22 = vpop.f32.mrb[66].mxu1 }
 0x50a   :  { %v3502_v53 = vpop.f32.mrb[67].mxu1  ;;  %v9226_v9 = vadd.f32 %v3500_v22, %v9033_v13  ;;  %v3675_v13 = vsel %vm1556_vm7, %v3670_v7, %v3674_v4 }
 0x50c   :  { %3973 = vmatmul.mubr.bf16.gmra.mrb[172].mxu1 %v3671_v42  ;;  %v3678_v42 = vrot.slane %v8918_v36, 2 }
 0x50d   :  { %6299 = vmatprep.mubr.msk.bf16.mxu1 %vm3134_vm10, %v3677_v59 }
 0x50e   :  { %v3679_v7 = vsel %vm1556_vm7, %v3674_v4, %v3678_v42  ;;  %v10296_v4 = vrot.slane %v8624_v51, 2 }
 0x50f   :  { %v3505_v18 = vpop.f32.mrb[68].mxu1 }
 0x510   :  { %v3507_v29 = vpop.f32.mrb[69].mxu1  ;;  %v9234_v35 = vadd.f32 %v3505_v18, %v9038_v28 }
 0x511   :  { %v3508_v53 = vpop.f32.mrb[70].mxu1  ;;  %v3684_v29 = vrot.slane %v8931_v63, 2 }
 0x512   :  { %v3510_v38 = vpop.f32.mrb[71].mxu1  ;;  %v9237_v22 = vadd.f32 %v3508_v53, %v9040_v6 }
 0x513   :  { %v3685_v32 = vsel %vm1556_vm7, %v3680_v40, %v3684_v29  ;;  %v3707_v40 = vsel %vm1556_vm7, %v3684_v29, %v10296_v4 }
 0x514   :  { %3981 = vmatmul.mubr.bf16.gmra.mrb[176].mxu1 %v3675_v13  ;;  %v3682_v13 = vrot.slane %v8933_v60, 2 }
 0x515   :  { %6300 = vmatprep.mubr.msk.bf16.mxu1 %vm3134_vm10, %v3681_v43 }
 0x517   :  { %v3513_v39 = vpop.f32.mrb[72].mxu1 }
 0x518   :  { %v3515_v59 = vpop.f32.mrb[73].mxu1  ;;  %v9245_v28 = vadd.f32 %v3513_v39, %v9045_v52 }
 0x519   :  { %v3516_v18 = vpop.f32.mrb[74].mxu1 }
 0x51a   :  { %v3518_v38 = vpop.f32.mrb[75].mxu1  ;;  %v9248_v6 = vadd.f32 %v3516_v18, %v9047_v62  ;;  %v3683_v18 = vsel %vm1556_vm7, %v3678_v42, %v3682_v13 }
 0x51c   :  { %3989 = vmatmul.mubr.bf16.gmra.mrb[180].mxu1 %v3679_v7 }
 0x51d   :  { %6301 = vmatprep.mubr.msk.bf16.mxu1 %vm3134_vm10, %v3685_v32  ;;  %v4050_v32 = vrot.slane %v8630_v48, 3 }
 0x51f   :  { %v3521_v53 = vpop.f32.mrb[76].mxu1 }
 0x520   :  { %v9255_v43 = vadd.f32 %v3521_v53, %v9052_v27  ;;  %v3523_v52 = vpop.f32.mrb[77].mxu1 }
 0x521   :  { %v3524_v39 = vpop.f32.mrb[78].mxu1  ;;  %v10231_v52 = vrot.slane %v8624_v51, 3 }
 0x522   :  { %v9258_v59 = vadd.f32 %v3524_v39, %v9054_v5  ;;  %v3526_v62 = vpop.f32.mrb[79].mxu1  ;;  %v10297_v39 = vrot.slane %v8644_v1, 2 }
 0x524   :  { %3997 = vmatmul.mubr.bf16.gmra.mrb[184].mxu1 %v3683_v18  ;;  %v3703_v29 = vsel %vm1556_vm7, %v3682_v13, %v10297_v39  ;;  %v10230_v18 = vrot.slane %v8644_v1, 3  ;;  %v7333_v13 = vld [vmem:[%s10179_s3 + $0x180] sm:$0xff]  }
 0x525   :  { %6302 = vmatprep.mubr.msk.bf16.mxu1 %vm3134_vm10, %v3707_v40 }
 0x527   :  { %v3529_v38 = vpop.f32.mrb[80].mxu1 }
 0x528   :  { %v9266_v7 = vadd.f32 %v3529_v38, %v9059_v37  ;;  %v3531_v27 = vpop.f32.mrb[81].mxu1  ;;  %v4051_v37 = vsel %vm4045_vm11, %v10231_v52, %v4050_v32  ;;  %v4054_v38 = vrot.slane %v8659_v56, 3 }
 0x529   :  { %v3532_v53 = vpop.f32.mrb[82].mxu1 }
 0x52a   :  { %v9270_v5 = vadd.f32 %v3532_v53, %v9062_v34  ;;  %v3534_v42 = vpop.f32.mrb[83].mxu1  ;;  %v4047_v34 = vrot.slane %v8641_v20, 3 }
 0x52c   :  { %4005 = vmatmul.mubr.bf16.gmra.mrb[188].mxu1 %v3703_v29  ;;  %v4048_v39 = vsel %vm4045_vm11, %v10230_v18, %v4047_v34  ;;  %v7334_v29 = vld [vmem:[%s10179_s3 + $0x188] sm:$0xff]  }
 0x52d   :  { %6339 = vmatprep.mubr.msk.bf16.mxu1 %vm3134_vm10, %v4051_v37 }
 0x52f   :  { %v3537_v62 = vpop.f32.mrb[84].mxu1 }
 0x530   :  { %v9283_v4 = vadd.f32 %v3537_v62, %v9070_v14  ;;  %v3539_v40 = vpop.f32.mrb[85].mxu1  ;;  %v4055_v14 = vsel %vm4045_vm11, %v4050_v32, %v4054_v38  ;;  %v7335_v32 = vld [vmem:[%s10179_s3 + $0x190] sm:$0xff]  }
 0x531   :  { %v3540_v27 = vpop.f32.mrb[86].mxu1 }
 0x532   :  { %v9290_v53 = vadd.f32 %v3540_v27, %v9075_v58  ;;  %v3542_v42 = vpop.f32.mrb[87].mxu1  ;;  %v4052_v58 = vrot.slane %v8672_v47, 3  ;;  %v4058_v27 = vrot.slane %v8685_v2, 3 }
 0x534   :  { %4308 = vmatmul.mubr.bf16.vlgmr.msra.gmra.mrb[192].mxu1 %v4048_v39 }
 0x535   :  { %6340 = vmatprep.mubr.msk.bf16.mxu1 %vm3134_vm10, %v4055_v14  ;;  %4699 = vmatpush1.bf16.msra.mxu1 %v7333_v13  ;;  %v4053_v14 = vsel %vm4045_vm11, %v4047_v34, %v4052_v58  ;;  %v4062_v34 = vrot.slane %v8710_v24, 3 }
 0x536   :  { %4700 = vmatprep.subr.bf16.mxu1 %v10257_v54 }
 0x537   :  { %v3545_v37 = vpop.f32.mrb[88].mxu1 }
 0x538   :  { %v9303_v62 = vadd.f32 %v3545_v37, %v9089_v10  ;;  %v3547_v40 = vpop.f32.mrb[89].mxu1  ;;  %v4059_v10 = vsel %vm4045_vm11, %v4054_v38, %v4058_v27  ;;  %v7337_v38 = vld [vmem:[%s10179_s3 + $0x1a0] sm:$0xff]  }
 0x539   :  { %v3548_v42 = vpop.f32.mrb[90].mxu1  ;;  %4701 = vmatpush1.bf16.msra.mxu1 %v7334_v29  ;;  %v7336_v29 = vld [vmem:[%s10179_s3 + $0x198] sm:$0xff]  }
 0x53a   :  { %v9310_v13 = vadd.f32 %v3548_v42, %v9093_v19  ;;  %v3550_v39 = vpop.f32.mrb[91].mxu1  ;;  %4702 = vmatprep.subr.bf16.mxu1 %v10257_v54  ;;  %v4056_v19 = vrot.slane %v8697_v49, 3 }
 0x53c   :  { %4316 = vmatmul.mubr.bf16.gmra.mrb[196].mxu1 %v4053_v14 }
 0x53d   :  { %6341 = vmatprep.mubr.msk.bf16.mxu1 %vm3134_vm10, %v4059_v10  ;;  %4703 = vmatpush1.bf16.msra.mxu1 %v7335_v32  ;;  %v4057_v10 = vsel %vm4045_vm11, %v4052_v58, %v4056_v19  ;;  %v4066_v58 = vrot.slane %v8735_v31, 3 }
 0x53e   :  { %4704 = vmatprep.subr.bf16.mxu1 %v10257_v54 }
 0x53f   :  { %v3553_v37 = vpop.f32.mrb[92].mxu1 }
 0x540   :  { %v9322_v40 = vadd.f32 %v3553_v37, %v9106_v3  ;;  %v3555_v42 = vpop.f32.mrb[93].mxu1  ;;  %v4063_v3 = vsel %vm4045_vm11, %v4058_v27, %v4062_v34  ;;  %v7339_v27 = vld [vmem:[%s10179_s3 + $0x1b0] sm:$0xff]  }
 0x541   :  { %v3556_v39 = vpop.f32.mrb[94].mxu1  ;;  %4705 = vmatpush1.bf16.msra.mxu1 %v7336_v29  ;;  %v7338_v29 = vld [vmem:[%s10179_s3 + $0x1a8] sm:$0xff]  }
 0x542   :  { %v9329_v32 = vadd.f32 %v3556_v39, %v9110_v0  ;;  %v3558_v14 = vpop.f32.mrb[95].mxu1  ;;  %4706 = vmatprep.subr.bf16.mxu1 %v10257_v54  ;;  %v4060_v0 = vrot.slane %v8722_v45, 3 }
 0x544   :  { %4324 = vmatmul.mubr.bf16.gmra.mrb[200].mxu1 %v4057_v10 }
 0x545   :  { %6342 = vmatprep.mubr.msk.bf16.mxu1 %vm3134_vm10, %v4063_v3  ;;  %4707 = vmatpush1.bf16.msra.mxu1 %v7337_v38  ;;  %v4061_v3 = vsel %vm4045_vm11, %v4056_v19, %v4060_v0  ;;  %v4070_v19 = vrot.slane %v8760_v41, 3 }
 0x546   :  { %4708 = vmatprep.subr.bf16.mxu1 %v10257_v54 }
 0x547   :  { %v3561_v37 = vpop.f32.mrb[96].mxu1 }
 0x548   :  { %v9341_v42 = vadd.f32 %v3561_v37, %v9123_v55  ;;  %v3563_v39 = vpop.f32.mrb[97].mxu1  ;;  %v4067_v55 = vsel %vm4045_vm11, %v4062_v34, %v4066_v58  ;;  %v7341_v34 = vld [vmem:[%s10179_s3 + $0x1c0] sm:$0xff]  }
 0x549   :  { %v3564_v14 = vpop.f32.mrb[98].mxu1  ;;  %4709 = vmatpush1.bf16.msra.mxu1 %v7338_v29  ;;  %v7340_v29 = vld [vmem:[%s10179_s3 + $0x1b8] sm:$0xff]  }
 0x54a   :  { %v9348_v38 = vadd.f32 %v3564_v14, %v9127_v16  ;;  %v3566_v10 = vpop.f32.mrb[99].mxu1  ;;  %4710 = vmatprep.subr.bf16.mxu1 %v10257_v54  ;;  %v4064_v16 = vrot.slane %v8747_v57, 3 }
 0x54c   :  { %4332 = vmatmul.mubr.bf16.gmra.mrb[204].mxu1 %v4061_v3  ;;  %v4065_v18 = vsel %vm4045_vm11, %v4060_v0, %v4064_v16  ;;  %v10300_v0 = vld [vmem:[#allocation31_spill] sm:$0xff] }
 0x54d   :  { %6343 = vmatprep.mubr.msk.bf16.mxu1 %vm3134_vm10, %v4067_v55  ;;  %4711 = vmatpush1.bf16.msra.mxu1 %v7339_v27  ;;  %v10298_v27 = vld [vmem:[#allocation20_spill] sm:$0xff] }
 0x54e   :  { %4712 = vmatprep.subr.bf16.mxu1 %v10257_v54 }
 0x54f   :  { %v3569_v37 = vpop.f32.mrb[100].mxu1 }
 0x550   :  { %v9360_v39 = vadd.f32 %v3569_v37, %v9140_v17  ;;  %v3571_v14 = vpop.f32.mrb[101].mxu1  ;;  %v4071_v17 = vsel %vm4045_vm11, %v4066_v58, %v4070_v19  ;;  %v7343_v58 = vld [vmem:[%s10179_s3 + $0x1d0] sm:$0xff]  }
 0x551   :  { %v3572_v10 = vpop.f32.mrb[102].mxu1  ;;  %4713 = vmatpush1.bf16.msra.mxu1 %v7340_v29  ;;  %v7342_v29 = vld [vmem:[%s10179_s3 + $0x1c8] sm:$0xff]   ;;  %v4068_v14 = vrot.slane %v8772_v50, 3 }
 0x552   :  { %v9367_v3 = vadd.f32 %v3572_v10, %v10298_v27  ;;  %v3574_v55 = vpop.f32.mrb[103].mxu1  ;;  %4714 = vmatprep.subr.bf16.mxu1 %v10257_v54 }
 0x553   :  { %v4069_v50 = vsel %vm4045_vm11, %v4064_v16, %v4068_v14  ;;  %v10306_v16 = vld [vmem:[#allocation11_spill] sm:$0xff] }
 0x554   :  { %4340 = vmatmul.mubr.bf16.gmra.mrb[208].mxu1 %v4065_v18  ;;  %v4074_v18 = vrot.slane %v10300_v0, 3 }
 0x555   :  { %6344 = vmatprep.mubr.msk.bf16.mxu1 %vm3134_vm10, %v4071_v17  ;;  %4715 = vmatpush1.bf16.msra.mxu1 %v7341_v34  ;;  %v10301_v34 = vld [vmem:[#allocation18_spill] sm:$0xff] }
 0x556   :  { %4716 = vmatprep.subr.bf16.mxu1 %v10257_v54 }
 0x557   :  { %v3577_v37 = vpop.f32.mrb[104].mxu1 }
 0x558   :  { %v9379_v10 = vadd.f32 %v3577_v37, %v9157_v61  ;;  %v3579_v27 = vpop.f32.mrb[105].mxu1  ;;  %v4075_v61 = vsel %vm4045_vm11, %v4070_v19, %v4074_v18 }
 0x559   :  { %v3580_v55 = vpop.f32.mrb[106].mxu1  ;;  %4717 = vmatpush1.bf16.msra.mxu1 %v7342_v29  ;;  %v7344_v29 = vld [vmem:[%s10179_s3 + $0x1d8] sm:$0xff]  }
 0x55a   :  { %10299 = vst [vmem:[#allocation28_spill] sm:$0xff] %v9379_v10  ;;  %v9386_v17 = vadd.f32 %v3580_v55, %v10301_v34  ;;  %v3582_v52 = vpop.f32.mrb[107].mxu1  ;;  %4718 = vmatprep.subr.bf16.mxu1 %v10257_v54  ;;  %v10303_v27 = vld [vmem:[#allocation32_spill] sm:$0xff] }
 0x55b   :  { %v4072_v55 = vrot.slane %v10303_v27, 3  ;;  %v10304_v52 = vld [vmem:[#allocation17_spill] sm:$0xff] }
 0x55c   :  { %10302 = vst [vmem:[#allocation26_spill] sm:$0xff] %v9386_v17  ;;  %4348 = vmatmul.mubr.bf16.gmra.mrb[212].mxu1 %v4069_v50  ;;  %v4078_v50 = vrot.slane %v10306_v16, 3 }
 0x55d   :  { %6345 = vmatprep.mubr.msk.bf16.mxu1 %vm3134_vm10, %v4075_v61  ;;  %4719 = vmatpush1.bf16.msra.mxu1 %v7343_v58  ;;  %v4073_v61 = vsel %vm4045_vm11, %v4068_v14, %v4072_v55 }
 0x55e   :  { %4720 = vmatprep.subr.bf16.mxu1 %v10257_v54  ;;  %v4079_v54 = vsel %vm4045_vm11, %v4074_v18, %v4078_v50 }
 0x55f   :  { %v3585_v37 = vpop.f32.mrb[108].mxu1 }
 0x560   :  { %v9398_v34 = vadd.f32 %v3585_v37, %v10304_v52  ;;  %v3587_v17 = vpop.f32.mrb[109].mxu1  ;;  %v4076_v37 = vrot.slane %v8816_v26, 3  ;;  %v10307_v52 = vld [vmem:[#allocation19_spill] sm:$0xff] }
 0x561   :  { %v3588_v0 = vpop.f32.mrb[110].mxu1  ;;  %4721 = vmatpush1.bf16.msra.mxu1 %v7344_v29 }
 0x562   :  { %10305 = vst [vmem:[#allocation25_spill] sm:$0xff] %v9398_v34  ;;  %v9402_v19 = vadd.f32 %v3588_v0, %v9178_v46  ;;  %v3590_v58 = vpop.f32.mrb[111].mxu1  ;;  %v10309_v34 = vld [vmem:[#allocation10_spill] sm:$0xff]  ;;  %v10310_v46 = vld [vmem:[#allocation24_spill] sm:$0xff]  ;;  %v4077_v14 = vsel %vm4045_vm11, %v4072_v55, %v4076_v37 }
 0x563   :  { %v4082_v29 = vrot.slane %v10309_v34, 3 }
 0x564   :  { %4356 = vmatmul.mubr.bf16.gmra.mrb[216].mxu1 %v4073_v61 }
 0x565   :  { %6346 = vmatprep.mubr.msk.bf16.mxu1 %vm3134_vm10, %v4079_v54  ;;  %v4083_v18 = vsel %vm4045_vm11, %v4078_v50, %v4082_v29  ;;  %v4080_v54 = vrot.slane %v8833_v15, 3 }
 0x567   :  { %v3593_v27 = vpop.f32.mrb[112].mxu1  ;;  %v4081_v55 = vsel %vm4045_vm11, %v4076_v37, %v4080_v54 }
 0x568   :  { %v9409_v17 = vadd.f32 %v3593_v27, %v10307_v52  ;;  %v3595_v16 = vpop.f32.mrb[113].mxu1  ;;  %v10312_v52 = vld [vmem:[#allocation12_spill] sm:$0xff] }
 0x569   :  { %v3596_v10 = vpop.f32.mrb[114].mxu1  ;;  %v4086_v34 = vrot.slane %v10312_v52, 3 }
 0x56a   :  { %10308 = vst [vmem:[#allocation27_spill] sm:$0xff] %v9409_v17  ;;  %v9413_v0 = vadd.f32 %v3596_v10, %v10310_v46  ;;  %v3598_v58 = vpop.f32.mrb[115].mxu1  ;;  %v10313_v10 = vld [vmem:[#allocation22_spill] sm:$0xff] }
 0x56b   :  { %v4087_v50 = vsel %vm4045_vm11, %v4082_v29, %v4086_v34 }
 0x56c   :  { %4364 = vmatmul.mubr.bf16.gmra.mrb[220].mxu1 %v4077_v14 }
 0x56d   :  { %6347 = vmatprep.mubr.msk.bf16.mxu1 %vm3134_vm10, %v4083_v18  ;;  %v4084_v18 = vrot.slane %v8850_v21, 3 }
 0x56f   :  { %v3601_v61 = vpop.f32.mrb[116].mxu1  ;;  %v4085_v37 = vsel %vm4045_vm11, %v4080_v54, %v4084_v18 }
 0x570   :  { %v9420_v27 = vadd.f32 %v3601_v61, %v9193_v12  ;;  %v3603_v16 = vpop.f32.mrb[117].mxu1 }
 0x571   :  { %v3604_v17 = vpop.f32.mrb[118].mxu1  ;;  %v10315_v16 = vld [vmem:[#allocation14_spill] sm:$0xff] }
 0x572   :  { %10311 = vst [vmem:[#allocation29_spill] sm:$0xff] %v9420_v27  ;;  %v9424_v46 = vadd.f32 %v3604_v17, %v10313_v10  ;;  %v3606_v58 = vpop.f32.mrb[119].mxu1  ;;  %v4090_v52 = vrot.slane %v10315_v16, 3  ;;  %v10316_v17 = vld [vmem:[#allocation21_spill] sm:$0xff] }
 0x573   :  { %v10318_v16 = vld [vmem:[#allocation13_spill] sm:$0xff] }
 0x574   :  { %4372 = vmatmul.mubr.bf16.gmra.mrb[224].mxu1 %v4081_v55  ;;  %v4091_v29 = vsel %vm4045_vm11, %v4086_v34, %v4090_v52 }
 0x575   :  { %6348 = vmatprep.mubr.msk.bf16.mxu1 %vm3134_vm10, %v4087_v50  ;;  %v4088_v50 = vrot.slane %v8867_v30, 3 }
 0x577   :  { %v3609_v14 = vpop.f32.mrb[120].mxu1  ;;  %v4089_v54 = vsel %vm4045_vm11, %v4084_v18, %v4088_v50 }
 0x578   :  { %v9431_v12 = vadd.f32 %v3609_v14, %v9202_v44  ;;  %v3611_v61 = vpop.f32.mrb[121].mxu1  ;;  %v10317_v44 = vld [vmem:[#allocation23_spill] sm:$0xff] }
 0x579   :  { %v3612_v27 = vpop.f32.mrb[122].mxu1 }
 0x57a   :  { %10314 = vst [vmem:[#allocation20_spill] sm:$0xff] %v9431_v12  ;;  %v9435_v10 = vadd.f32 %v3612_v27, %v10316_v17  ;;  %v3614_v58 = vpop.f32.mrb[123].mxu1  ;;  %v4094_v12 = vrot.slane %v10318_v16, 3 }
 0x57c   :  { %4380 = vmatmul.mubr.bf16.gmra.mrb[228].mxu1 %v4085_v37  ;;  %v4095_v34 = vsel %vm4045_vm11, %v4090_v52, %v4094_v12  ;;  %v4092_v37 = vrot.slane %v8884_v8, 3 }
 0x57d   :  { %6349 = vmatprep.mubr.msk.bf16.mxu1 %vm3134_vm10, %v4091_v29 }
 0x57e   :  { %v4093_v18 = vsel %vm4045_vm11, %v4088_v50, %v4092_v37 }
 0x57f   :  { %v3617_v55 = vpop.f32.mrb[124].mxu1 }
 0x580   :  { %v9442_v14 = vadd.f32 %v3617_v55, %v10317_v44  ;;  %v3619_v61 = vpop.f32.mrb[125].mxu1  ;;  %v10319_v44 = vld [vmem:[#allocation15_spill] sm:$0xff] }
 0x581   :  { %v3620_v21 = vpop.f32.mrb[126].mxu1  ;;  %v4098_v61 = vrot.slane %v10319_v44, 3 }
 0x582   :  { %v9446_v27 = vadd.f32 %v3620_v21, %v9215_v23  ;;  %v3622_v17 = vpop.f32.mrb[127].mxu1 }
 0x583   :  { %v4099_v52 = vsel %vm4045_vm11, %v4094_v12, %v4098_v61 }
 0x584   :  { %4388 = vmatmul.mubr.bf16.gmra.mrb[232].mxu1 %v4089_v54  ;;  %v4096_v54 = vrot.slane %v8901_v33, 3 }
 0x585   :  { %6350 = vmatprep.mubr.msk.bf16.mxu1 %vm3134_vm10, %v4095_v34 }
 0x586   :  { %v4097_v50 = vsel %vm4045_vm11, %v4092_v37, %v4096_v54 }
 0x587   :  { %v3886_v58 = vpop.f32.mrb[128].mxu1 }
 0x588   :  { %v9453_v29 = vadd.f32 %v3886_v58, %v9223_v11  ;;  %v3888_v55 = vpop.f32.mrb[129].mxu1  ;;  %v4102_v58 = vrot.slane %v8910_v25, 3 }
 0x589   :  { %v3889_v16 = vpop.f32.mrb[130].mxu1 }
 0x58a   :  { %v9457_v21 = vadd.f32 %v3889_v16, %v9226_v9  ;;  %v3891_v23 = vpop.f32.mrb[131].mxu1  ;;  %v4103_v12 = vsel %vm4045_vm11, %v4098_v61, %v4102_v58 }
 0x58c   :  { %4396 = vmatmul.mubr.bf16.gmra.mrb[236].mxu1 %v4093_v18  ;;  %v4100_v18 = vrot.slane %v8918_v36, 3 }
 0x58d   :  { %6351 = vmatprep.mubr.msk.bf16.mxu1 %vm3134_vm10, %v4099_v52 }
 0x58e   :  { %v4101_v37 = vsel %vm4045_vm11, %v4096_v54, %v4100_v18  ;;  %v10320_v54 = vrot.slane %v8624_v51, 3 }
 0x58f   :  { %v3894_v17 = vpop.f32.mrb[132].mxu1 }
 0x590   :  { %v9464_v11 = vadd.f32 %v3894_v17, %v9234_v35  ;;  %v3896_v34 = vpop.f32.mrb[133].mxu1  ;;  %v4106_v17 = vrot.slane %v8931_v63, 3 }
 0x591   :  { %v3897_v55 = vpop.f32.mrb[134].mxu1 }
 0x592   :  { %v9468_v9 = vadd.f32 %v3897_v55, %v9237_v22  ;;  %v3899_v16 = vpop.f32.mrb[135].mxu1  ;;  %v4107_v61 = vsel %vm4045_vm11, %v4102_v58, %v4106_v17  ;;  %v4130_v58 = vsel %vm4045_vm11, %v4106_v17, %v10320_v54 }
 0x594   :  { %4404 = vmatmul.mubr.bf16.gmra.mrb[240].mxu1 %v4097_v50  ;;  %v4104_v50 = vrot.slane %v8933_v60, 3 }
 0x595   :  { %6352 = vmatprep.mubr.msk.bf16.mxu1 %vm3134_vm10, %v4103_v12 }
 0x597   :  { %v3902_v23 = vpop.f32.mrb[136].mxu1 }
 0x598   :  { %v9475_v35 = vadd.f32 %v3902_v23, %v9245_v28  ;;  %v3904_v52 = vpop.f32.mrb[137].mxu1 }
 0x599   :  { %v3905_v34 = vpop.f32.mrb[138].mxu1 }
 0x59a   :  { %v9479_v22 = vadd.f32 %v3905_v34, %v9248_v6  ;;  %v3907_v55 = vpop.f32.mrb[139].mxu1  ;;  %v4105_v34 = vsel %vm4045_vm11, %v4100_v18, %v4104_v50 }
 0x59c   :  { %4412 = vmatmul.mubr.bf16.gmra.mrb[244].mxu1 %v4101_v37 }
 0x59d   :  { %6353 = vmatprep.mubr.msk.bf16.mxu1 %vm3134_vm10, %v4107_v61  ;;  %v4473_v61 = vrot.slane %v8630_v48, 4  ;;  %v4470_v48 = vrot.slane %v8641_v20, 4 }
 0x59f   :  { %v3910_v16 = vpop.f32.mrb[140].mxu1 }
 0x5a0   :  { %v9486_v28 = vadd.f32 %v3910_v16, %v9255_v43  ;;  %v3912_v12 = vpop.f32.mrb[141].mxu1 }
 0x5a1   :  { %v3913_v23 = vpop.f32.mrb[142].mxu1  ;;  %v4472_v12 = vrot.slane %v8624_v51, 4 }
 0x5a2   :  { %v9489_v52 = vadd.f32 %v3913_v23, %v9258_v59  ;;  %v3915_v6 = vpop.f32.mrb[143].mxu1  ;;  %v10321_v23 = vrot.slane %v8644_v1, 3 }
 0x5a3   :  { %v4469_v6 = vrot.slane %v8644_v1, 4 }
 0x5a4   :  { %4420 = vmatmul.mubr.bf16.gmra.mrb[248].mxu1 %v4105_v34  ;;  %v4126_v17 = vsel %vm4045_vm11, %v4104_v50, %v10321_v23 }
 0x5a5   :  { %6354 = vmatprep.mubr.msk.bf16.mxu1 %vm3134_vm10, %v4130_v58  ;;  %v4477_v58 = vrot.slane %v8659_v56, 4 }
 0x5a7   :  { %v3918_v55 = vpop.f32.mrb[144].mxu1  ;;  %v4478_v20 = vsel %vm4468_vm12, %v4473_v61, %v4477_v58 }
 0x5a8   :  { %v9497_v37 = vadd.f32 %v3918_v55, %v9266_v7  ;;  %v3920_v43 = vpop.f32.mrb[145].mxu1  ;;  %v4474_v7 = vsel %vm4468_vm12, %v4472_v12, %v4473_v61 }
 0x5a9   :  { %v3921_v16 = vpop.f32.mrb[146].mxu1 }
 0x5aa   :  { %v9501_v59 = vadd.f32 %v3921_v16, %v9270_v5  ;;  %v3923_v18 = vpop.f32.mrb[147].mxu1  ;;  %v4471_v16 = vsel %vm4468_vm12, %v4469_v6, %v4470_v48 }
 0x5ac   :  { %4428 = vmatmul.mubr.bf16.gmra.mrb[252].mxu1 %v4126_v17 }
 0x5ad   :  { %6391 = vmatprep.mubr.msk.bf16.mxu1 %vm3134_vm10, %v4474_v7 }
 0x5af   :  { %v3926_v5 = vpop.f32.mrb[148].mxu1 }
 0x5b0   :  { %v9514_v34 = vadd.f32 %v3926_v5, %v9283_v4  ;;  %v3928_v54 = vpop.f32.mrb[149].mxu1  ;;  %v4475_v4 = vrot.slane %v8672_v47, 4  ;;  %v4479_v47 = vrot.slane %v8697_v49, 4  ;;  %v4483_v49 = vrot.slane %v8722_v45, 4 }
 0x5b1   :  { %v3929_v55 = vpop.f32.mrb[150].mxu1  ;;  %v4487_v45 = vrot.slane %v8747_v57, 4  ;;  %v10322_v57 = vld [vmem:[#allocation30_spill] sm:$0xff] }
 0x5b2   :  { %v9518_v50 = vadd.f32 %v3929_v55, %v9290_v53  ;;  %v3931_v43 = vpop.f32.mrb[151].mxu1  ;;  %v4481_v53 = vrot.slane %v8685_v2, 4  ;;  %v4476_v54 = vsel %vm4468_vm12, %v4470_v48, %v4475_v4  ;;  %v4485_v2 = vrot.slane %v8710_v24, 4 }
 0x5b3   :  { %v4480_v48 = vsel %vm4468_vm12, %v4475_v4, %v4479_v47  ;;  %v4489_v24 = vrot.slane %v8735_v31, 4  ;;  %v4484_v4 = vsel %vm4468_vm12, %v4479_v47, %v4483_v49  ;;  %v4493_v31 = vrot.slane %v8760_v41, 4  ;;  %v10324_v41 = vld [vmem:[#allocation31_spill] sm:$0xff] }
 0x5b4   :  { %4731 = vmatmul.mubr.bf16.vlgmr.msra.gmra.mrb[0].mxu1 %v4471_v16  ;;  %v4482_v61 = vsel %vm4468_vm12, %v4477_v58, %v4481_v53  ;;  %v4486_v58 = vsel %vm4468_vm12, %v4481_v53, %v4485_v2  ;;  %v4488_v47 = vsel %vm4468_vm12, %v4483_v49, %v4487_v45 }
 0x5b5   :  { %6392 = vmatprep.mubr.msk.bf16.mxu1 %vm3134_vm10, %v4478_v20  ;;  %v4490_v53 = vsel %vm4468_vm12, %v4485_v2, %v4489_v24  ;;  %v4494_v2 = vsel %vm4468_vm12, %v4489_v24, %v4493_v31 }
 0x5b7   :  { %v3934_v18 = vpop.f32.mrb[152].mxu1 }
 0x5b8   :  { %v9527_v23 = vadd.f32 %v3934_v18, %v9303_v62  ;;  %v3936_v56 = vpop.f32.mrb[153].mxu1 }
 0x5b9   :  { %v3937_v17 = vpop.f32.mrb[154].mxu1 }
 0x5ba   :  { %v9531_v7 = vadd.f32 %v3937_v17, %v9310_v13  ;;  %v3939_v5 = vpop.f32.mrb[155].mxu1 }
 0x5bc   :  { %4739 = vmatmul.mubr.bf16.gmra.mrb[4].mxu1 %v4476_v54 }
 0x5bd   :  { %6393 = vmatprep.mubr.msk.bf16.mxu1 %vm3134_vm10, %v4482_v61 }
 0x5bf   :  { %v3942_v55 = vpop.f32.mrb[156].mxu1 }
 0x5c0   :  { %v9538_v62 = vadd.f32 %v3942_v55, %v9322_v40  ;;  %v3944_v43 = vpop.f32.mrb[157].mxu1 }
 0x5c1   :  { %v3945_v16 = vpop.f32.mrb[158].mxu1 }
 0x5c2   :  { %v9542_v13 = vadd.f32 %v3945_v16, %v9329_v32  ;;  %v3947_v20 = vpop.f32.mrb[159].mxu1 }
 0x5c3   :  { %v4491_v20 = vrot.slane %v10322_v57, 4 }
 0x5c4   :  { %4747 = vmatmul.mubr.bf16.gmra.mrb[8].mxu1 %v4480_v48 }
 0x5c5   :  { %6394 = vmatprep.mubr.msk.bf16.mxu1 %vm3134_vm10, %v4486_v58  ;;  %v4492_v49 = vsel %vm4468_vm12, %v4487_v45, %v4491_v20 }
 0x5c7   :  { %v3950_v18 = vpop.f32.mrb[160].mxu1 }
 0x5c8   :  { %v9549_v40 = vadd.f32 %v3950_v18, %v9341_v42  ;;  %v3952_v56 = vpop.f32.mrb[161].mxu1  ;;  %v4497_v18 = vrot.slane %v10324_v41, 4  ;;  %v4499_v41 = vrot.slane %v8816_v26, 4  ;;  %v4503_v26 = vrot.slane %v8833_v15, 4  ;;  %v10333_v15 = vld [vmem:[#allocation16_spill] sm:$0xff] }
 0x5c9   :  { %v3953_v17 = vpop.f32.mrb[162].mxu1 }
 0x5ca   :  { %v9553_v32 = vadd.f32 %v3953_v17, %v9348_v38  ;;  %v3955_v5 = vpop.f32.mrb[163].mxu1  ;;  %v4498_v24 = vsel %vm4468_vm12, %v4493_v31, %v4497_v18 }
 0x5cc   :  { %4755 = vmatmul.mubr.bf16.gmra.mrb[12].mxu1 %v4484_v4 }
 0x5cd   :  { %6395 = vmatprep.mubr.msk.bf16.mxu1 %vm3134_vm10, %v4490_v53  ;;  %v10326_v53 = vld [vmem:[#allocation32_spill] sm:$0xff] }
 0x5cf   :  { %v3958_v54 = vpop.f32.mrb[164].mxu1 }
 0x5d0   :  { %v9560_v42 = vadd.f32 %v3958_v54, %v9360_v39  ;;  %v3960_v61 = vpop.f32.mrb[165].mxu1  ;;  %v10323_v39 = vld [vmem:[#allocation28_spill] sm:$0xff]  ;;  %v4495_v54 = vrot.slane %v10326_v53, 4 }
 0x5d1   :  { %v3961_v55 = vpop.f32.mrb[166].mxu1  ;;  %v10327_v61 = vld [vmem:[#allocation25_spill] sm:$0xff] }
 0x5d2   :  { %v9564_v38 = vadd.f32 %v3961_v55, %v9367_v3  ;;  %v3963_v43 = vpop.f32.mrb[167].mxu1  ;;  %v10325_v3 = vld [vmem:[#allocation26_spill] sm:$0xff]  ;;  %v4496_v45 = vsel %vm4468_vm12, %v4491_v20, %v4495_v54  ;;  %v4500_v20 = vsel %vm4468_vm12, %v4495_v54, %v4499_v41  ;;  %v4504_v54 = vsel %vm4468_vm12, %v4499_v41, %v4503_v26 }
 0x5d4   :  { %4763 = vmatmul.mubr.bf16.gmra.mrb[16].mxu1 %v4488_v47  ;;  %v10328_v47 = vld [vmem:[#allocation11_spill] sm:$0xff] }
 0x5d5   :  { %6396 = vmatprep.mubr.msk.bf16.mxu1 %vm3134_vm10, %v4494_v2  ;;  %v4501_v2 = vrot.slane %v10328_v47, 4 }
 0x5d7   :  { %v3966_v16 = vpop.f32.mrb[168].mxu1  ;;  %v4502_v31 = vsel %vm4468_vm12, %v4497_v18, %v4501_v2 }
 0x5d8   :  { %v9571_v48 = vadd.f32 %v3966_v16, %v10323_v39  ;;  %v3968_v58 = vpop.f32.mrb[169].mxu1 }
 0x5d9   :  { %v3969_v56 = vpop.f32.mrb[170].mxu1 }
 0x5da   :  { %v9575_v17 = vadd.f32 %v3969_v56, %v10325_v3  ;;  %v3971_v5 = vpop.f32.mrb[171].mxu1  ;;  %v10329_v56 = vld [vmem:[#allocation27_spill] sm:$0xff] }
 0x5dc   :  { %4771 = vmatmul.mubr.bf16.gmra.mrb[20].mxu1 %v4492_v49  ;;  %v10330_v49 = vld [vmem:[#allocation10_spill] sm:$0xff] }
 0x5dd   :  { %6397 = vmatprep.mubr.msk.bf16.mxu1 %vm3134_vm10, %v4498_v24  ;;  %v4505_v24 = vrot.slane %v10330_v49, 4  ;;  %v10334_v49 = vld [vmem:[#allocation20_spill] sm:$0xff] }
 0x5df   :  { %v3974_v4 = vpop.f32.mrb[172].mxu1  ;;  %v4506_v18 = vsel %vm4468_vm12, %v4501_v2, %v4505_v24 }
 0x5e0   :  { %v9582_v55 = vadd.f32 %v3974_v4, %v10327_v61  ;;  %v3976_v43 = vpop.f32.mrb[173].mxu1 }
 0x5e1   :  { %v3977_v16 = vpop.f32.mrb[174].mxu1  ;;  %v10331_v43 = vld [vmem:[#allocation29_spill] sm:$0xff] }
 0x5e2   :  { %v9586_v57 = vadd.f32 %v3977_v16, %v9402_v19  ;;  %v3979_v39 = vpop.f32.mrb[175].mxu1 }
 0x5e3   :  { %v10332_v39 = vld [vmem:[#allocation12_spill] sm:$0xff] }
 0x5e4   :  { %4779 = vmatmul.mubr.bf16.gmra.mrb[24].mxu1 %v4496_v45  ;;  %v4509_v45 = vrot.slane %v10332_v39, 4  ;;  %v4511_v39 = vrot.slane %v8867_v30, 4  ;;  %v4515_v30 = vrot.slane %v8884_v8, 4  ;;  %v4519_v8 = vrot.slane %v8901_v33, 4 }
 0x5e5   :  { %6398 = vmatprep.mubr.msk.bf16.mxu1 %vm3134_vm10, %v4502_v31  ;;  %v4523_v33 = vrot.slane %v8918_v36, 4  ;;  %v4527_v36 = vrot.slane %v8933_v60, 4 }
 0x5e6   :  { %v4510_v2 = vsel %vm4468_vm12, %v4505_v24, %v4509_v45 }
 0x5e7   :  { %v3982_v58 = vpop.f32.mrb[176].mxu1 }
 0x5e8   :  { %v9593_v3 = vadd.f32 %v3982_v58, %v10329_v56  ;;  %v3984_v5 = vpop.f32.mrb[177].mxu1 }
 0x5e9   :  { %v3985_v4 = vpop.f32.mrb[178].mxu1  ;;  %v4507_v5 = vrot.slane %v10333_v15, 4 }
 0x5ea   :  { %v9597_v19 = vadd.f32 %v3985_v4, %v9413_v0  ;;  %v3987_v53 = vpop.f32.mrb[179].mxu1 }
 0x5eb   :  { %v4508_v41 = vsel %vm4468_vm12, %v4503_v26, %v4507_v5  ;;  %v4512_v26 = vsel %vm4468_vm12, %v4507_v5, %v4511_v39  ;;  %v4516_v5 = vsel %vm4468_vm12, %v4511_v39, %v4515_v30  ;;  %v4520_v39 = vsel %vm4468_vm12, %v4515_v30, %v4519_v8 }
 0x5ec   :  { %4787 = vmatmul.mubr.bf16.gmra.mrb[28].mxu1 %v4500_v20  ;;  %v10335_v20 = vld [vmem:[#allocation14_spill] sm:$0xff] }
 0x5ed   :  { %6399 = vmatprep.mubr.msk.bf16.mxu1 %vm3134_vm10, %v4506_v18  ;;  %v4513_v18 = vrot.slane %v10335_v20, 4  ;;  %v4521_v20 = vrot.slane %v10319_v44, 4  ;;  %v4525_v44 = vrot.slane %v8910_v25, 4  ;;  %v4529_v25 = vrot.slane %v8931_v63, 4 }
 0x5ef   :  { %v3990_v61 = vpop.f32.mrb[180].mxu1  ;;  %v4514_v24 = vsel %vm4468_vm12, %v4509_v45, %v4513_v18 }
 0x5f0   :  { %v9604_v47 = vadd.f32 %v3990_v61, %v10331_v43  ;;  %v3992_v16 = vpop.f32.mrb[181].mxu1 }
 0x5f1   :  { %v3993_v31 = vpop.f32.mrb[182].mxu1 }
 0x5f2   :  { %v9608_v0 = vadd.f32 %v3993_v31, %v9424_v46  ;;  %v3995_v58 = vpop.f32.mrb[183].mxu1 }
 0x5f4   :  { %4795 = vmatmul.mubr.bf16.gmra.mrb[32].mxu1 %v4504_v54  ;;  %v10336_v54 = vld [vmem:[#allocation13_spill] sm:$0xff] }
 0x5f5   :  { %6400 = vmatprep.mubr.msk.bf16.mxu1 %vm3134_vm10, %v4510_v2  ;;  %v4517_v2 = vrot.slane %v10336_v54, 4  ;;  %v4526_v54 = vsel %vm4468_vm12, %v4521_v20, %v4525_v44 }
 0x5f7   :  { %v3998_v56 = vpop.f32.mrb[184].mxu1  ;;  %v4518_v45 = vsel %vm4468_vm12, %v4513_v18, %v4517_v2  ;;  %v4522_v18 = vsel %vm4468_vm12, %v4517_v2, %v4521_v20 }
 0x5f8   :  { %v9615_v4 = vadd.f32 %v3998_v56, %v10334_v49  ;;  %v4000_v53 = vpop.f32.mrb[185].mxu1 }
 0x5f9   :  { %v4001_v61 = vpop.f32.mrb[186].mxu1 }
 0x5fa   :  { %v9619_v46 = vadd.f32 %v4001_v61, %v9435_v10  ;;  %v4003_v43 = vpop.f32.mrb[187].mxu1 }
 0x5fc   :  { %4803 = vmatmul.mubr.bf16.gmra.mrb[36].mxu1 %v4508_v41 }
 0x5fd   :  { %6401 = vmatprep.mubr.msk.bf16.mxu1 %vm3134_vm10, %v4514_v24 }
 0x5ff   :  { %v4006_v16 = vpop.f32.mrb[188].mxu1 }
 0x600   :  { %v9626_v31 = vadd.f32 %v4006_v16, %v9442_v14  ;;  %v4008_v58 = vpop.f32.mrb[189].mxu1 }
 0x601   :  { %v4009_v56 = vpop.f32.mrb[190].mxu1 }
 0x602   :  { %v9630_v10 = vadd.f32 %v4009_v56, %v9446_v27  ;;  %v4011_v15 = vpop.f32.mrb[191].mxu1 }
 0x604   :  { %4811 = vmatmul.mubr.bf16.gmra.mrb[40].mxu1 %v4512_v26 }
 0x605   :  { %6402 = vmatprep.mubr.msk.bf16.mxu1 %vm3134_vm10, %v4518_v45  ;;  %v4524_v45 = vsel %vm4468_vm12, %v4519_v8, %v4523_v33  ;;  %v4549_v8 = vsel %vm4468_vm12, %v4527_v36, %v4469_v6 }
 0x607   :  { %v4309_v49 = vpop.f32.mrb[192].mxu1 }
 0x608   :  { %v9637_v14 = vadd.f32 %v4309_v49, %v9453_v29  ;;  %v4311_v53 = vpop.f32.mrb[193].mxu1  ;;  %v4530_v49 = vsel %vm4468_vm12, %v4525_v44, %v4529_v25 }
 0x609   :  { %v4312_v61 = vpop.f32.mrb[194].mxu1 }
 0x60a   :  { %v9641_v27 = vadd.f32 %v4312_v61, %v9457_v21  ;;  %v4314_v43 = vpop.f32.mrb[195].mxu1  ;;  %v4528_v61 = vsel %vm4468_vm12, %v4523_v33, %v4527_v36 }
 0x60b   :  { %v4553_v43 = vsel %vm4468_vm12, %v4529_v25, %v4472_v12 }
 0x60c   :  { %4819 = vmatmul.mubr.bf16.gmra.mrb[44].mxu1 %v4516_v5 }
 0x60d   :  { %6403 = vmatprep.mubr.msk.bf16.mxu1 %vm3134_vm10, %v4522_v18 }
 0x60f   :  { %v4317_v41 = vpop.f32.mrb[196].mxu1 }
 0x610   :  { %v9648_v29 = vadd.f32 %v4317_v41, %v9464_v11  ;;  %v4319_v24 = vpop.f32.mrb[197].mxu1 }
 0x611   :  { %v4320_v16 = vpop.f32.mrb[198].mxu1 }
 0x612   :  { %v9652_v21 = vadd.f32 %v4320_v16, %v9468_v9  ;;  %v4322_v58 = vpop.f32.mrb[199].mxu1 }
 0x614   :  { %4827 = vmatmul.mubr.bf16.gmra.mrb[48].mxu1 %v4520_v39 }
 0x615   :  { %6404 = vmatprep.mubr.msk.bf16.mxu1 %vm3134_vm10, %v4526_v54 }
 0x617   :  { %v4325_v2 = vpop.f32.mrb[200].mxu1 }
 0x618   :  { %v9659_v11 = vadd.f32 %v4325_v2, %v9475_v35  ;;  %v4327_v56 = vpop.f32.mrb[201].mxu1 }
 0x619   :  { %v4328_v15 = vpop.f32.mrb[202].mxu1 }
 0x61a   :  { %v9663_v9 = vadd.f32 %v4328_v15, %v9479_v22  ;;  %v4330_v26 = vpop.f32.mrb[203].mxu1 }
 0x61c   :  { %4835 = vmatmul.mubr.bf16.gmra.mrb[52].mxu1 %v4524_v45 }
 0x61d   :  { %6405 = vmatprep.mubr.msk.bf16.mxu1 %vm3134_vm10, %v4530_v49 }
 0x61f   :  { %v4333_v30 = vpop.f32.mrb[204].mxu1 }
 0x620   :  { %v9670_v35 = vadd.f32 %v4333_v30, %v9486_v28  ;;  %v4335_v53 = vpop.f32.mrb[205].mxu1 }
 0x621   :  { %v4336_v63 = vpop.f32.mrb[206].mxu1 }
 0x622   :  { %v9673_v20 = vadd.f32 %v4336_v63, %v9489_v52  ;;  %v4338_v22 = vpop.f32.mrb[207].mxu1 }
 0x624   :  { %4843 = vmatmul.mubr.bf16.gmra.mrb[56].mxu1 %v4528_v61 }
 0x625   :  { %6406 = vmatprep.mubr.msk.bf16.mxu1 %vm3134_vm10, %v4553_v43 }
 0x627   :  { %v4341_v5 = vpop.f32.mrb[208].mxu1 }
 0x628   :  { %v9681_v60 = vadd.f32 %v4341_v5, %v9497_v37  ;;  %v4343_v28 = vpop.f32.mrb[209].mxu1 }
 0x629   :  { %v4344_v18 = vpop.f32.mrb[210].mxu1 }
 0x62a   :  { %v9684_v41 = vadd.f32 %v4344_v18, %v9501_v59  ;;  %v4346_v52 = vpop.f32.mrb[211].mxu1 }
 0x62c   :  { %4851 = vmatmul.mubr.bf16.gmra.mrb[60].mxu1 %v4549_v8 }
 0x62f   :  { %v4349_v51 = vpop.f32.mrb[212].mxu1 }
 0x630   :  { %v9690_v12 = vadd.f32 %v4349_v51, %v9514_v34  ;;  %v4351_v24 = vpop.f32.mrb[213].mxu1 }
 0x631   :  { %v4352_v44 = vpop.f32.mrb[214].mxu1 }
 0x632   :  { %v9693_v37 = vadd.f32 %v4352_v44, %v9518_v50  ;;  %v4354_v16 = vpop.f32.mrb[215].mxu1 }
 0x637   :  { %v4357_v58 = vpop.f32.mrb[216].mxu1 }
 0x638   :  { %v9696_v59 = vadd.f32 %v4357_v58, %v9527_v23  ;;  %v4359_v39 = vpop.f32.mrb[217].mxu1 }
 0x639   :  { %v4360_v54 = vpop.f32.mrb[218].mxu1 }
 0x63a   :  { %v9699_v1 = vadd.f32 %v4360_v54, %v9531_v7  ;;  %v4362_v6 = vpop.f32.mrb[219].mxu1 }
 0x63f   :  { %v4365_v2 = vpop.f32.mrb[220].mxu1 }
 0x640   :  { %v9702_v34 = vadd.f32 %v4365_v2, %v9538_v62  ;;  %v4367_v33 = vpop.f32.mrb[221].mxu1 }
 0x641   :  { %v4368_v56 = vpop.f32.mrb[222].mxu1 }
 0x642   :  { %v9705_v50 = vadd.f32 %v4368_v56, %v9542_v13  ;;  %v4370_v25 = vpop.f32.mrb[223].mxu1 }
 0x647   :  { %v4373_v15 = vpop.f32.mrb[224].mxu1 }
 0x648   :  { %v9708_v23 = vadd.f32 %v4373_v15, %v9549_v40  ;;  %v4375_v26 = vpop.f32.mrb[225].mxu1 }
 0x649   :  { %v4376_v45 = vpop.f32.mrb[226].mxu1 }
 0x64a   :  { %v9711_v7 = vadd.f32 %v4376_v45, %v9553_v32  ;;  %v4378_v49 = vpop.f32.mrb[227].mxu1 }
 0x64f   :  { %v4381_v30 = vpop.f32.mrb[228].mxu1 }
 0x650   :  { %v9714_v62 = vadd.f32 %v4381_v30, %v9560_v42  ;;  %v4383_v36 = vpop.f32.mrb[229].mxu1 }
 0x651   :  { %v4384_v53 = vpop.f32.mrb[230].mxu1 }
 0x652   :  { %v9717_v13 = vadd.f32 %v4384_v53, %v9564_v38  ;;  %v4386_v63 = vpop.f32.mrb[231].mxu1 }
 0x657   :  { %v4389_v22 = vpop.f32.mrb[232].mxu1 }
 0x658   :  { %v9720_v40 = vadd.f32 %v4389_v22, %v9571_v48  ;;  %v4391_v61 = vpop.f32.mrb[233].mxu1 }
 0x659   :  { %v4392_v43 = vpop.f32.mrb[234].mxu1 }
 0x65a   :  { %v9723_v32 = vadd.f32 %v4392_v43, %v9575_v17  ;;  %v4394_v5 = vpop.f32.mrb[235].mxu1 }
 0x65f   :  { %v4397_v28 = vpop.f32.mrb[236].mxu1 }
 0x660   :  { %v9726_v42 = vadd.f32 %v4397_v28, %v9582_v55  ;;  %v4399_v18 = vpop.f32.mrb[237].mxu1 }
 0x661   :  { %v4400_v52 = vpop.f32.mrb[238].mxu1 }
 0x662   :  { %v9729_v38 = vadd.f32 %v4400_v52, %v9586_v57  ;;  %v4402_v8 = vpop.f32.mrb[239].mxu1 }
 0x667   :  { %v4405_v51 = vpop.f32.mrb[240].mxu1 }
 0x668   :  { %v9732_v48 = vadd.f32 %v4405_v51, %v9593_v3  ;;  %v4407_v24 = vpop.f32.mrb[241].mxu1 }
 0x669   :  { %v4408_v44 = vpop.f32.mrb[242].mxu1 }
 0x66a   :  { %v9735_v17 = vadd.f32 %v4408_v44, %v9597_v19  ;;  %v4410_v16 = vpop.f32.mrb[243].mxu1 }
 0x66f   :  { %v4413_v58 = vpop.f32.mrb[244].mxu1 }
 0x670   :  { %v9738_v55 = vadd.f32 %v4413_v58, %v9604_v47  ;;  %v4415_v39 = vpop.f32.mrb[245].mxu1 }
 0x671   :  { %v4416_v54 = vpop.f32.mrb[246].mxu1 }
 0x672   :  { %v9741_v57 = vadd.f32 %v4416_v54, %v9608_v0  ;;  %v4418_v6 = vpop.f32.mrb[247].mxu1 }
 0x677   :  { %v4421_v2 = vpop.f32.mrb[248].mxu1 }
 0x678   :  { %v9744_v3 = vadd.f32 %v4421_v2, %v9615_v4  ;;  %v4423_v33 = vpop.f32.mrb[249].mxu1  ;;  %v9758_v4 = vld [vmem:[%s10180_s4] ss:$0 sm:$0xff]  ;;  %s7473_s4 = smov 112  }
 0x679   :  { %v4424_v56 = vpop.f32.mrb[250].mxu1 }
 0x67a   :  { %v9747_v19 = vadd.f32 %v4424_v56, %v9619_v46  ;;  %v4426_v25 = vpop.f32.mrb[251].mxu1 }
 0x67f   :  { %v4429_v15 = vpop.f32.mrb[252].mxu1 }
 0x680   :  { %v9750_v47 = vadd.f32 %v4429_v15, %v9626_v31  ;;  %v4431_v26 = vpop.f32.mrb[253].mxu1 }
 0x681   :  { %v4432_v45 = vpop.f32.mrb[254].mxu1 }
 0x682   :  { %v9753_v0 = vadd.f32 %v4432_v45, %v9630_v10  ;;  %v4434_v49 = vpop.f32.mrb[255].mxu1 }
 0x687   :  { %v4732_v30 = vpop.f32.mrb[0].mxu1 }
 0x688   :  { %v4859_v46 = vadd.f32 %v4732_v30, %v9637_v14  ;;  %v4734_v36 = vpop.f32.mrb[1].mxu1 }
 0x689   :  { %v4735_v53 = vpop.f32.mrb[2].mxu1 }
 0x68a   :  { %v4898_v63 = vadd.f32 %v9758_v4, %v4859_v46  ;;  %v4860_v31 = vadd.f32 %v4735_v53, %v9641_v27  ;;  %v4737_v22 = vpop.f32.mrb[3].mxu1 }
 0x68c   :  { %v4930_v61 = vmax.f32 %v4898_v63, 0.0  ;;  %v4899_v10 = vadd.f32 %v9758_v4, %v4860_v31 }
 0x68e   :  { %v4931_v43 = vmax.f32 %v4899_v10, 0.0  ;;  %v9764_v28 = vrot.slane %v4930_v61, 2 }
 0x68f   :  { %v4740_v5 = vpop.f32.mrb[4].mxu1 }
 0x690   :  { %v4995_v18 = vrot.slane %v4931_v43, 2  ;;  %v4861_v52 = vadd.f32 %v4740_v5, %v9648_v29  ;;  %v4742_v8 = vpop.f32.mrb[5].mxu1 }
 0x691   :  { %v4743_v51 = vpop.f32.mrb[6].mxu1 }
 0x692   :  { %v4900_v14 = vadd.f32 %v9758_v4, %v4861_v52  ;;  %v4862_v24 = vadd.f32 %v4743_v51, %v9652_v21  ;;  %v4745_v44 = vpop.f32.mrb[7].mxu1  ;;  %v4996_v27 = vsel %vm1556_vm7, %v9764_v28, %v4995_v18 }
 0x693   :  { %v9771_v16 = vmax.f32 %v4930_v61, %v4996_v27 }
 0x694   :  { %v4932_v58 = vmax.f32 %v4900_v14, 0.0  ;;  %v4901_v39 = vadd.f32 %v9758_v4, %v4862_v24 }
 0x696   :  { %v4997_v54 = vrot.slane %v4932_v58, 2  ;;  %v4933_v6 = vmax.f32 %v4901_v39, 0.0 }
 0x697   :  { %v4748_v2 = vpop.f32.mrb[8].mxu1 }
 0x698   :  { %v4999_v33 = vrot.slane %v4933_v6, 2  ;;  %v4863_v29 = vadd.f32 %v4748_v2, %v9659_v11  ;;  %v4750_v56 = vpop.f32.mrb[9].mxu1  ;;  %v4998_v25 = vsel %vm1556_vm7, %v4995_v18, %v4997_v54 }
 0x699   :  { %v4751_v15 = vpop.f32.mrb[10].mxu1  ;;  %v9776_v21 = vmax.f32 %v4931_v43, %v4998_v25 }
 0x69a   :  { %v4902_v26 = vadd.f32 %v9758_v4, %v4863_v29  ;;  %v4864_v45 = vadd.f32 %v4751_v15, %v9663_v9  ;;  %v4753_v49 = vpop.f32.mrb[11].mxu1  ;;  %v5000_v30 = vsel %vm1556_vm7, %v4997_v54, %v4999_v33 }
 0x69b   :  { %v7175_v46 = vpack.i.bf16 %v9776_v21, %v9771_v16  ;;  %v9783_v36 = vmax.f32 %v4932_v58, %v5000_v30 }
 0x69c   :  { %v4934_v53 = vmax.f32 %v4902_v26, 0.0  ;;  %v4903_v11 = vadd.f32 %v9758_v4, %v4864_v45 }
 0x69d   :  { %7176 = vrot.lane.b32.xlu1 %v7175_v46, %s7473_s4 }
 0x69e   :  { %v5001_v63 = vrot.slane %v4934_v53, 2  ;;  %v4935_v31 = vmax.f32 %v4903_v11, 0.0 }
 0x69f   :  { %v4756_v22 = vpop.f32.mrb[12].mxu1 }
 0x6a0   :  { %v5003_v61 = vrot.slane %v4935_v31, 2  ;;  %v4865_v9 = vadd.f32 %v4756_v22, %v9670_v35  ;;  %v4758_v10 = vpop.f32.mrb[13].mxu1  ;;  %v5002_v43 = vsel %vm1556_vm7, %v4999_v33, %v5001_v63 }
 0x6a1   :  { %v4759_v5 = vpop.f32.mrb[14].mxu1  ;;  %v9789_v18 = vmax.f32 %v4933_v6, %v5002_v43 }
 0x6a2   :  { %v4904_v52 = vadd.f32 %v9758_v4, %v4865_v9  ;;  %v4866_v8 = vadd.f32 %v4759_v5, %v9673_v20  ;;  %v4761_v51 = vpop.f32.mrb[15].mxu1  ;;  %v5004_v14 = vsel %vm1556_vm7, %v5001_v63, %v5003_v61 }
 0x6a3   :  { %v7180_v24 = vpack.i.bf16 %v9789_v18, %v9783_v36  ;;  %v9796_v44 = vmax.f32 %v4934_v53, %v5004_v14 }
 0x6a4   :  { %v4936_v27 = vmax.f32 %v4904_v52, 0.0  ;;  %v4905_v35 = vadd.f32 %v9758_v4, %v4866_v8 }
 0x6a5   :  { %7181 = vrot.lane.b32.xlu1 %v7180_v24, %s7473_s4 }
 0x6a6   :  { %v5005_v58 = vrot.slane %v4936_v27, 2  ;;  %v4937_v39 = vmax.f32 %v4905_v35, 0.0 }
 0x6a7   :  { %v4764_v54 = vpop.f32.mrb[16].mxu1 }
 0x6a8   :  { %v5007_v6 = vrot.slane %v4937_v39, 2  ;;  %v4867_v2 = vadd.f32 %v4764_v54, %v9681_v60  ;;  %v4766_v20 = vpop.f32.mrb[17].mxu1  ;;  %v5006_v33 = vsel %vm1556_vm7, %v5003_v61, %v5005_v58 }
 0x6a9   :  { %v4767_v29 = vpop.f32.mrb[18].mxu1  ;;  %v9802_v56 = vmax.f32 %v4935_v31, %v5006_v33 }
 0x6aa   :  { %v4906_v25 = vadd.f32 %v9758_v4, %v4867_v2  ;;  %v4868_v15 = vadd.f32 %v4767_v29, %v9684_v41  ;;  %v4769_v26 = vpop.f32.mrb[19].mxu1  ;;  %v5008_v45 = vsel %vm1556_vm7, %v5005_v58, %v5007_v6 }
 0x6ab   :  { %v7185_v49 = vpack.i.bf16 %v9802_v56, %v9796_v44  ;;  %v9809_v30 = vmax.f32 %v4936_v27, %v5008_v45 }
 0x6ac   :  { %v4938_v46 = vmax.f32 %v4906_v25, 0.0  ;;  %v4907_v60 = vadd.f32 %v9758_v4, %v4868_v15 }
 0x6ad   :  { %7186 = vrot.lane.b32.xlu1 %v7185_v49, %s7473_s4 }
 0x6ae   :  { %v5009_v53 = vrot.slane %v4938_v46, 2  ;;  %v4939_v11 = vmax.f32 %v4907_v60, 0.0 }
 0x6af   :  { %v4772_v63 = vpop.f32.mrb[20].mxu1 }
 0x6b0   :  { %v5011_v31 = vrot.slane %v4939_v11, 2  ;;  %v4869_v22 = vadd.f32 %v4772_v63, %v9690_v12  ;;  %v4774_v41 = vpop.f32.mrb[21].mxu1  ;;  %v5010_v61 = vsel %vm1556_vm7, %v5007_v6, %v5009_v53 }
 0x6b1   :  { %v4775_v9 = vpop.f32.mrb[22].mxu1  ;;  %v9815_v10 = vmax.f32 %v4937_v39, %v5010_v61 }
 0x6b2   :  { %v4908_v43 = vadd.f32 %v9758_v4, %v4869_v22  ;;  %v4870_v5 = vadd.f32 %v4775_v9, %v9693_v37  ;;  %v4777_v52 = vpop.f32.mrb[23].mxu1  ;;  %v5012_v8 = vsel %vm1556_vm7, %v5009_v53, %v5011_v31 }
 0x6b3   :  { %v7190_v51 = vpack.i.bf16 %v9815_v10, %v9809_v30  ;;  %v9822_v14 = vmax.f32 %v4938_v46, %v5012_v8 }
 0x6b4   :  { %v4940_v24 = vmax.f32 %v4908_v43, 0.0  ;;  %v4909_v12 = vadd.f32 %v9758_v4, %v4870_v5 }
 0x6b5   :  { %7191 = vrot.lane.b32.xlu1 %v7190_v51, %s7473_s4 }
 0x6b6   :  { %v5013_v27 = vrot.slane %v4940_v24, 2  ;;  %v4941_v35 = vmax.f32 %v4909_v12, 0.0 }
 0x6b7   :  { %v4780_v58 = vpop.f32.mrb[24].mxu1 }
 0x6b8   :  { %v5015_v39 = vrot.slane %v4941_v35, 2  ;;  %v4871_v54 = vadd.f32 %v4780_v58, %v9696_v59  ;;  %v4782_v37 = vpop.f32.mrb[25].mxu1  ;;  %v5014_v6 = vsel %vm1556_vm7, %v5011_v31, %v5013_v27 }
 0x6b9   :  { %v4783_v2 = vpop.f32.mrb[26].mxu1  ;;  %v9828_v20 = vmax.f32 %v4939_v11, %v5014_v6 }
 0x6ba   :  { %v4910_v33 = vadd.f32 %v9758_v4, %v4871_v54  ;;  %v4872_v29 = vadd.f32 %v4783_v2, %v9699_v1  ;;  %v4785_v25 = vpop.f32.mrb[27].mxu1  ;;  %v5016_v15 = vsel %vm1556_vm7, %v5013_v27, %v5015_v39 }
 0x6bb   :  { %v7195_v26 = vpack.i.bf16 %v9828_v20, %v9822_v14  ;;  %v9835_v45 = vmax.f32 %v4940_v24, %v5016_v15 }
 0x6bc   :  { %v4942_v49 = vmax.f32 %v4910_v33, 0.0  ;;  %v4911_v59 = vadd.f32 %v9758_v4, %v4872_v29 }
 0x6bd   :  { %7196 = vrot.lane.b32.xlu1 %v7195_v26, %s7473_s4 }
 0x6be   :  { %v5017_v46 = vrot.slane %v4942_v49, 2  ;;  %v4943_v60 = vmax.f32 %v4911_v59, 0.0 }
 0x6bf   :  { %v4788_v53 = vpop.f32.mrb[28].mxu1 }
 0x6c0   :  { %v5019_v11 = vrot.slane %v4943_v60, 2  ;;  %v4873_v63 = vadd.f32 %v4788_v53, %v9702_v34  ;;  %v4790_v1 = vpop.f32.mrb[29].mxu1  ;;  %v5018_v31 = vsel %vm1556_vm7, %v5015_v39, %v5017_v46 }
 0x6c1   :  { %v4791_v22 = vpop.f32.mrb[30].mxu1  ;;  %v9841_v41 = vmax.f32 %v4941_v35, %v5018_v31 }
 0x6c2   :  { %v4912_v61 = vadd.f32 %v9758_v4, %v4873_v63  ;;  %v4874_v9 = vadd.f32 %v4791_v22, %v9705_v50  ;;  %v4793_v43 = vpop.f32.mrb[31].mxu1  ;;  %v5020_v5 = vsel %vm1556_vm7, %v5017_v46, %v5019_v11 }
 0x6c3   :  { %v7200_v52 = vpack.i.bf16 %v9841_v41, %v9835_v45  ;;  %v9848_v8 = vmax.f32 %v4942_v49, %v5020_v5 }
 0x6c4   :  { %v4944_v51 = vmax.f32 %v4912_v61, 0.0  ;;  %v4913_v34 = vadd.f32 %v9758_v4, %v4874_v9 }
 0x6c5   :  { %7201 = vrot.lane.b32.xlu1 %v7200_v52, %s7473_s4 }
 0x6c6   :  { %v5021_v24 = vrot.slane %v4944_v51, 2  ;;  %v4945_v12 = vmax.f32 %v4913_v34, 0.0 }
 0x6c7   :  { %v4796_v27 = vpop.f32.mrb[32].mxu1 }
 0x6c8   :  { %v5023_v35 = vrot.slane %v4945_v12, 2  ;;  %v4875_v58 = vadd.f32 %v4796_v27, %v9708_v23  ;;  %v4798_v50 = vpop.f32.mrb[33].mxu1  ;;  %v5022_v39 = vsel %vm1556_vm7, %v5019_v11, %v5021_v24 }
 0x6c9   :  { %v4799_v54 = vpop.f32.mrb[34].mxu1  ;;  %v9854_v37 = vmax.f32 %v4943_v60, %v5022_v39 }
 0x6ca   :  { %v4914_v6 = vadd.f32 %v9758_v4, %v4875_v58  ;;  %v4876_v2 = vadd.f32 %v4799_v54, %v9711_v7  ;;  %v4801_v33 = vpop.f32.mrb[35].mxu1  ;;  %v5024_v29 = vsel %vm1556_vm7, %v5021_v24, %v5023_v35 }
 0x6cb   :  { %v7205_v25 = vpack.i.bf16 %v9854_v37, %v9848_v8  ;;  %v9861_v15 = vmax.f32 %v4944_v51, %v5024_v29 }
 0x6cc   :  { %v4946_v26 = vmax.f32 %v4914_v6, 0.0  ;;  %v4915_v23 = vadd.f32 %v9758_v4, %v4876_v2 }
 0x6cd   :  { %7206 = vrot.lane.b32.xlu1 %v7205_v25, %s7473_s4 }
 0x6ce   :  { %v5025_v49 = vrot.slane %v4946_v26, 2  ;;  %v4947_v59 = vmax.f32 %v4915_v23, 0.0 }
 0x6cf   :  { %v4804_v46 = vpop.f32.mrb[36].mxu1 }
 0x6d0   :  { %v5027_v60 = vrot.slane %v4947_v59, 2  ;;  %v4877_v53 = vadd.f32 %v4804_v46, %v9714_v62  ;;  %v4806_v7 = vpop.f32.mrb[37].mxu1  ;;  %v5026_v11 = vsel %vm1556_vm7, %v5023_v35, %v5025_v49 }
 0x6d1   :  { %v4807_v63 = vpop.f32.mrb[38].mxu1  ;;  %v9867_v1 = vmax.f32 %v4945_v12, %v5026_v11 }
 0x6d2   :  { %v4916_v31 = vadd.f32 %v9758_v4, %v4877_v53  ;;  %v4878_v22 = vadd.f32 %v4807_v63, %v9717_v13  ;;  %v4809_v61 = vpop.f32.mrb[39].mxu1  ;;  %v5028_v9 = vsel %vm1556_vm7, %v5025_v49, %v5027_v60 }
 0x6d3   :  { %v7250_v43 = vpack.i.bf16 %v9867_v1, %v9861_v15  ;;  %v9874_v5 = vmax.f32 %v4946_v26, %v5028_v9 }
 0x6d4   :  { %v4948_v52 = vmax.f32 %v4916_v31, 0.0  ;;  %v4917_v62 = vadd.f32 %v9758_v4, %v4878_v22 }
 0x6d5   :  { %7251 = vrot.lane.b32.xlu1 %v7250_v43, %s7473_s4 }
 0x6d6   :  { %v5029_v51 = vrot.slane %v4948_v52, 2  ;;  %v4949_v34 = vmax.f32 %v4917_v62, 0.0 }
 0x6d7   :  { %v4812_v24 = vpop.f32.mrb[40].mxu1 }
 0x6d8   :  { %v5031_v12 = vrot.slane %v4949_v34, 2  ;;  %v4879_v27 = vadd.f32 %v4812_v24, %v9720_v40  ;;  %v4814_v13 = vpop.f32.mrb[41].mxu1  ;;  %v5030_v35 = vsel %vm1556_vm7, %v5027_v60, %v5029_v51 }
 0x6d9   :  { %v4815_v58 = vpop.f32.mrb[42].mxu1  ;;  %v9880_v50 = vmax.f32 %v4947_v59, %v5030_v35 }
 0x6da   :  { %v4918_v39 = vadd.f32 %v9758_v4, %v4879_v27  ;;  %v4880_v54 = vadd.f32 %v4815_v58, %v9723_v32  ;;  %v4817_v6 = vpop.f32.mrb[43].mxu1  ;;  %v5032_v2 = vsel %vm1556_vm7, %v5029_v51, %v5031_v12 }
 0x6db   :  { %v7210_v33 = vpack.i.bf16 %v9880_v50, %v9874_v5  ;;  %v9887_v29 = vmax.f32 %v4948_v52, %v5032_v2 }
 0x6dc   :  { %v4950_v25 = vmax.f32 %v4918_v39, 0.0  ;;  %v4919_v40 = vadd.f32 %v9758_v4, %v4880_v54 }
 0x6dd   :  { %7211 = vrot.lane.b32.xlu0 %v7210_v33, %s7473_s4 }
 0x6de   :  { %v5033_v26 = vrot.slane %v4950_v25, 2  ;;  %v4951_v23 = vmax.f32 %v4919_v40, 0.0 }
 0x6df   :  { %v4820_v49 = vpop.f32.mrb[44].mxu1 }
 0x6e0   :  { %v5035_v59 = vrot.slane %v4951_v23, 2  ;;  %v4881_v46 = vadd.f32 %v4820_v49, %v9726_v42  ;;  %v4822_v32 = vpop.f32.mrb[45].mxu1  ;;  %v5034_v60 = vsel %vm1556_vm7, %v5031_v12, %v5033_v26 }
 0x6e1   :  { %v4823_v53 = vpop.f32.mrb[46].mxu1  ;;  %v9893_v7 = vmax.f32 %v4949_v34, %v5034_v60 }
 0x6e2   :  { %v4920_v11 = vadd.f32 %v9758_v4, %v4881_v46  ;;  %v4882_v63 = vadd.f32 %v4823_v53, %v9729_v38  ;;  %v4825_v31 = vpop.f32.mrb[47].mxu1  ;;  %v5036_v22 = vsel %vm1556_vm7, %v5033_v26, %v5035_v59 }
 0x6e3   :  { %v7215_v61 = vpack.i.bf16 %v9893_v7, %v9887_v29  ;;  %v9900_v9 = vmax.f32 %v4950_v25, %v5036_v22 }
 0x6e4   :  { %v4952_v43 = vmax.f32 %v4920_v11, 0.0  ;;  %v4921_v42 = vadd.f32 %v9758_v4, %v4882_v63 }
 0x6e5   :  { %7216 = vrot.lane.b32.xlu0 %v7215_v61, %s7473_s4 }
 0x6e6   :  { %v5037_v52 = vrot.slane %v4952_v43, 2  ;;  %v4953_v62 = vmax.f32 %v4921_v42, 0.0 }
 0x6e7   :  { %v4828_v51 = vpop.f32.mrb[48].mxu1 }
 0x6e8   :  { %v5039_v34 = vrot.slane %v4953_v62, 2  ;;  %v4883_v24 = vadd.f32 %v4828_v51, %v9732_v48  ;;  %v4830_v38 = vpop.f32.mrb[49].mxu1  ;;  %v5038_v12 = vsel %vm1556_vm7, %v5035_v59, %v5037_v52 }
 0x6e9   :  { %v4831_v27 = vpop.f32.mrb[50].mxu1  ;;  %v9906_v13 = vmax.f32 %v4951_v23, %v5038_v12 }
 0x6ea   :  { %v4922_v35 = vadd.f32 %v9758_v4, %v4883_v24  ;;  %v4884_v58 = vadd.f32 %v4831_v27, %v9735_v17  ;;  %v4833_v39 = vpop.f32.mrb[51].mxu1  ;;  %v5040_v54 = vsel %vm1556_vm7, %v5037_v52, %v5039_v34 }
 0x6eb   :  { %v7220_v6 = vpack.i.bf16 %v9906_v13, %v9900_v9  ;;  %v9913_v2 = vmax.f32 %v4952_v43, %v5040_v54 }
 0x6ec   :  { %v4954_v33 = vmax.f32 %v4922_v35, 0.0  ;;  %v4923_v48 = vadd.f32 %v9758_v4, %v4884_v58 }
 0x6ed   :  { %7221 = vrot.lane.b32.xlu0 %v7220_v6, %s7473_s4 }
 0x6ee   :  { %v5041_v25 = vrot.slane %v4954_v33, 2  ;;  %v4955_v40 = vmax.f32 %v4923_v48, 0.0 }
 0x6ef   :  { %v4836_v26 = vpop.f32.mrb[52].mxu1 }
 0x6f0   :  { %v5043_v23 = vrot.slane %v4955_v40, 2  ;;  %v4885_v49 = vadd.f32 %v4836_v26, %v9738_v55  ;;  %v4838_v17 = vpop.f32.mrb[53].mxu1  ;;  %v5042_v59 = vsel %vm1556_vm7, %v5039_v34, %v5041_v25 }
 0x6f1   :  { %v4839_v46 = vpop.f32.mrb[54].mxu1  ;;  %v9919_v32 = vmax.f32 %v4953_v62, %v5042_v59 }
 0x6f2   :  { %v4924_v60 = vadd.f32 %v9758_v4, %v4885_v49  ;;  %v4886_v53 = vadd.f32 %v4839_v46, %v9741_v57  ;;  %v4841_v11 = vpop.f32.mrb[55].mxu1  ;;  %v5044_v63 = vsel %vm1556_vm7, %v5041_v25, %v5043_v23 }
 0x6f3   :  { %v7225_v31 = vpack.i.bf16 %v9919_v32, %v9913_v2  ;;  %v9926_v22 = vmax.f32 %v4954_v33, %v5044_v63 }
 0x6f4   :  { %v4956_v61 = vmax.f32 %v4924_v60, 0.0  ;;  %v4925_v55 = vadd.f32 %v9758_v4, %v4886_v53 }
 0x6f5   :  { %7226 = vrot.lane.b32.xlu0 %v7225_v31, %s7473_s4 }
 0x6f6   :  { %v5045_v43 = vrot.slane %v4956_v61, 2  ;;  %v4957_v42 = vmax.f32 %v4925_v55, 0.0 }
 0x6f7   :  { %v4844_v52 = vpop.f32.mrb[56].mxu1 }
 0x6f8   :  { %v5047_v62 = vrot.slane %v4957_v42, 2  ;;  %v4887_v51 = vadd.f32 %v4844_v52, %v9744_v3  ;;  %v4846_v57 = vpop.f32.mrb[57].mxu1  ;;  %v5046_v34 = vsel %vm1556_vm7, %v5043_v23, %v5045_v43 }
 0x6f9   :  { %v4847_v24 = vpop.f32.mrb[58].mxu1  ;;  %v9932_v38 = vmax.f32 %v4955_v40, %v5046_v34  ;;  %v10337_v34 = vlaneseq }
 0x6fa   :  { %v4926_v12 = vadd.f32 %v9758_v4, %v4887_v51  ;;  %v4888_v27 = vadd.f32 %v4847_v24, %v9747_v19  ;;  %v4849_v35 = vpop.f32.mrb[59].mxu1  ;;  %v5048_v58 = vsel %vm1556_vm7, %v5045_v43, %v5047_v62 }
 0x6fb   :  { %v7230_v39 = vpack.i.bf16 %v9932_v38, %v9926_v22  ;;  %v9939_v54 = vmax.f32 %v4956_v61, %v5048_v58  ;;  %v5300_v24 = vand.u32 127, %v10337_v34 }
 0x6fc   :  { %v4958_v6 = vmax.f32 %v4926_v12, 0.0  ;;  %v4927_v3 = vadd.f32 %v9758_v4, %v4888_v27  ;;  %v10338_v12 = vld [vmem:[#allocation9_spill] sm:$0xff] }
 0x6fd   :  { %7231 = vrot.lane.b32.xlu0 %v7230_v39, %s7473_s4  ;;  %v5304_v27 = vmul.u32 32, %v10338_v12  ;;  %v5301_v35 = vadd.s32 128, %v5300_v24 }
 0x6fe   :  { %v5049_v33 = vrot.slane %v4958_v6, 2  ;;  %v4959_v48 = vmax.f32 %v4927_v3, 0.0 }
 0x6ff   :  { %v4852_v25 = vpop.f32.mrb[60].mxu1  ;;  %v9971_v58 = vsub.s32 %v5300_v24, %v5304_v27  ;;  %v9975_v39 = vsub.s32 %v5301_v35, %v5304_v27 }
 0x700   :  { %v5051_v40 = vrot.slane %v4959_v48, 2  ;;  %v4889_v26 = vadd.f32 %v4852_v25, %v9750_v47  ;;  %v4854_v19 = vpop.f32.mrb[61].mxu1  ;;  %v5050_v23 = vsel %vm1556_vm7, %v5047_v62, %v5049_v33 }
 0x701   :  { %v4855_v49 = vpop.f32.mrb[62].mxu1  ;;  %v9945_v17 = vmax.f32 %v4957_v42, %v5050_v23  ;;  %vm5308_vm13 = vcmp.eq.s32.totalorder %v9975_v39, 0  ;;  %vm5400_vm15 = vcmp.eq.s32.totalorder %v9975_v39, 8  ;;  %vm5399_vm1 = vcmp.eq.s32.totalorder %v9971_v58, 8 }
 0x702   :  { %v4928_v59 = vadd.f32 %v9758_v4, %v4889_v26  ;;  %v4890_v46 = vadd.f32 %v4855_v49, %v9753_v0  ;;  %v4857_v60 = vpop.f32.mrb[63].mxu1  ;;  %v5052_v53 = vsel %vm1556_vm7, %v5049_v33, %v5051_v40  ;;  %vm6408_vm14 = vmpackc.low %vm5308_vm13, %vm5308_vm13  ;;  %vm5307_vm2 = vcmp.eq.s32.totalorder %v9971_v58, 0 }
 0x703   :  { %v7235_v11 = vpack.i.bf16 %v9945_v17, %v9939_v54  ;;  %v9952_v63 = vmax.f32 %v4958_v6, %v5052_v53  ;;  %v7474_v6 = vmov 1.0|1.0   ;;  %vm6416_vm0 = vmpackc.low %vm5400_vm15, %vm5400_vm15  ;;  %vm5354_vm3 = vcmp.eq.s32.totalorder %v9975_v39, 4 }
 0x704   :  { %v4960_v31 = vmax.f32 %v4928_v59, 0.0  ;;  %v4929_v47 = vadd.f32 %v9758_v4, %v4890_v46  ;;  %6409 = vmatprep.mubr.msk.bf16.mxu0 %vm6408_vm14, %v7474_v6  ;;  %6417 = vmatprep.mubr.msk.bf16.mxu1 %vm6416_vm0, %v7474_v6  ;;  %vm6418_vm4 = vmpackc.low %vm5399_vm1, %vm5399_vm1  ;;  %vm5446_vm8 = vcmp.eq.s32.totalorder %v9975_v39, 12  ;;  %vm5445_vm11 = vcmp.eq.s32.totalorder %v9971_v58, 12  ;;  %v7347_v39 = vld [vmem:[#allocation4 + $0xc0] sm:$0xff]  }
 0x705   :  { %7236 = vrot.lane.b32.xlu0 %v7235_v11, %s7473_s4  ;;  %vm6410_vm5 = vmpackc.low %vm5307_vm2, %vm5307_vm2  ;;  %vm7476_vm13 = vmmov 0  }
 0x706   :  { %v5053_v61 = vrot.slane %v4960_v31, 2  ;;  %v4961_v55 = vmax.f32 %v4929_v47, 0.0  ;;  %vm6412_vm6 = vmpackc.low %vm5354_vm3, %vm5354_vm3 }
 0x707   :  { %vm6420_vm10 = vmpackc.low %vm5446_vm8, %vm5446_vm8 }
 0x708   :  { %v5055_v43 = vrot.slane %v4961_v55, 2  ;;  %v5054_v42 = vsel %vm1556_vm7, %v5051_v40, %v5053_v61  ;;  %vm6422_vm12 = vmpackc.low %vm5445_vm11, %vm5445_vm11 }
 0x709   :  { %v9957_v52 = vmax.f32 %v4959_v48, %v5054_v42 }
 0x70a   :  { %v5090_v0 = vsel %vm1556_vm7, %v5055_v43, %v9764_v28  ;;  %v5056_v62 = vsel %vm1556_vm7, %v5053_v61, %v5055_v43  ;;  %vm5353_vm7 = vcmp.eq.s32.totalorder %v9971_v58, 4  ;;  %v7363_v58 = vld [vmem:[#allocation4 + $0xe0] sm:$0xff]  }
 0x70b   :  { %v9962_v51 = vmax.f32 %v4961_v55, %v5090_v0  ;;  %v7240_v57 = vpack.i.bf16 %v9957_v52, %v9952_v63  ;;  %v9966_v4 = vmax.f32 %v4960_v31, %v5056_v62  ;;  %vm6414_vm9 = vmpackc.low %vm5353_vm7, %vm5353_vm7 }
 0x70d   :  { %7241 = vrot.lane.b32.xlu0 %v7240_v57, %s7473_s4  ;;  %v7245_v28 = vpack.i.bf16 %v9962_v51, %v9966_v4 }
 0x70f   :  { %v7177_v3 = vpop.permute.xlu1 %7176 }
 0x710   :  { %v7179_v33 = vunpack.i.h.bf16 %v7177_v3  ;;  %v7178_v48 = vunpack.i.l.bf16 %v7177_v3 }
 0x711   :  { %7246 = vrot.lane.b32.xlu0 %v7245_v28, %s7473_s4 }
 0x712   :  { %v5252_v19 = vmax.f32 %v9776_v21, %v7179_v33  ;;  %v5251_v23 = vmax.f32 %v9771_v16, %v7178_v48 }
 0x714   :  { %v9988_v53 = vpack.c.bf16 %v5252_v19, %v5251_v23 }
 0x717   :  { %v7182_v49 = vpop.permute.xlu1 %7181 }
 0x718   :  { %v7184_v11 = vunpack.i.h.bf16 %v7182_v49  ;;  %v7183_v31 = vunpack.i.l.bf16 %v7182_v49 }
 0x71f   :  { %v7187_v61 = vpop.permute.xlu1 %7186 }
 0x720   :  { %v7189_v62 = vunpack.i.h.bf16 %v7187_v61  ;;  %v7188_v57 = vunpack.i.l.bf16 %v7187_v61 }
 0x727   :  { %v7192_v24 = vpop.permute.xlu1 %7191 }
 0x728   :  { %v7194_v3 = vunpack.i.h.bf16 %v7192_v24  ;;  %v7193_v33 = vunpack.i.l.bf16 %v7192_v24 }
 0x74f   :  { %v7212_v25 = vpop.permute.xlu0 %7211 }
 0x750   :  { %v7214_v40 = vunpack.i.h.bf16 %v7212_v25  ;;  %v7213_v26 = vunpack.i.l.bf16 %v7212_v25  ;;  %v7197_v25 = vpop.permute.xlu1 %7196 }
 0x751   :  { %v7199_v49 = vunpack.i.h.bf16 %v7197_v25 }
 0x752   :  { %v5268_v59 = vmax.f32 %v9880_v50, %v7214_v40  ;;  %v5267_v46 = vmax.f32 %v9874_v5, %v7213_v26  ;;  %v5254_v50 = vmax.f32 %v9789_v18, %v7184_v11  ;;  %v5253_v5 = vmax.f32 %v9783_v36, %v7183_v31 }
 0x754   :  { %v9986_v60 = vpack.c.bf16 %v5268_v59, %v5267_v46  ;;  %v10000_v0 = vpack.c.bf16 %v5254_v50, %v5253_v5  ;;  %v7198_v59 = vunpack.i.l.bf16 %v7197_v25  ;;  %v7202_v11 = vpop.permute.xlu1 %7201 }
 0x755   :  { %v7204_v50 = vunpack.i.h.bf16 %v7202_v11  ;;  %v7203_v5 = vunpack.i.l.bf16 %v7202_v11  ;;  %v7369_v11 = vld [vmem:[#allocation4 + $0x70] sm:$0xff]  }
 0x756   :  { %6475 = vmatprep.subr.bf16.mxu0 %v9986_v60  ;;  %6519 = vmatprep.subr.bf16.mxu1 %v9986_v60 }
 0x757   :  { %v7217_v47 = vpop.permute.xlu0 %7216  ;;  %6476 = vmatpush3.bf16.msra.mxu0 %v9988_v53  ;;  %6520 = vmatpush3.bf16.msra.mxu1 %v9988_v53 }
 0x758   :  { %v7219_v16 = vunpack.i.h.bf16 %v7217_v47  ;;  %v7218_v21 = vunpack.i.l.bf16 %v7217_v47 }
 0x75a   :  { %v5270_v55 = vmax.f32 %v9893_v7, %v7219_v16  ;;  %v5269_v43 = vmax.f32 %v9887_v29, %v7218_v21  ;;  %v5256_v7 = vmax.f32 %v9802_v56, %v7189_v62  ;;  %v5255_v29 = vmax.f32 %v9796_v44, %v7188_v57 }
 0x75c   :  { %v9998_v42 = vpack.c.bf16 %v5270_v55, %v5269_v43  ;;  %v10012_v28 = vpack.c.bf16 %v5256_v7, %v5255_v29  ;;  %v7207_v55 = vpop.permute.xlu1 %7206 }
 0x75e   :  { %6477 = vmatprep.subr.bf16.mxu0 %v9998_v42  ;;  %6521 = vmatprep.subr.bf16.mxu1 %v9998_v42 }
 0x75f   :  { %v7222_v34 = vpop.permute.xlu0 %7221  ;;  %6478 = vmatpush3.bf16.msra.mxu0 %v10000_v0  ;;  %6522 = vmatpush3.bf16.msra.mxu1 %v10000_v0 }
 0x760   :  { %v7224_v36 = vunpack.i.h.bf16 %v7222_v34  ;;  %v7223_v18 = vunpack.i.l.bf16 %v7222_v34  ;;  %v7252_v7 = vpop.permute.xlu1 %7251 }
 0x761   :  { %v7254_v24 = vunpack.i.h.bf16 %v7252_v7 }
 0x762   :  { %v5272_v12 = vmax.f32 %v9906_v13, %v7224_v36  ;;  %v5271_v27 = vmax.f32 %v9900_v9, %v7223_v18  ;;  %v5258_v13 = vmax.f32 %v9815_v10, %v7194_v3  ;;  %v5257_v9 = vmax.f32 %v9809_v30, %v7193_v33 }
 0x763   :  { %v7209_v36 = vunpack.i.h.bf16 %v7207_v55  ;;  %v7208_v18 = vunpack.i.l.bf16 %v7207_v55 }
 0x764   :  { %v10010_v35 = vpack.c.bf16 %v5272_v12, %v5271_v27  ;;  %v10024_v23 = vpack.c.bf16 %v5258_v13, %v5257_v9  ;;  %v7253_v12 = vunpack.i.l.bf16 %v7252_v7  ;;  %v5266_v9 = vmax.f32 %v9867_v1, %v7254_v24  ;;  %v7345_v1 = vld [vmem:[#allocation4 + $0x40] sm:$0xff]  }
 0x765   :  { %v7377_v24 = vld [vmem:[%s10183_s7] sm:$0xff]  }
 0x766   :  { %6479 = vmatprep.subr.bf16.mxu0 %v10010_v35  ;;  %6523 = vmatprep.subr.bf16.mxu1 %v10010_v35  ;;  %v5265_v25 = vmax.f32 %v9861_v15, %v7253_v12 }
 0x767   :  { %v7227_v48 = vpop.permute.xlu0 %7226  ;;  %6480 = vmatpush3.bf16.msra.mxu0 %v10012_v28  ;;  %6524 = vmatpush3.bf16.msra.mxu1 %v10012_v28 }
 0x768   :  { %v7229_v44 = vunpack.i.h.bf16 %v7227_v48  ;;  %v7228_v56 = vunpack.i.l.bf16 %v7227_v48  ;;  %v10074_v15 = vpack.c.bf16 %v5266_v9, %v5265_v25 }
 0x76a   :  { %v5274_v40 = vmax.f32 %v9919_v32, %v7229_v44  ;;  %v5273_v26 = vmax.f32 %v9913_v2, %v7228_v56  ;;  %v5260_v32 = vmax.f32 %v9828_v20, %v7199_v49  ;;  %v5259_v2 = vmax.f32 %v9822_v14, %v7198_v59  ;;  %v7357_v49 = vld [vmem:[#allocation4 + $0x58] sm:$0xff]  }
 0x76b   :  { %v7358_v59 = vld [vmem:[#allocation4 + $0x18] sm:$0xff]  }
 0x76c   :  { %v10022_v19 = vpack.c.bf16 %v5274_v40, %v5273_v26  ;;  %v10036_v21 = vpack.c.bf16 %v5260_v32, %v5259_v2  ;;  %v7353_v40 = vld [vmem:[#allocation4 + $0x50] sm:$0xff]   ;;  %v7366_v32 = vld [vmem:[#allocation4 + $0x28] sm:$0xff]  }
 0x76d   :  { %v7354_v26 = vld [vmem:[#allocation4 + $0x10] sm:$0xff]   ;;  %v7367_v2 = vld [vmem:[#allocation4 + $0xe8] sm:$0xff]  }
 0x76e   :  { %6481 = vmatprep.subr.bf16.mxu0 %v10022_v19  ;;  %6525 = vmatprep.subr.bf16.mxu1 %v10022_v19 }
 0x76f   :  { %v7232_v46 = vpop.permute.xlu0 %7231  ;;  %6482 = vmatpush3.bf16.msra.mxu0 %v10024_v23  ;;  %6526 = vmatpush3.bf16.msra.mxu1 %v10024_v23 }
 0x770   :  { %v7234_v30 = vunpack.i.h.bf16 %v7232_v46  ;;  %v7233_v10 = vunpack.i.l.bf16 %v7232_v46  ;;  %v7361_v46 = vld [vmem:[#allocation4 + $0x60] sm:$0xff]  }
 0x772   :  { %v5276_v31 = vmax.f32 %v9932_v38, %v7234_v30  ;;  %v5275_v47 = vmax.f32 %v9926_v22, %v7233_v10  ;;  %v5262_v38 = vmax.f32 %v9841_v41, %v7204_v50  ;;  %v5261_v22 = vmax.f32 %v9835_v45, %v7203_v5  ;;  %v7362_v30 = vld [vmem:[#allocation4 + $0x20] sm:$0xff]   ;;  %v7365_v10 = vld [vmem:[#allocation4 + $0x68] sm:$0xff]   ;;  %v7372_v50 = vld [vmem:[#allocation4 + $0xb0] sm:$0xff]  }
 0x773   :  { %v7375_v5 = vld [vmem:[#allocation4 + $0xf8] sm:$0xff]  }
 0x774   :  { %v10034_v16 = vpack.c.bf16 %v5276_v31, %v5275_v47  ;;  %v10048_v34 = vpack.c.bf16 %v5262_v38, %v5261_v22  ;;  %v7370_v31 = vld [vmem:[#allocation4 + $0x30] sm:$0xff]  }
 0x775   :  { %v7371_v47 = vld [vmem:[#allocation4 + $0xf0] sm:$0xff]  }
 0x776   :  { %6483 = vmatprep.subr.bf16.mxu0 %v10034_v16  ;;  %6527 = vmatprep.subr.bf16.mxu1 %v10034_v16 }
 0x777   :  { %v7237_v61 = vpop.permute.xlu0 %7236  ;;  %6484 = vmatpush3.bf16.msra.mxu0 %v10036_v21  ;;  %6528 = vmatpush3.bf16.msra.mxu1 %v10036_v21 }
 0x778   :  { %v7239_v14 = vunpack.i.h.bf16 %v7237_v61  ;;  %v7238_v20 = vunpack.i.l.bf16 %v7237_v61  ;;  %v7376_v61 = vld [vmem:[#allocation4 + $0xb8] sm:$0xff]  }
 0x77a   :  { %v5278_v43 = vmax.f32 %v9945_v17, %v7239_v14  ;;  %v5277_v62 = vmax.f32 %v9939_v54, %v7238_v20  ;;  %v5264_v54 = vmax.f32 %v9854_v37, %v7209_v36  ;;  %v5263_v17 = vmax.f32 %v9848_v8, %v7208_v18 }
 0x77b   :  { %v7475_v14 = vmov 0.0  }
 0x77c   :  { %v10046_v57 = vpack.c.bf16 %v5278_v43, %v5277_v62  ;;  %v10060_v13 = vpack.c.bf16 %v5264_v54, %v5263_v17 }
 0x77e   :  { %6485 = vmatprep.subr.bf16.mxu0 %v10046_v57  ;;  %6529 = vmatprep.subr.bf16.mxu1 %v10046_v57 }
 0x77f   :  { %v7242_v29 = vpop.permute.xlu0 %7241  ;;  %6486 = vmatpush3.bf16.msra.mxu0 %v10048_v34  ;;  %6530 = vmatpush3.bf16.msra.mxu1 %v10048_v34 }
 0x780   :  { %v7244_v45 = vunpack.i.h.bf16 %v7242_v29  ;;  %v7243_v41 = vunpack.i.l.bf16 %v7242_v29 }
 0x782   :  { %v5280_v27 = vmax.f32 %v9957_v52, %v7244_v45  ;;  %v5279_v3 = vmax.f32 %v9952_v63, %v7243_v41  ;;  %v7346_v52 = vld [vmem:[#allocation4] sm:$0xff]  }
 0x783   :  { %v7247_v33 = vpop.permute.xlu0 %7246 }
 0x784   :  { %v10058_v48 = vpack.c.bf16 %v5280_v27, %v5279_v3  ;;  %v7249_v44 = vunpack.i.h.bf16 %v7247_v33  ;;  %v7248_v56 = vunpack.i.l.bf16 %v7247_v33  ;;  %v7378_v27 = vld [vmem:[%s10183_s7 + $0x8] sm:$0xff]   ;;  %v7379_v3 = vld [vmem:[%s10183_s7 + $0x10] sm:$0xff]   ;;  %v7380_v33 = vld [vmem:[%s10183_s7 + $0x18] sm:$0xff]  }
 0x786   :  { %v5282_v37 = vmax.f32 %v9962_v51, %v7249_v44  ;;  %v5281_v8 = vmax.f32 %v9966_v4, %v7248_v56  ;;  %6487 = vmatprep.subr.bf16.mxu0 %v10058_v48  ;;  %6531 = vmatprep.subr.bf16.mxu1 %v10058_v48  ;;  %v7349_v51 = vld [vmem:[#allocation4 + $0x48] sm:$0xff]  }
 0x787   :  { %6488 = vmatpush3.bf16.msra.mxu0 %v10060_v13  ;;  %6532 = vmatpush3.bf16.msra.mxu1 %v10060_v13  ;;  %v7350_v4 = vld [vmem:[#allocation4 + $0x8] sm:$0xff]  }
 0x788   :  { %v10071_v63 = vpack.c.bf16 %v5282_v37, %v5281_v8 }
 0x78a   :  { %6489 = vmatprep.subr.bf16.mxu0 %v10071_v63  ;;  %6533 = vmatprep.subr.bf16.mxu1 %v10071_v63 }
 0x78b   :  { %6490 = vmatpush3.bf16.msra.mxu0 %v10074_v15  ;;  %6534 = vmatpush3.bf16.msra.mxu1 %v10074_v15 }
 0x78c   :  { %6497 = vmatprep.subr.bf16.mxu0 %v9986_v60  ;;  %6563 = vmatprep.subr.bf16.mxu1 %v7345_v1  ;;  %v7383_v1 = vld [vmem:[%s10183_s7 + $0x30] sm:$0xff]  }
 0x78e   :  { %6411 = vmatmul.mubr.msk.bf16.vlgmr.msra.gmra.mrb[64].mxu0 %vm6410_vm5, %v7474_v6  ;;  %6419 = vmatmul.mubr.msk.bf16.vlgmr.msra.gmra.mrb[64].mxu1 %vm6418_vm4, %v7474_v6 }
 0x78f   :  { %6498 = vmatpush3.bf16.msra.mxu0 %v9988_v53  ;;  %6413 = vmatprep.mubr.msk.bf16.mxu0 %vm6412_vm6, %v7474_v6 }
 0x790   :  { %6499 = vmatprep.subr.bf16.mxu0 %v9998_v42  ;;  %6564 = vmatpush3.bf16.msra.mxu1 %v7346_v52  ;;  %v7385_v52 = vld [vmem:[#allocation6] sm:$0xff]  }
 0x791   :  { %6565 = vmatprep.subr.bf16.mxu1 %v7349_v51  ;;  %v7386_v51 = vld [vmem:[#allocation6 + $0x8] sm:$0xff]  }
 0x793   :  { %6500 = vmatpush3.bf16.msra.mxu0 %v10000_v0 }
 0x794   :  { %6501 = vmatprep.subr.bf16.mxu0 %v10010_v35  ;;  %6566 = vmatpush3.bf16.msra.mxu1 %v7350_v4  ;;  %v7387_v4 = vld [vmem:[#allocation6 + $0x10] sm:$0xff]  }
 0x795   :  { %6567 = vmatprep.subr.bf16.mxu1 %v7353_v40  ;;  %v7388_v40 = vld [vmem:[#allocation6 + $0x18] sm:$0xff]  }
 0x797   :  { %6502 = vmatpush3.bf16.msra.mxu0 %v10012_v28 }
 0x798   :  { %6503 = vmatprep.subr.bf16.mxu0 %v10022_v19  ;;  %6568 = vmatpush3.bf16.msra.mxu1 %v7354_v26  ;;  %v7389_v26 = vld [vmem:[#allocation6 + $0x20] sm:$0xff]  }
 0x799   :  { %6569 = vmatprep.subr.bf16.mxu1 %v7357_v49  ;;  %v7390_v49 = vld [vmem:[#allocation6 + $0x28] sm:$0xff]  }
 0x79b   :  { %6504 = vmatpush3.bf16.msra.mxu0 %v10024_v23 }
 0x79c   :  { %6505 = vmatprep.subr.bf16.mxu0 %v10034_v16  ;;  %6570 = vmatpush3.bf16.msra.mxu1 %v7358_v59 }
 0x79d   :  { %6571 = vmatprep.subr.bf16.mxu1 %v7361_v46 }
 0x79f   :  { %6506 = vmatpush3.bf16.msra.mxu0 %v10036_v21 }
 0x7a0   :  { %6507 = vmatprep.subr.bf16.mxu0 %v10046_v57  ;;  %6572 = vmatpush3.bf16.msra.mxu1 %v7362_v30 }
 0x7a1   :  { %6573 = vmatprep.subr.bf16.mxu1 %v7365_v10 }
 0x7a3   :  { %6508 = vmatpush3.bf16.msra.mxu0 %v10048_v34 }
 0x7a4   :  { %6509 = vmatprep.subr.bf16.mxu0 %v10058_v48  ;;  %6574 = vmatpush3.bf16.msra.mxu1 %v7366_v32 }
 0x7a5   :  { %6575 = vmatprep.subr.bf16.mxu1 %v7369_v11  ;;  %v6457_v11 = vld [vmem:[%s10184_s8] ss:$0 sm:$0xff] }
 0x7a7   :  { %6510 = vmatpush3.bf16.msra.mxu0 %v10060_v13 }
 0x7a8   :  { %6511 = vmatprep.subr.bf16.mxu0 %v10071_v63  ;;  %6576 = vmatpush3.bf16.msra.mxu1 %v7370_v31 }
 0x7ab   :  { %6512 = vmatpush3.bf16.msra.mxu0 %v10074_v15 }
 0x7ac   :  { %6541 = vmatprep.subr.bf16.mxu0 %v9986_v60  ;;  %v7348_v60 = vld [vmem:[#allocation4 + $0x80] sm:$0xff]  }
 0x7ae   :  { %6415 = vmatmul.mubr.msk.bf16.vlgmr.msra.gmra.mrb[68].mxu0 %vm6414_vm9, %v7474_v6 }
 0x7af   :  { %6542 = vmatpush3.bf16.msra.mxu0 %v9988_v53  ;;  %6421 = vmatprep.mubr.msk.bf16.mxu0 %vm6420_vm10, %v7474_v6  ;;  %v7351_v53 = vld [vmem:[#allocation4 + $0xc8] sm:$0xff]  }
 0x7b0   :  { %6543 = vmatprep.subr.bf16.mxu0 %v9998_v42  ;;  %v7352_v42 = vld [vmem:[#allocation4 + $0x88] sm:$0xff]  }
 0x7b3   :  { %6544 = vmatpush3.bf16.msra.mxu0 %v10000_v0  ;;  %v7355_v0 = vld [vmem:[#allocation4 + $0xd0] sm:$0xff]  }
 0x7b4   :  { %6545 = vmatprep.subr.bf16.mxu0 %v10010_v35  ;;  %v7356_v35 = vld [vmem:[#allocation4 + $0x90] sm:$0xff]  }
 0x7b7   :  { %6546 = vmatpush3.bf16.msra.mxu0 %v10012_v28  ;;  %v7359_v28 = vld [vmem:[#allocation4 + $0xd8] sm:$0xff]  }
 0x7b8   :  { %6547 = vmatprep.subr.bf16.mxu0 %v10022_v19  ;;  %v7360_v19 = vld [vmem:[#allocation4 + $0x98] sm:$0xff]  }
 0x7bb   :  { %6548 = vmatpush3.bf16.msra.mxu0 %v10024_v23  ;;  %v7364_v23 = vld [vmem:[#allocation4 + $0xa0] sm:$0xff]  }
 0x7bc   :  { %6549 = vmatprep.subr.bf16.mxu0 %v10034_v16  ;;  %v7373_v16 = vld [vmem:[#allocation4 + $0x78] sm:$0xff]  }
 0x7bd   :  { %6577 = vmatprep.subr.bf16.mxu1 %v7373_v16 }
 0x7bf   :  { %6550 = vmatpush3.bf16.msra.mxu0 %v10036_v21  ;;  %v7374_v21 = vld [vmem:[#allocation4 + $0x38] sm:$0xff]  }
 0x7c0   :  { %6551 = vmatprep.subr.bf16.mxu0 %v10046_v57  ;;  %6578 = vmatpush3.bf16.msra.mxu1 %v7374_v21 }
 0x7c1   :  { %6625 = vmatprep.subr.bf16.mxu1 %v7475_v14 }
 0x7c3   :  { %6552 = vmatpush3.bf16.msra.mxu0 %v10048_v34 }
 0x7c4   :  { %6553 = vmatprep.subr.bf16.mxu0 %v10058_v48  ;;  %v7381_v48 = vld [vmem:[%s10183_s7 + $0x20] sm:$0xff]  }
 0x7c7   :  { %6554 = vmatpush3.bf16.msra.mxu0 %v10060_v13 }
 0x7c8   :  { %6555 = vmatprep.subr.bf16.mxu0 %v10071_v63  ;;  %v7382_v63 = vld [vmem:[%s10183_s7 + $0x28] sm:$0xff]  }
 0x7cb   :  { %6556 = vmatpush3.bf16.msra.mxu0 %v10074_v15  ;;  %v7384_v15 = vld [vmem:[%s10183_s7 + $0x38] sm:$0xff]  }
 0x7cc   :  { %6585 = vmatprep.subr.bf16.mxu0 %v7347_v39 }
 0x7ce   :  { %6423 = vmatmul.mubr.msk.bf16.vlgmr.msra.gmra.mrb[72].mxu0 %vm6422_vm12, %v7474_v6  ;;  %v7368_v6 = vld [vmem:[#allocation4 + $0xa8] sm:$0xff]  }
 0x7cf   :  { %6586 = vmatpush3.bf16.msra.mxu0 %v7348_v60 }
 0x7d0   :  { %6587 = vmatprep.subr.bf16.mxu0 %v7351_v53  ;;  %v6424_v53 = vld [vmem:[%s10182_s6] ss:$0 sm:$0xff] }
 0x7d3   :  { %6588 = vmatpush3.bf16.msra.mxu0 %v7352_v42 }
 0x7d4   :  { %6589 = vmatprep.subr.bf16.mxu0 %v7355_v0 }
 0x7d7   :  { %6590 = vmatpush3.bf16.msra.mxu0 %v7356_v35 }
 0x7d8   :  { %6591 = vmatprep.subr.bf16.mxu0 %v7359_v28 }
 0x7db   :  { %6592 = vmatpush3.bf16.msra.mxu0 %v7360_v19 }
 0x7dc   :  { %6593 = vmatprep.subr.bf16.mxu0 %v7363_v58 }
 0x7df   :  { %6594 = vmatpush3.bf16.msra.mxu0 %v7364_v23 }
 0x7e0   :  { %6595 = vmatprep.subr.bf16.mxu0 %v7367_v2  ;;  %v7391_v2 = vld [vmem:[#allocation6 + $0x30] sm:$0xff]  }
 0x7e3   :  { %6596 = vmatpush3.bf16.msra.mxu0 %v7368_v6  ;;  %v7392_v6 = vld [vmem:[#allocation6 + $0x38] sm:$0xff]  }
 0x7e4   :  { %6597 = vmatprep.subr.bf16.mxu0 %v7371_v47 }
 0x7e7   :  { %6598 = vmatpush3.bf16.msra.mxu0 %v7372_v50 }
 0x7e8   :  { %6599 = vmatprep.subr.bf16.mxu0 %v7375_v5 }
 0x7eb   :  { %6600 = vmatpush3.bf16.msra.mxu0 %v7376_v61 }
 0x7ec   :  { %6645 = vmatprep.subr.bf16.mxu0 %v7475_v14 }
 0x861   :  { %v6491_v20 = vpop.f32.mrb[64].mxu0  ;;  %v6535_v38 = vpop.f32.mrb[64].mxu1 }
 0x862   :  { %v6492_v22 = vpop.f32.mrb[65].mxu0  ;;  %v6536_v55 = vpop.f32.mrb[65].mxu1 }
 0x863   :  { %v6493_v43 = vadd.f32 %v6492_v22, %v6491_v20  ;;  %v6494_v62 = vpop.f32.mrb[66].mxu0  ;;  %v6537_v57 = vadd.f32 %v6536_v55, %v6535_v38  ;;  %v6538_v34 = vpop.f32.mrb[66].mxu1  ;;  %v6466_v20 = vld [vmem:[%s10186_s10] ss:$0 sm:$0xff] }
 0x864   :  { %v6495_v36 = vpop.f32.mrb[67].mxu0  ;;  %v6539_v18 = vpop.f32.mrb[67].mxu1 }
 0x865   :  { %v5491_v12 = vpack.c.bf16 %v6493_v43, %v6493_v43  ;;  %v5493_v25 = vpack.c.bf16 %v6537_v57, %v6537_v57 }
 0x881   :  { %v6513_v7 = vpop.f32.mrb[68].mxu0 }
 0x882   :  { %v6514_v29 = vpop.f32.mrb[69].mxu0 }
 0x883   :  { %v6515_v45 = vadd.f32 %v6514_v29, %v6513_v7  ;;  %v6516_v41 = vpop.f32.mrb[70].mxu0 }
 0x884   :  { %v6517_v54 = vpop.f32.mrb[71].mxu0 }
 0x885   :  { %v5492_v17 = vpack.c.bf16 %v6515_v45, %v6515_v45 }
 0x887   :  { %5790 = vmatprep.mubr.bf16.mxu1 %v5492_v17 }
 0x888   :  { %5791 = vmatmul.mubr.bf16.vlgmr.msra.gmra.mrb[68].mxu1 %v5491_v12 }
 0x889   :  { %6626 = vmatpush3.bf16.msra.mxu1 %v7377_v24  ;;  %6641 = vmatprep.mubr.msk.bf16.mxu1 %vm7476_vm13, %v7475_v14 }
 0x88a   :  { %6627 = vmatprep.subr.bf16.mxu1 %v7475_v14 }
 0x88d   :  { %6628 = vmatpush3.bf16.msra.mxu1 %v7378_v27 }
 0x88e   :  { %6629 = vmatprep.subr.bf16.mxu1 %v7475_v14 }
 0x891   :  { %6630 = vmatpush3.bf16.msra.mxu1 %v7379_v3 }
 0x892   :  { %6631 = vmatprep.subr.bf16.mxu1 %v7475_v14 }
 0x895   :  { %6632 = vmatpush3.bf16.msra.mxu1 %v7380_v33 }
 0x896   :  { %6633 = vmatprep.subr.bf16.mxu1 %v7475_v14 }
 0x899   :  { %6634 = vmatpush3.bf16.msra.mxu1 %v7381_v48 }
 0x89a   :  { %6635 = vmatprep.subr.bf16.mxu1 %v7475_v14 }
 0x89d   :  { %6636 = vmatpush3.bf16.msra.mxu1 %v7382_v63 }
 0x89e   :  { %6637 = vmatprep.subr.bf16.mxu1 %v7475_v14 }
 0x8a1   :  { %v6557_v44 = vpop.f32.mrb[72].mxu0  ;;  %6638 = vmatpush3.bf16.msra.mxu1 %v7383_v1 }
 0x8a2   :  { %v6558_v56 = vpop.f32.mrb[73].mxu0  ;;  %6639 = vmatprep.subr.bf16.mxu1 %v7475_v14 }
 0x8a3   :  { %v6559_v13 = vadd.f32 %v6558_v56, %v6557_v44  ;;  %v6560_v9 = vpop.f32.mrb[74].mxu0 }
 0x8a4   :  { %v6561_v37 = vpop.f32.mrb[75].mxu0 }
 0x8a5   :  { %v5494_v8 = vpack.c.bf16 %v6559_v13, %v6559_v13  ;;  %6640 = vmatpush3.bf16.msra.mxu1 %v7384_v15 }
 0x8a7   :  { %5830 = vmatprep.mubr.bf16.mxu0 %v5494_v8 }
 0x8a8   :  { %5831 = vmatmul.mubr.bf16.vlgmr.msra.gmra.mrb[76].mxu0 %v5493_v25 }
 0x8a9   :  { %6661 = vmatprep.mubr.msk.bf16.mxu0 %vm7476_vm13, %v7475_v14  ;;  %6646 = vmatpush3.bf16.msra.mxu0 %v7385_v52 }
 0x8aa   :  { %6647 = vmatprep.subr.bf16.mxu0 %v7475_v14 }
 0x8ad   :  { %6648 = vmatpush3.bf16.msra.mxu0 %v7386_v51 }
 0x8ae   :  { %6649 = vmatprep.subr.bf16.mxu0 %v7475_v14 }
 0x8b1   :  { %6650 = vmatpush3.bf16.msra.mxu0 %v7387_v4 }
 0x8b2   :  { %6651 = vmatprep.subr.bf16.mxu0 %v7475_v14 }
 0x8b5   :  { %6652 = vmatpush3.bf16.msra.mxu0 %v7388_v40 }
 0x8b6   :  { %6653 = vmatprep.subr.bf16.mxu0 %v7475_v14 }
 0x8b9   :  { %6654 = vmatpush3.bf16.msra.mxu0 %v7389_v26 }
 0x8ba   :  { %6655 = vmatprep.subr.bf16.mxu0 %v7475_v14 }
 0x8bd   :  { %6656 = vmatpush3.bf16.msra.mxu0 %v7390_v49 }
 0x8be   :  { %6657 = vmatprep.subr.bf16.mxu0 %v7475_v14 }
 0x8c1   :  { %6658 = vmatpush3.bf16.msra.mxu0 %v7391_v2 }
 0x8c2   :  { %6659 = vmatprep.subr.bf16.mxu0 %v7475_v14 }
 0x8c5   :  { %6660 = vmatpush3.bf16.msra.mxu0 %v7392_v6 }
 0x95b   :  { %v6579_v59 = vpop.f32.mrb[68].mxu1 }
 0x95c   :  { %v6580_v46 = vpop.f32.mrb[69].mxu1 }
 0x95d   :  { %v6581_v30 = vadd.f32 %v6580_v46, %v6579_v59  ;;  %v6582_v39 = vpop.f32.mrb[70].mxu1 }
 0x95e   :  { %v6583_v60 = vpop.f32.mrb[71].mxu1 }
 0x95f   :  { %v5793_v35 = vadd.f32 %v6581_v30, %v6424_v53 }
 0x97b   :  { %v6601_v42 = vpop.f32.mrb[76].mxu0 }
 0x97c   :  { %v6602_v0 = vpop.f32.mrb[77].mxu0 }
 0x97d   :  { %v6603_v28 = vadd.f32 %v6602_v0, %v6601_v42  ;;  %v6604_v19 = vpop.f32.mrb[78].mxu0 }
 0x97e   :  { %v6605_v58 = vpop.f32.mrb[79].mxu0 }
 0x97f   :  { %v5833_v23 = vadd.f32 %v6603_v28, %v5793_v35 }
 0x981   :  { %v5838_v10 = vmax.f32 %v5833_v23, 0.0 }
 0x983   :  { %v5839_v32 = vpack.c.bf16 %v5838_v10, %v5838_v10 }
 0x985   :  { %6642 = vmatmul.mubr.bf16.vlgmr.msra.gmra.mrb[72].mxu1 %v5839_v32 }
 0xa58   :  { %v5945_v31 = vpop.f32.mrb[72].mxu1 }
 0xa59   :  { %v5946_v47 = vadd.f32 %v6457_v11, %v5945_v31  ;;  %v6643_v16 = vpop.f32.mrb[73].mxu1 }
 0xa5a   :  { %v5948_v21 = vpop.f32.mrb[74].mxu1 }
 0xa5b   :  { %v5951_v50 = vmax.f32 %v5946_v47, 0.0  ;;  %v6644_v5 = vpop.f32.mrb[75].mxu1 }
 0xa5d   :  { %v5952_v61 = vpack.c.bf16 %v5951_v50, %v5951_v50 }
 0xa5f   :  { %6662 = vmatmul.mubr.bf16.vlgmr.msra.gmra.mrb[80].mxu0 %v5952_v61 }
 0xb32   :  { %v6058_v38 = vpop.f32.mrb[80].mxu0 }
 0xb33   :  { %v6059_v22 = vadd.f32 %v6466_v20, %v6058_v38  ;;  %v6663_v14 = vpop.f32.mrb[81].mxu0 }
 0xb34   :  { %v6061_v55 = vpop.f32.mrb[82].mxu0 }
 0xb35   :  { %6064 = vst [vmem:[%s10187_s11] sm:$0xff] %v6059_v22  ;;  %v6664_v43 = vpop.f32.mrb[83].mxu0 }
 0xb36   :  { %6069 = vsyncpa [#allocation3], 1 }
 0xb37   :  { %6070 = vsyncpa [#allocation5], 1 }

</bundles_post_ra>
